<compile_context>
chip_gen: v5e
topology: v5e:2x2
jax: 0.10.0
libtpu: 0.0.40
codegen_flags: <defaults>
</compile_context>

<pallas_src>
import math

import numpy as np
import jax
import jax.numpy as jnp
from jax.experimental import pallas as pl
from jax.experimental.pallas import tpu as pltpu


# ----------------------------------------------------------------------------
# helpers
# ----------------------------------------------------------------------------
def _round_up(x, m):
    return (x + m - 1) // m * m


def _choose_tb(n, cap=8):
    """Samples per grid step: amortize the ~0.35us per-step overhead, but keep
    the grid extent >= 2 so the 'parallel' axis feeds both v7x TensorCores."""
    for tb in range(min(cap, n // 2), 0, -1):
        if n % tb == 0:
            return tb
    return 1


def _vmem_limit_or_none(need_bytes):
    """Deliberate scoped-VMEM budgeting: keep the conservative compiler default
    when it suffices; raise it explicitly (capped below v7x's 64 MiB physical
    VMEM) only when the pipelined blocks actually need it."""
    budget = 3 * int(need_bytes)
    if budget <= (16 << 20):
        return None
    return int(min(budget, 56 << 20))


def _acos_approx(x):
    # Abramowitz & Stegun 4.4.45 (|err| < 7e-5); avoids relying on acos lowering.
    ax = jnp.abs(x)
    p = 1.5707288 + ax * (-0.2121144 + ax * (0.074261 + ax * (-0.0187293)))
    r = jnp.sqrt(jnp.maximum(1.0 - ax, 0.0)) * p
    return jnp.where(x >= 0.0, r, math.pi - r)


# ----------------------------------------------------------------------------
# Kernel 1 (fused): contour -> winding mask -> distance map -> isoline gaussians
# ----------------------------------------------------------------------------
def _make_contour_iso_kernel(K, HW, HWp, S8, size, TB, iso_vals, neg_inv_vars,
                             eps=1e-4):
    I = len(iso_vals)
    inv = 1.0 / float(size - 1) if size > 1 else 1.0
    iso_vals = [float(v) for v in iso_vals]
    neg_inv_vars = [float(v) for v in neg_inv_vars]

    def kernel(cx_ref, cy_ref, iso_ref, mask_ref):
        step = pl.program_id(0)

        # Pixel mesh generated in-kernel (no px/py input DMA streams).  The
        # flattened H*W axis is laid out dense over (sublane, lane) = (S8, 128)
        # so VPU/EUP work runs on full vregs, not a 1-sublane (1, HW) strip.
        r = jax.lax.broadcasted_iota(jnp.int32, (S8, 128), 0).astype(jnp.float32)
        c = jax.lax.broadcasted_iota(jnp.int32, (S8, 128), 1).astype(jnp.float32)
        lin = r * 128.0 + c                           # flat pixel index (exact in f32)
        py_i = jnp.floor((lin + 0.5) * (1.0 / size))  # idx // size (robust floor)
        px_i = lin - py_i * size                      # idx %  size
        px = px_i * inv
        py = py_i * inv

        for b in range(TB):                           # static, TB <= 8
            s = step * TB + b                         # sample index (SMEM scalars)

            # K-chunked running accumulators: only O(S8*128) live VMEM per
            # iteration instead of ~10 (K, HW) temporaries -> safe for the
            # v7x 64 MiB VMEM budget at large size/K.
            def body(k, carry):
                min_d, wind = carry
                kn = (k + 1) % K
                x0 = cx_ref[s, k]
                y0 = cy_ref[s, k]
                x1 = cx_ref[s, kn]
                y1 = cy_ref[s, kn]
                dx, dy = x0 - px, y0 - py
                dxn, dyn = x1 - px, y1 - py
                d0 = jnp.sqrt(dx * dx + dy * dy)
                d1 = jnp.sqrt(dxn * dxn + dyn * dyn)
                min_d = jnp.minimum(min_d, d0)
                cross = dx * dyn - dy * dxn
                # hard sign instead of tanh(1e4*x): module is forward-only
                # (requires_grad_(False) upstream); keeps the EUP free.
                sgn = jnp.where(cross >= 0.0, 1.0, -1.0)
                dot = dx * dxn + dy * dyn
                cosang = jnp.clip(
                    dot * pl.reciprocal(d0 * d1 + eps, approx=True),
                    -1.0 + eps, 1.0 - eps)
                wind = wind + sgn * _acos_approx(cosang)
                return min_d, wind

            init = (jnp.full((S8, 128), jnp.inf, dtype=jnp.float32),
                    jnp.zeros((S8, 128), dtype=jnp.float32))
            min_d, wind = jax.lax.fori_loop(0, K, body, init, unroll=True)

            # TODO(synk): winding-number mask + max-normalized masked distance
            # reproduce the reference-repo Contour_to_distance_map semantics;
            # the original class source was not provided.
            m = jnp.clip(jnp.abs(wind) * (0.5 / math.pi), 0.0, 1.0)
            if HWp != HW:                             # zero out padded pixels
                m = m * (lin < float(HW)).astype(jnp.float32)
            d = min_d * m
            mx = jnp.max(d).reshape(1, 1)
            d = d * pl.reciprocal(mx + eps, approx=True)

            # Fused Distance_map_to_isoline_features gaussians: the distance
            # map never touches HBM.  Each isoline row is a full dense
            # (S8, 128) tile store (static index, unmasked lanes).
            for i in range(I):
                diff = d - iso_vals[i]
                iso_ref[b, i] = m * jnp.exp(diff * diff * neg_inv_vars[i])
            mask_ref[b, 0] = m

    return kernel


def contour_to_isoline_images(contour, size, iso_vals, neg_inv_vars):
    """contour: (B, N, K, 2) float32 closed polygon, (x, y) in [0, 1]^2.
    Returns (iso_img (B, I, size, size), mask (B, 1, size, size))."""
    B, N, K, _ = contour.shape
    assert N == 1, "isoline broadcast (isolines[None,:,None,None] - dmap) requires N == 1"
    BN = B * N
    HW = size * size
    S8 = pl.cdiv(HW, 128)
    HWp = S8 * 128
    I = len(iso_vals)

    cx = contour[..., 0].reshape(BN, K).astype(jnp.float32)
    cy = contour[..., 1].reshape(BN, K).astype(jnp.float32)

    TB = _choose_tb(BN)
    grid = (BN // TB,)

    # contour coordinates live in SMEM (scalar reads inside the K loop): no
    # (1, K, 1) lane-sparse VMEM block, no in-kernel relayout, no rolled copies.
    smem_spec = pl.BlockSpec(memory_space=pltpu.MemorySpace.SMEM)
    iso_spec = pl.BlockSpec((TB, I, S8, 128), lambda i: (i, 0, 0, 0))
    msk_spec = pl.BlockSpec((TB, 1, S8, 128), lambda i: (i, 0, 0, 0))

    need = 2 * TB * (I + 1) * HWp * 4 + 16 * HWp * 4   # dbl-buffered outs + temps
    iso, msk = pl.pallas_call(
        _make_contour_iso_kernel(K, HW, HWp, S8, size, TB, iso_vals, neg_inv_vars),
        out_shape=(jax.ShapeDtypeStruct((BN, I, S8, 128), jnp.float32),
                   jax.ShapeDtypeStruct((BN, 1, S8, 128), jnp.float32)),
        grid=grid,
        in_specs=[smem_spec, smem_spec],
        out_specs=(iso_spec, msk_spec),
        compiler_params=pltpu.CompilerParams(
            dimension_semantics=("parallel",),
            vmem_limit_bytes=_vmem_limit_or_none(need)),
    )(cx, cy)

    iso = iso.reshape(BN, I, HWp)
    msk = msk.reshape(BN, 1, HWp)
    if HWp != HW:
        iso = iso[:, :, :HW]
        msk = msk[:, :, :HW]
    return iso.reshape(B, I, size, size), msk.reshape(B, 1, size, size)


# ----------------------------------------------------------------------------
# Kernel 2: isoline-/mask-weighted feature pooling (single bf16 MXU matmul)
# ----------------------------------------------------------------------------
def _make_pool_kernel(TB, Rp, C, Cp, eps=1e-12):
    def kernel(act_ref, w_ref, out_ref):
        for b in range(TB):                                   # static, TB <= 8
            a = act_ref[b]                                    # (C, hw) bf16
            w = w_ref[b]                                      # (Rp, hw) f32
            # one MXU pass for all isoline rows + the mask row (rows padded to 8)
            num = jax.lax.dot_general(
                w.astype(jnp.bfloat16), a,
                (((1,), (1,)), ((), ())),
                preferred_element_type=jnp.float32)           # (Rp, C)
            den = jnp.sum(w, axis=1, keepdims=True)           # (Rp, 1), one reduce
            # eps guards empty/off-image contours (reference would emit NaN/Inf);
            # <=1e-9 relative effect for any non-degenerate mask.
            res = num * pl.reciprocal(den + eps, approx=True)
            if Cp != C:
                # lane-pad so the writeback is one unmasked (8, 128k) store
                res = jnp.concatenate(
                    [res, jnp.zeros((Rp, Cp - C), jnp.float32)], axis=-1)
            out_ref[b] = res
    return kernel


def pooled_features(act, iso_img, mask_img=None, eps=1e-12):
    """act (B, C, h, w), iso_img (B, I, h, w), mask_img (B, 1, h, w) or None
    -> (features_isolines (B, I, C), features_mask (B, 1, C) or None)."""
    B, C, h, w = act.shape
    hw = h * w
    I = iso_img.shape[1]

    parts = [iso_img.reshape(B, I, hw).astype(jnp.float32)]
    if mask_img is not None:
        parts.append(mask_img.reshape(B, 1, hw).astype(jnp.float32))
    wgt = jnp.concatenate(parts, axis=1) if len(parts) > 1 else parts[0]
    R = wgt.shape[1]
    Rp = _round_up(R, 8)                      # sublane-pad the weight rows
    if Rp != R:
        wgt = jnp.concatenate(
            [wgt, jnp.zeros((B, Rp - R, hw), jnp.float32)], axis=1)
    Cp = _round_up(C, 128)                    # lane-dense output width

    # bf16 activation stream: halves the dominant HBM read and feeds the MXU
    # natively on v5e/v6e/v7x (accumulation stays f32).
    a = act.reshape(B, C, hw).astype(jnp.bfloat16)

    TB = _choose_tb(B)
    grid = (B // TB,)

    # TODO(synk): for real activation sizes (large C, hw) add an hw-reduction
    # grid axis ("arbitrary") with VMEM num/den accumulators so blocks stay
    # inside v7x's 64 MiB VMEM.
    need = 2 * TB * (C * hw * 2 + Rp * hw * 4 + Rp * Cp * 4)
    out = pl.pallas_call(
        _make_pool_kernel(TB, Rp, C, Cp, eps),
        out_shape=jax.ShapeDtypeStruct((B, Rp, Cp), jnp.float32),
        grid=grid,
        in_specs=[pl.BlockSpec((TB, C, hw), lambda i: (i, 0, 0)),
                  pl.BlockSpec((TB, Rp, hw), lambda i: (i, 0, 0))],
        out_specs=pl.BlockSpec((TB, Rp, Cp), lambda i: (i, 0, 0)),
        compiler_params=pltpu.CompilerParams(
            dimension_semantics=("parallel",),
            vmem_limit_bytes=_vmem_limit_or_none(need)),
    )(a, wgt)

    fiso = out[:, :I, :C]
    fmask = out[:, I:I + 1, :C] if mask_img is not None else None
    return fiso, fmask


# ----------------------------------------------------------------------------
# Module-level wrapper (mirrors Contour_to_isoline_features.forward)
# ----------------------------------------------------------------------------
class ContourToIsolineFeatures:
    def __init__(self, size, isolines, halfway_value, compute_features_mask=False):
        self.size = int(size)
        self.isolines = np.asarray(isolines, dtype=np.float32)
        self.vars = self._mean_to_var(self.isolines, float(halfway_value))
        # fold 1/var into a compile-time constant multiply inside the kernel
        self.neg_inv_vars = (-1.0 / self.vars).astype(np.float32)
        self.compute_features_mask = compute_features_mask

    @staticmethod
    def _mean_to_var(isolines, halfway_value):
        # == Distance_map_to_isoline_features.mean_to_var (cdist**2, diag->inf)
        d2 = (isolines[:, None] - isolines[None, :]) ** 2
        d2 = np.where(d2 == 0.0, np.inf, d2)
        return (-np.min(d2, axis=0) / (8.0 * np.log(halfway_value))).astype(np.float32)

    def __call__(self, contour, activations):
        iso_img, mask = contour_to_isoline_images(
            contour, self.size,
            [float(v) for v in self.isolines],
            [float(v) for v in self.neg_inv_vars])            # (B,I,H,W), (B,1,H,W)

        features_isolines, features_mask = [], []
        nb_scales = len(activations)
        for i in range(nb_scales):
            act = activations[i]
            h, w = act.shape[-2], act.shape[-1]
            # TODO(synk): jax.image.resize(bilinear) ~ F.interpolate(align_corners=False);
            # downsampling uses a triangle kernel rather than torch's point sampling.
            # TODO(synk): for large H*W fold this resize into the pooling kernel as two
            # small interpolation matmuls (R_h @ iso @ R_w^T) to drop the per-scale
            # full-resolution HBM round-trip.
            iso_s = jax.image.resize(
                iso_img, (iso_img.shape[0], iso_img.shape[1], h, w), method="bilinear")
            if self.compute_features_mask:
                mask_s = jax.image.resize(
                    mask, (mask.shape[0], mask.shape[1], h, w), method="bilinear")
            else:
                mask_s = None
            fiso, fmask = pooled_features(act, iso_s, mask_s)
            features_isolines.append(fiso)
            if self.compute_features_mask:
                features_mask.append(fmask)
        return features_isolines, features_mask


# ----------------------------------------------------------------------------
if __name__ == "__main__":
    key = jax.random.PRNGKey(0)
    B, N, K = 2, 1, 16
    size = 16
    isolines = np.array([0.0, 0.5, 1.0], dtype=np.float32)

    model = ContourToIsolineFeatures(size, isolines, halfway_value=0.5,
                                     compute_features_mask=True)

    # closed polygon contour (noisy circle) per sample, points (x, y) in [0,1]^2
    theta = np.linspace(0.0, 2.0 * np.pi, K, endpoint=False)
    k1, k2, k3 = jax.random.split(key, 3)
    radius = 0.25 + 0.05 * jax.random.uniform(k1, (B, N, 1), dtype=jnp.float32)
    cx = 0.5 + radius * jnp.asarray(np.cos(theta), jnp.float32)[None, None, :]
    cy = 0.5 + radius * jnp.asarray(np.sin(theta), jnp.float32)[None, None, :]
    contour = jnp.stack([cx, cy], axis=-1).astype(jnp.float32)        # (B,N,K,2)

    activations = {
        0: jax.random.normal(k2, (B, 4, 16, 16), dtype=jnp.float32),
        1: jax.random.normal(k3, (B, 8, 8, 8), dtype=jnp.float32),
    }

    feats_iso, feats_mask = model(contour, activations)
    feats_iso = [jax.block_until_ready(f) for f in feats_iso]
    feats_mask = [jax.block_until_ready(f) for f in feats_mask]

    assert feats_iso[0].shape == (B, 3, 4) and feats_iso[1].shape == (B, 3, 8)
    assert feats_mask[0].shape == (B, 1, 4) and feats_mask[1].shape == (B, 1, 8)
    assert all(bool(jnp.all(jnp.isfinite(f))) for f in feats_iso + feats_mask)
    print("KERNEL_OK")
</pallas_src>

<mosaic_0001>
module attributes {stable_mosaic.version = 11 : i64} {
  func.func @kernel(%arg0: i32, %arg1: memref<2x16xf32, #tpu.memory_space<smem>>, %arg2: memref<2x16xf32, #tpu.memory_space<smem>>, %arg3: memref<1x3x2x128xf32, #tpu.memory_space<vmem>>, %arg4: memref<1x1x2x128xf32, #tpu.memory_space<vmem>>) attributes {dimension_semantics = [#tpu.dimension_semantics<parallel>], iteration_bounds = array<i64: 2>, scalar_prefetch = 0 : i64, scratch_operands = 0 : i64, tpu.core_type = #tpu.core_type<tc>, window_params = [{transform_indices = @transform_0, window_bounds = array<i64: 2, 16>}, {transform_indices = @transform_1, window_bounds = array<i64: 2, 16>}, {transform_indices = @transform_2, window_bounds = array<i64: 1, 3, 2, 128>}, {transform_indices = @transform_3, window_bounds = array<i64: 1, 1, 2, 128>}]} {
    %0 = tpu.iota {dimensions = array<i32: 0>} : vector<2x128xi32>
    %1 = arith.sitofp %0 : vector<2x128xi32> to vector<2x128xf32>
    %2 = tpu.iota {dimensions = array<i32: 1>} : vector<2x128xi32>
    %3 = arith.sitofp %2 : vector<2x128xi32> to vector<2x128xf32>
    %cst = arith.constant 1.280000e+02 : f32
    %4 = vector.broadcast %cst : f32 to vector<2x128xf32>
    %5 = arith.mulf %1, %4 : vector<2x128xf32>
    %6 = arith.addf %5, %3 : vector<2x128xf32>
    %cst_0 = arith.constant 5.000000e-01 : f32
    %7 = vector.broadcast %cst_0 : f32 to vector<2x128xf32>
    %8 = arith.addf %6, %7 : vector<2x128xf32>
    %cst_1 = arith.constant 6.250000e-02 : f32
    %9 = vector.broadcast %cst_1 : f32 to vector<2x128xf32>
    %10 = arith.mulf %8, %9 : vector<2x128xf32>
    %11 = math.floor %10 : vector<2x128xf32>
    %cst_2 = arith.constant 1.600000e+01 : f32
    %12 = vector.broadcast %cst_2 : f32 to vector<2x128xf32>
    %13 = arith.mulf %11, %12 : vector<2x128xf32>
    %14 = arith.subf %6, %13 : vector<2x128xf32>
    %cst_3 = arith.constant 0.0666666701 : f32
    %15 = vector.broadcast %cst_3 : f32 to vector<2x128xf32>
    %16 = arith.mulf %14, %15 : vector<2x128xf32>
    %cst_4 = arith.constant 0.0666666701 : f32
    %17 = vector.broadcast %cst_4 : f32 to vector<2x128xf32>
    %18 = arith.mulf %11, %17 : vector<2x128xf32>
    %c1_i32 = arith.constant 1 : i32
    %19 = arith.muli %arg0, %c1_i32 : i32
    %c0_i32 = arith.constant 0 : i32
    %20 = arith.addi %19, %c0_i32 : i32
    %cst_5 = arith.constant 0x7F800000 : f32
    %21 = vector.broadcast %cst_5 : f32 to vector<2x128xf32>
    %cst_6 = arith.constant 0.000000e+00 : f32
    %22 = vector.broadcast %cst_6 : f32 to vector<2x128xf32>
    %c0_i32_7 = arith.constant 0 : i32
    %c1_i32_8 = arith.constant 1 : i32
    %23 = arith.addi %c0_i32_7, %c1_i32_8 : i32
    %c16_i32 = arith.constant 16 : i32
    %c0_i32_9 = arith.constant 0 : i32
    %24 = arith.cmpi eq, %c16_i32, %c0_i32_9 : i32
    %c1_i32_10 = arith.constant 1 : i32
    %25 = arith.select %24, %c1_i32_10, %c16_i32 : i32
    %26 = arith.remsi %23, %25 : i32
    %c0_i32_11 = arith.constant 0 : i32
    %27 = arith.cmpi ne, %26, %c0_i32_11 : i32
    %c0_i32_12 = arith.constant 0 : i32
    %28 = arith.cmpi slt, %26, %c0_i32_12 : i32
    %c0_i32_13 = arith.constant 0 : i32
    %29 = arith.cmpi slt, %25, %c0_i32_13 : i32
    %30 = arith.xori %28, %29 : i1
    %31 = arith.andi %30, %27 : i1
    %32 = arith.addi %26, %25 : i32
    %33 = arith.select %31, %32, %26 : i32
    %34 = arith.index_cast %20 : i32 to index
    %35 = arith.index_cast %c0_i32_7 : i32 to index
    %36 = memref.load %arg1[%34, %35] : memref<2x16xf32, #tpu.memory_space<smem>>
    %37 = arith.index_cast %20 : i32 to index
    %38 = arith.index_cast %c0_i32_7 : i32 to index
    %39 = memref.load %arg2[%37, %38] : memref<2x16xf32, #tpu.memory_space<smem>>
    %40 = arith.index_cast %20 : i32 to index
    %41 = arith.index_cast %33 : i32 to index
    %42 = memref.load %arg1[%40, %41] : memref<2x16xf32, #tpu.memory_space<smem>>
    %43 = arith.index_cast %20 : i32 to index
    %44 = arith.index_cast %33 : i32 to index
    %45 = memref.load %arg2[%43, %44] : memref<2x16xf32, #tpu.memory_space<smem>>
    %46 = vector.broadcast %36 : f32 to vector<2x128xf32>
    %47 = arith.subf %46, %16 : vector<2x128xf32>
    %48 = vector.broadcast %39 : f32 to vector<2x128xf32>
    %49 = arith.subf %48, %18 : vector<2x128xf32>
    %50 = vector.broadcast %42 : f32 to vector<2x128xf32>
    %51 = arith.subf %50, %16 : vector<2x128xf32>
    %52 = vector.broadcast %45 : f32 to vector<2x128xf32>
    %53 = arith.subf %52, %18 : vector<2x128xf32>
    %54 = arith.mulf %47, %47 : vector<2x128xf32>
    %55 = arith.mulf %49, %49 : vector<2x128xf32>
    %56 = arith.addf %54, %55 : vector<2x128xf32>
    %57 = math.sqrt %56 : vector<2x128xf32>
    %58 = arith.mulf %51, %51 : vector<2x128xf32>
    %59 = arith.mulf %53, %53 : vector<2x128xf32>
    %60 = arith.addf %58, %59 : vector<2x128xf32>
    %61 = math.sqrt %60 : vector<2x128xf32>
    %62 = arith.minimumf %21, %57 : vector<2x128xf32>
    %63 = arith.mulf %47, %53 : vector<2x128xf32>
    %64 = arith.mulf %49, %51 : vector<2x128xf32>
    %65 = arith.subf %63, %64 : vector<2x128xf32>
    %cst_14 = arith.constant 0.000000e+00 : f32
    %66 = vector.broadcast %cst_14 : f32 to vector<2x128xf32>
    %67 = arith.cmpf oge, %65, %66 : vector<2x128xf32>
    %cst_15 = arith.constant 1.000000e+00 : f32
    %cst_16 = arith.constant -1.000000e+00 : f32
    %68 = vector.broadcast %cst_15 : f32 to vector<2x128xf32>
    %69 = vector.broadcast %cst_16 : f32 to vector<2x128xf32>
    %70 = arith.select %67, %68, %69 : vector<2x128xi1>, vector<2x128xf32>
    %71 = arith.mulf %47, %51 : vector<2x128xf32>
    %72 = arith.mulf %49, %53 : vector<2x128xf32>
    %73 = arith.addf %71, %72 : vector<2x128xf32>
    %74 = arith.mulf %57, %61 : vector<2x128xf32>
    %cst_17 = arith.constant 9.99999974E-5 : f32
    %75 = vector.broadcast %cst_17 : f32 to vector<2x128xf32>
    %76 = arith.addf %74, %75 : vector<2x128xf32>
    %77 = tpu.reciprocal %76 {approx = true} : vector<2x128xf32> -> vector<2x128xf32>
    %78 = arith.mulf %73, %77 : vector<2x128xf32>
    %cst_18 = arith.constant -0.999899983 : f32
    %cst_19 = arith.constant 0.999899983 : f32
    %79 = vector.broadcast %cst_18 : f32 to vector<2x128xf32>
    %80 = arith.maximumf %79, %78 : vector<2x128xf32>
    %81 = vector.broadcast %cst_19 : f32 to vector<2x128xf32>
    %82 = arith.minimumf %81, %80 : vector<2x128xf32>
    %83 = math.absf %82 : vector<2x128xf32>
    %cst_20 = arith.constant -1.872930e-02 : f32
    %84 = vector.broadcast %cst_20 : f32 to vector<2x128xf32>
    %85 = arith.mulf %83, %84 : vector<2x128xf32>
    %cst_21 = arith.constant 7.426100e-02 : f32
    %86 = vector.broadcast %cst_21 : f32 to vector<2x128xf32>
    %87 = arith.addf %86, %85 : vector<2x128xf32>
    %88 = arith.mulf %83, %87 : vector<2x128xf32>
    %cst_22 = arith.constant -0.212114394 : f32
    %89 = vector.broadcast %cst_22 : f32 to vector<2x128xf32>
    %90 = arith.addf %89, %88 : vector<2x128xf32>
    %91 = arith.mulf %83, %90 : vector<2x128xf32>
    %cst_23 = arith.constant 1.57072878 : f32
    %92 = vector.broadcast %cst_23 : f32 to vector<2x128xf32>
    %93 = arith.addf %92, %91 : vector<2x128xf32>
    %cst_24 = arith.constant 1.000000e+00 : f32
    %94 = vector.broadcast %cst_24 : f32 to vector<2x128xf32>
    %95 = arith.subf %94, %83 : vector<2x128xf32>
    %cst_25 = arith.constant 0.000000e+00 : f32
    %96 = vector.broadcast %cst_25 : f32 to vector<2x128xf32>
    %97 = arith.maximumf %95, %96 : vector<2x128xf32>
    %98 = math.sqrt %97 : vector<2x128xf32>
    %99 = arith.mulf %98, %93 : vector<2x128xf32>
    %cst_26 = arith.constant 0.000000e+00 : f32
    %100 = vector.broadcast %cst_26 : f32 to vector<2x128xf32>
    %101 = arith.cmpf oge, %82, %100 : vector<2x128xf32>
    %cst_27 = arith.constant 3.14159274 : f32
    %102 = vector.broadcast %cst_27 : f32 to vector<2x128xf32>
    %103 = arith.subf %102, %99 : vector<2x128xf32>
    %104 = arith.select %101, %99, %103 : vector<2x128xi1>, vector<2x128xf32>
    %105 = arith.mulf %70, %104 : vector<2x128xf32>
    %106 = arith.addf %22, %105 : vector<2x128xf32>
    %c1_i32_28 = arith.constant 1 : i32
    %c1_i32_29 = arith.constant 1 : i32
    %107 = arith.addi %c1_i32_28, %c1_i32_29 : i32
    %c16_i32_30 = arith.constant 16 : i32
    %c0_i32_31 = arith.constant 0 : i32
    %108 = arith.cmpi eq, %c16_i32_30, %c0_i32_31 : i32
    %c1_i32_32 = arith.constant 1 : i32
    %109 = arith.select %108, %c1_i32_32, %c16_i32_30 : i32
    %110 = arith.remsi %107, %109 : i32
    %c0_i32_33 = arith.constant 0 : i32
    %111 = arith.cmpi ne, %110, %c0_i32_33 : i32
    %c0_i32_34 = arith.constant 0 : i32
    %112 = arith.cmpi slt, %110, %c0_i32_34 : i32
    %c0_i32_35 = arith.constant 0 : i32
    %113 = arith.cmpi slt, %109, %c0_i32_35 : i32
    %114 = arith.xori %112, %113 : i1
    %115 = arith.andi %114, %111 : i1
    %116 = arith.addi %110, %109 : i32
    %117 = arith.select %115, %116, %110 : i32
    %118 = arith.index_cast %20 : i32 to index
    %119 = arith.index_cast %c1_i32_28 : i32 to index
    %120 = memref.load %arg1[%118, %119] : memref<2x16xf32, #tpu.memory_space<smem>>
    %121 = arith.index_cast %20 : i32 to index
    %122 = arith.index_cast %c1_i32_28 : i32 to index
    %123 = memref.load %arg2[%121, %122] : memref<2x16xf32, #tpu.memory_space<smem>>
    %124 = arith.index_cast %20 : i32 to index
    %125 = arith.index_cast %117 : i32 to index
    %126 = memref.load %arg1[%124, %125] : memref<2x16xf32, #tpu.memory_space<smem>>
    %127 = arith.index_cast %20 : i32 to index
    %128 = arith.index_cast %117 : i32 to index
    %129 = memref.load %arg2[%127, %128] : memref<2x16xf32, #tpu.memory_space<smem>>
    %130 = vector.broadcast %120 : f32 to vector<2x128xf32>
    %131 = arith.subf %130, %16 : vector<2x128xf32>
    %132 = vector.broadcast %123 : f32 to vector<2x128xf32>
    %133 = arith.subf %132, %18 : vector<2x128xf32>
    %134 = vector.broadcast %126 : f32 to vector<2x128xf32>
    %135 = arith.subf %134, %16 : vector<2x128xf32>
    %136 = vector.broadcast %129 : f32 to vector<2x128xf32>
    %137 = arith.subf %136, %18 : vector<2x128xf32>
    %138 = arith.mulf %131, %131 : vector<2x128xf32>
    %139 = arith.mulf %133, %133 : vector<2x128xf32>
    %140 = arith.addf %138, %139 : vector<2x128xf32>
    %141 = math.sqrt %140 : vector<2x128xf32>
    %142 = arith.mulf %135, %135 : vector<2x128xf32>
    %143 = arith.mulf %137, %137 : vector<2x128xf32>
    %144 = arith.addf %142, %143 : vector<2x128xf32>
    %145 = math.sqrt %144 : vector<2x128xf32>
    %146 = arith.minimumf %62, %141 : vector<2x128xf32>
    %147 = arith.mulf %131, %137 : vector<2x128xf32>
    %148 = arith.mulf %133, %135 : vector<2x128xf32>
    %149 = arith.subf %147, %148 : vector<2x128xf32>
    %cst_36 = arith.constant 0.000000e+00 : f32
    %150 = vector.broadcast %cst_36 : f32 to vector<2x128xf32>
    %151 = arith.cmpf oge, %149, %150 : vector<2x128xf32>
    %cst_37 = arith.constant 1.000000e+00 : f32
    %cst_38 = arith.constant -1.000000e+00 : f32
    %152 = vector.broadcast %cst_37 : f32 to vector<2x128xf32>
    %153 = vector.broadcast %cst_38 : f32 to vector<2x128xf32>
    %154 = arith.select %151, %152, %153 : vector<2x128xi1>, vector<2x128xf32>
    %155 = arith.mulf %131, %135 : vector<2x128xf32>
    %156 = arith.mulf %133, %137 : vector<2x128xf32>
    %157 = arith.addf %155, %156 : vector<2x128xf32>
    %158 = arith.mulf %141, %145 : vector<2x128xf32>
    %cst_39 = arith.constant 9.99999974E-5 : f32
    %159 = vector.broadcast %cst_39 : f32 to vector<2x128xf32>
    %160 = arith.addf %158, %159 : vector<2x128xf32>
    %161 = tpu.reciprocal %160 {approx = true} : vector<2x128xf32> -> vector<2x128xf32>
    %162 = arith.mulf %157, %161 : vector<2x128xf32>
    %cst_40 = arith.constant -0.999899983 : f32
    %cst_41 = arith.constant 0.999899983 : f32
    %163 = vector.broadcast %cst_40 : f32 to vector<2x128xf32>
    %164 = arith.maximumf %163, %162 : vector<2x128xf32>
    %165 = vector.broadcast %cst_41 : f32 to vector<2x128xf32>
    %166 = arith.minimumf %165, %164 : vector<2x128xf32>
    %167 = math.absf %166 : vector<2x128xf32>
    %cst_42 = arith.constant -1.872930e-02 : f32
    %168 = vector.broadcast %cst_42 : f32 to vector<2x128xf32>
    %169 = arith.mulf %167, %168 : vector<2x128xf32>
    %cst_43 = arith.constant 7.426100e-02 : f32
    %170 = vector.broadcast %cst_43 : f32 to vector<2x128xf32>
    %171 = arith.addf %170, %169 : vector<2x128xf32>
    %172 = arith.mulf %167, %171 : vector<2x128xf32>
    %cst_44 = arith.constant -0.212114394 : f32
    %173 = vector.broadcast %cst_44 : f32 to vector<2x128xf32>
    %174 = arith.addf %173, %172 : vector<2x128xf32>
    %175 = arith.mulf %167, %174 : vector<2x128xf32>
    %cst_45 = arith.constant 1.57072878 : f32
    %176 = vector.broadcast %cst_45 : f32 to vector<2x128xf32>
    %177 = arith.addf %176, %175 : vector<2x128xf32>
    %cst_46 = arith.constant 1.000000e+00 : f32
    %178 = vector.broadcast %cst_46 : f32 to vector<2x128xf32>
    %179 = arith.subf %178, %167 : vector<2x128xf32>
    %cst_47 = arith.constant 0.000000e+00 : f32
    %180 = vector.broadcast %cst_47 : f32 to vector<2x128xf32>
    %181 = arith.maximumf %179, %180 : vector<2x128xf32>
    %182 = math.sqrt %181 : vector<2x128xf32>
    %183 = arith.mulf %182, %177 : vector<2x128xf32>
    %cst_48 = arith.constant 0.000000e+00 : f32
    %184 = vector.broadcast %cst_48 : f32 to vector<2x128xf32>
    %185 = arith.cmpf oge, %166, %184 : vector<2x128xf32>
    %cst_49 = arith.constant 3.14159274 : f32
    %186 = vector.broadcast %cst_49 : f32 to vector<2x128xf32>
    %187 = arith.subf %186, %183 : vector<2x128xf32>
    %188 = arith.select %185, %183, %187 : vector<2x128xi1>, vector<2x128xf32>
    %189 = arith.mulf %154, %188 : vector<2x128xf32>
    %190 = arith.addf %106, %189 : vector<2x128xf32>
    %c2_i32 = arith.constant 2 : i32
    %c1_i32_50 = arith.constant 1 : i32
    %191 = arith.addi %c2_i32, %c1_i32_50 : i32
    %c16_i32_51 = arith.constant 16 : i32
    %c0_i32_52 = arith.constant 0 : i32
    %192 = arith.cmpi eq, %c16_i32_51, %c0_i32_52 : i32
    %c1_i32_53 = arith.constant 1 : i32
    %193 = arith.select %192, %c1_i32_53, %c16_i32_51 : i32
    %194 = arith.remsi %191, %193 : i32
    %c0_i32_54 = arith.constant 0 : i32
    %195 = arith.cmpi ne, %194, %c0_i32_54 : i32
    %c0_i32_55 = arith.constant 0 : i32
    %196 = arith.cmpi slt, %194, %c0_i32_55 : i32
    %c0_i32_56 = arith.constant 0 : i32
    %197 = arith.cmpi slt, %193, %c0_i32_56 : i32
    %198 = arith.xori %196, %197 : i1
    %199 = arith.andi %198, %195 : i1
    %200 = arith.addi %194, %193 : i32
    %201 = arith.select %199, %200, %194 : i32
    %202 = arith.index_cast %20 : i32 to index
    %203 = arith.index_cast %c2_i32 : i32 to index
    %204 = memref.load %arg1[%202, %203] : memref<2x16xf32, #tpu.memory_space<smem>>
    %205 = arith.index_cast %20 : i32 to index
    %206 = arith.index_cast %c2_i32 : i32 to index
    %207 = memref.load %arg2[%205, %206] : memref<2x16xf32, #tpu.memory_space<smem>>
    %208 = arith.index_cast %20 : i32 to index
    %209 = arith.index_cast %201 : i32 to index
    %210 = memref.load %arg1[%208, %209] : memref<2x16xf32, #tpu.memory_space<smem>>
    %211 = arith.index_cast %20 : i32 to index
    %212 = arith.index_cast %201 : i32 to index
    %213 = memref.load %arg2[%211, %212] : memref<2x16xf32, #tpu.memory_space<smem>>
    %214 = vector.broadcast %204 : f32 to vector<2x128xf32>
    %215 = arith.subf %214, %16 : vector<2x128xf32>
    %216 = vector.broadcast %207 : f32 to vector<2x128xf32>
    %217 = arith.subf %216, %18 : vector<2x128xf32>
    %218 = vector.broadcast %210 : f32 to vector<2x128xf32>
    %219 = arith.subf %218, %16 : vector<2x128xf32>
    %220 = vector.broadcast %213 : f32 to vector<2x128xf32>
    %221 = arith.subf %220, %18 : vector<2x128xf32>
    %222 = arith.mulf %215, %215 : vector<2x128xf32>
    %223 = arith.mulf %217, %217 : vector<2x128xf32>
    %224 = arith.addf %222, %223 : vector<2x128xf32>
    %225 = math.sqrt %224 : vector<2x128xf32>
    %226 = arith.mulf %219, %219 : vector<2x128xf32>
    %227 = arith.mulf %221, %221 : vector<2x128xf32>
    %228 = arith.addf %226, %227 : vector<2x128xf32>
    %229 = math.sqrt %228 : vector<2x128xf32>
    %230 = arith.minimumf %146, %225 : vector<2x128xf32>
    %231 = arith.mulf %215, %221 : vector<2x128xf32>
    %232 = arith.mulf %217, %219 : vector<2x128xf32>
    %233 = arith.subf %231, %232 : vector<2x128xf32>
    %cst_57 = arith.constant 0.000000e+00 : f32
    %234 = vector.broadcast %cst_57 : f32 to vector<2x128xf32>
    %235 = arith.cmpf oge, %233, %234 : vector<2x128xf32>
    %cst_58 = arith.constant 1.000000e+00 : f32
    %cst_59 = arith.constant -1.000000e+00 : f32
    %236 = vector.broadcast %cst_58 : f32 to vector<2x128xf32>
    %237 = vector.broadcast %cst_59 : f32 to vector<2x128xf32>
    %238 = arith.select %235, %236, %237 : vector<2x128xi1>, vector<2x128xf32>
    %239 = arith.mulf %215, %219 : vector<2x128xf32>
    %240 = arith.mulf %217, %221 : vector<2x128xf32>
    %241 = arith.addf %239, %240 : vector<2x128xf32>
    %242 = arith.mulf %225, %229 : vector<2x128xf32>
    %cst_60 = arith.constant 9.99999974E-5 : f32
    %243 = vector.broadcast %cst_60 : f32 to vector<2x128xf32>
    %244 = arith.addf %242, %243 : vector<2x128xf32>
    %245 = tpu.reciprocal %244 {approx = true} : vector<2x128xf32> -> vector<2x128xf32>
    %246 = arith.mulf %241, %245 : vector<2x128xf32>
    %cst_61 = arith.constant -0.999899983 : f32
    %cst_62 = arith.constant 0.999899983 : f32
    %247 = vector.broadcast %cst_61 : f32 to vector<2x128xf32>
    %248 = arith.maximumf %247, %246 : vector<2x128xf32>
    %249 = vector.broadcast %cst_62 : f32 to vector<2x128xf32>
    %250 = arith.minimumf %249, %248 : vector<2x128xf32>
    %251 = math.absf %250 : vector<2x128xf32>
    %cst_63 = arith.constant -1.872930e-02 : f32
    %252 = vector.broadcast %cst_63 : f32 to vector<2x128xf32>
    %253 = arith.mulf %251, %252 : vector<2x128xf32>
    %cst_64 = arith.constant 7.426100e-02 : f32
    %254 = vector.broadcast %cst_64 : f32 to vector<2x128xf32>
    %255 = arith.addf %254, %253 : vector<2x128xf32>
    %256 = arith.mulf %251, %255 : vector<2x128xf32>
    %cst_65 = arith.constant -0.212114394 : f32
    %257 = vector.broadcast %cst_65 : f32 to vector<2x128xf32>
    %258 = arith.addf %257, %256 : vector<2x128xf32>
    %259 = arith.mulf %251, %258 : vector<2x128xf32>
    %cst_66 = arith.constant 1.57072878 : f32
    %260 = vector.broadcast %cst_66 : f32 to vector<2x128xf32>
    %261 = arith.addf %260, %259 : vector<2x128xf32>
    %cst_67 = arith.constant 1.000000e+00 : f32
    %262 = vector.broadcast %cst_67 : f32 to vector<2x128xf32>
    %263 = arith.subf %262, %251 : vector<2x128xf32>
    %cst_68 = arith.constant 0.000000e+00 : f32
    %264 = vector.broadcast %cst_68 : f32 to vector<2x128xf32>
    %265 = arith.maximumf %263, %264 : vector<2x128xf32>
    %266 = math.sqrt %265 : vector<2x128xf32>
    %267 = arith.mulf %266, %261 : vector<2x128xf32>
    %cst_69 = arith.constant 0.000000e+00 : f32
    %268 = vector.broadcast %cst_69 : f32 to vector<2x128xf32>
    %269 = arith.cmpf oge, %250, %268 : vector<2x128xf32>
    %cst_70 = arith.constant 3.14159274 : f32
    %270 = vector.broadcast %cst_70 : f32 to vector<2x128xf32>
    %271 = arith.subf %270, %267 : vector<2x128xf32>
    %272 = arith.select %269, %267, %271 : vector<2x128xi1>, vector<2x128xf32>
    %273 = arith.mulf %238, %272 : vector<2x128xf32>
    %274 = arith.addf %190, %273 : vector<2x128xf32>
    %c3_i32 = arith.constant 3 : i32
    %c1_i32_71 = arith.constant 1 : i32
    %275 = arith.addi %c3_i32, %c1_i32_71 : i32
    %c16_i32_72 = arith.constant 16 : i32
    %c0_i32_73 = arith.constant 0 : i32
    %276 = arith.cmpi eq, %c16_i32_72, %c0_i32_73 : i32
    %c1_i32_74 = arith.constant 1 : i32
    %277 = arith.select %276, %c1_i32_74, %c16_i32_72 : i32
    %278 = arith.remsi %275, %277 : i32
    %c0_i32_75 = arith.constant 0 : i32
    %279 = arith.cmpi ne, %278, %c0_i32_75 : i32
    %c0_i32_76 = arith.constant 0 : i32
    %280 = arith.cmpi slt, %278, %c0_i32_76 : i32
    %c0_i32_77 = arith.constant 0 : i32
    %281 = arith.cmpi slt, %277, %c0_i32_77 : i32
    %282 = arith.xori %280, %281 : i1
    %283 = arith.andi %282, %279 : i1
    %284 = arith.addi %278, %277 : i32
    %285 = arith.select %283, %284, %278 : i32
    %286 = arith.index_cast %20 : i32 to index
    %287 = arith.index_cast %c3_i32 : i32 to index
    %288 = memref.load %arg1[%286, %287] : memref<2x16xf32, #tpu.memory_space<smem>>
    %289 = arith.index_cast %20 : i32 to index
    %290 = arith.index_cast %c3_i32 : i32 to index
    %291 = memref.load %arg2[%289, %290] : memref<2x16xf32, #tpu.memory_space<smem>>
    %292 = arith.index_cast %20 : i32 to index
    %293 = arith.index_cast %285 : i32 to index
    %294 = memref.load %arg1[%292, %293] : memref<2x16xf32, #tpu.memory_space<smem>>
    %295 = arith.index_cast %20 : i32 to index
    %296 = arith.index_cast %285 : i32 to index
    %297 = memref.load %arg2[%295, %296] : memref<2x16xf32, #tpu.memory_space<smem>>
    %298 = vector.broadcast %288 : f32 to vector<2x128xf32>
    %299 = arith.subf %298, %16 : vector<2x128xf32>
    %300 = vector.broadcast %291 : f32 to vector<2x128xf32>
    %301 = arith.subf %300, %18 : vector<2x128xf32>
    %302 = vector.broadcast %294 : f32 to vector<2x128xf32>
    %303 = arith.subf %302, %16 : vector<2x128xf32>
    %304 = vector.broadcast %297 : f32 to vector<2x128xf32>
    %305 = arith.subf %304, %18 : vector<2x128xf32>
    %306 = arith.mulf %299, %299 : vector<2x128xf32>
    %307 = arith.mulf %301, %301 : vector<2x128xf32>
    %308 = arith.addf %306, %307 : vector<2x128xf32>
    %309 = math.sqrt %308 : vector<2x128xf32>
    %310 = arith.mulf %303, %303 : vector<2x128xf32>
    %311 = arith.mulf %305, %305 : vector<2x128xf32>
    %312 = arith.addf %310, %311 : vector<2x128xf32>
    %313 = math.sqrt %312 : vector<2x128xf32>
    %314 = arith.minimumf %230, %309 : vector<2x128xf32>
    %315 = arith.mulf %299, %305 : vector<2x128xf32>
    %316 = arith.mulf %301, %303 : vector<2x128xf32>
    %317 = arith.subf %315, %316 : vector<2x128xf32>
    %cst_78 = arith.constant 0.000000e+00 : f32
    %318 = vector.broadcast %cst_78 : f32 to vector<2x128xf32>
    %319 = arith.cmpf oge, %317, %318 : vector<2x128xf32>
    %cst_79 = arith.constant 1.000000e+00 : f32
    %cst_80 = arith.constant -1.000000e+00 : f32
    %320 = vector.broadcast %cst_79 : f32 to vector<2x128xf32>
    %321 = vector.broadcast %cst_80 : f32 to vector<2x128xf32>
    %322 = arith.select %319, %320, %321 : vector<2x128xi1>, vector<2x128xf32>
    %323 = arith.mulf %299, %303 : vector<2x128xf32>
    %324 = arith.mulf %301, %305 : vector<2x128xf32>
    %325 = arith.addf %323, %324 : vector<2x128xf32>
    %326 = arith.mulf %309, %313 : vector<2x128xf32>
    %cst_81 = arith.constant 9.99999974E-5 : f32
    %327 = vector.broadcast %cst_81 : f32 to vector<2x128xf32>
    %328 = arith.addf %326, %327 : vector<2x128xf32>
    %329 = tpu.reciprocal %328 {approx = true} : vector<2x128xf32> -> vector<2x128xf32>
    %330 = arith.mulf %325, %329 : vector<2x128xf32>
    %cst_82 = arith.constant -0.999899983 : f32
    %cst_83 = arith.constant 0.999899983 : f32
    %331 = vector.broadcast %cst_82 : f32 to vector<2x128xf32>
    %332 = arith.maximumf %331, %330 : vector<2x128xf32>
    %333 = vector.broadcast %cst_83 : f32 to vector<2x128xf32>
    %334 = arith.minimumf %333, %332 : vector<2x128xf32>
    %335 = math.absf %334 : vector<2x128xf32>
    %cst_84 = arith.constant -1.872930e-02 : f32
    %336 = vector.broadcast %cst_84 : f32 to vector<2x128xf32>
    %337 = arith.mulf %335, %336 : vector<2x128xf32>
    %cst_85 = arith.constant 7.426100e-02 : f32
    %338 = vector.broadcast %cst_85 : f32 to vector<2x128xf32>
    %339 = arith.addf %338, %337 : vector<2x128xf32>
    %340 = arith.mulf %335, %339 : vector<2x128xf32>
    %cst_86 = arith.constant -0.212114394 : f32
    %341 = vector.broadcast %cst_86 : f32 to vector<2x128xf32>
    %342 = arith.addf %341, %340 : vector<2x128xf32>
    %343 = arith.mulf %335, %342 : vector<2x128xf32>
    %cst_87 = arith.constant 1.57072878 : f32
    %344 = vector.broadcast %cst_87 : f32 to vector<2x128xf32>
    %345 = arith.addf %344, %343 : vector<2x128xf32>
    %cst_88 = arith.constant 1.000000e+00 : f32
    %346 = vector.broadcast %cst_88 : f32 to vector<2x128xf32>
    %347 = arith.subf %346, %335 : vector<2x128xf32>
    %cst_89 = arith.constant 0.000000e+00 : f32
    %348 = vector.broadcast %cst_89 : f32 to vector<2x128xf32>
    %349 = arith.maximumf %347, %348 : vector<2x128xf32>
    %350 = math.sqrt %349 : vector<2x128xf32>
    %351 = arith.mulf %350, %345 : vector<2x128xf32>
    %cst_90 = arith.constant 0.000000e+00 : f32
    %352 = vector.broadcast %cst_90 : f32 to vector<2x128xf32>
    %353 = arith.cmpf oge, %334, %352 : vector<2x128xf32>
    %cst_91 = arith.constant 3.14159274 : f32
    %354 = vector.broadcast %cst_91 : f32 to vector<2x128xf32>
    %355 = arith.subf %354, %351 : vector<2x128xf32>
    %356 = arith.select %353, %351, %355 : vector<2x128xi1>, vector<2x128xf32>
    %357 = arith.mulf %322, %356 : vector<2x128xf32>
    %358 = arith.addf %274, %357 : vector<2x128xf32>
    %c4_i32 = arith.constant 4 : i32
    %c1_i32_92 = arith.constant 1 : i32
    %359 = arith.addi %c4_i32, %c1_i32_92 : i32
    %c16_i32_93 = arith.constant 16 : i32
    %c0_i32_94 = arith.constant 0 : i32
    %360 = arith.cmpi eq, %c16_i32_93, %c0_i32_94 : i32
    %c1_i32_95 = arith.constant 1 : i32
    %361 = arith.select %360, %c1_i32_95, %c16_i32_93 : i32
    %362 = arith.remsi %359, %361 : i32
    %c0_i32_96 = arith.constant 0 : i32
    %363 = arith.cmpi ne, %362, %c0_i32_96 : i32
    %c0_i32_97 = arith.constant 0 : i32
    %364 = arith.cmpi slt, %362, %c0_i32_97 : i32
    %c0_i32_98 = arith.constant 0 : i32
    %365 = arith.cmpi slt, %361, %c0_i32_98 : i32
    %366 = arith.xori %364, %365 : i1
    %367 = arith.andi %366, %363 : i1
    %368 = arith.addi %362, %361 : i32
    %369 = arith.select %367, %368, %362 : i32
    %370 = arith.index_cast %20 : i32 to index
    %371 = arith.index_cast %c4_i32 : i32 to index
    %372 = memref.load %arg1[%370, %371] : memref<2x16xf32, #tpu.memory_space<smem>>
    %373 = arith.index_cast %20 : i32 to index
    %374 = arith.index_cast %c4_i32 : i32 to index
    %375 = memref.load %arg2[%373, %374] : memref<2x16xf32, #tpu.memory_space<smem>>
    %376 = arith.index_cast %20 : i32 to index
    %377 = arith.index_cast %369 : i32 to index
    %378 = memref.load %arg1[%376, %377] : memref<2x16xf32, #tpu.memory_space<smem>>
    %379 = arith.index_cast %20 : i32 to index
    %380 = arith.index_cast %369 : i32 to index
    %381 = memref.load %arg2[%379, %380] : memref<2x16xf32, #tpu.memory_space<smem>>
    %382 = vector.broadcast %372 : f32 to vector<2x128xf32>
    %383 = arith.subf %382, %16 : vector<2x128xf32>
    %384 = vector.broadcast %375 : f32 to vector<2x128xf32>
    %385 = arith.subf %384, %18 : vector<2x128xf32>
    %386 = vector.broadcast %378 : f32 to vector<2x128xf32>
    %387 = arith.subf %386, %16 : vector<2x128xf32>
    %388 = vector.broadcast %381 : f32 to vector<2x128xf32>
    %389 = arith.subf %388, %18 : vector<2x128xf32>
    %390 = arith.mulf %383, %383 : vector<2x128xf32>
    %391 = arith.mulf %385, %385 : vector<2x128xf32>
    %392 = arith.addf %390, %391 : vector<2x128xf32>
    %393 = math.sqrt %392 : vector<2x128xf32>
    %394 = arith.mulf %387, %387 : vector<2x128xf32>
    %395 = arith.mulf %389, %389 : vector<2x128xf32>
    %396 = arith.addf %394, %395 : vector<2x128xf32>
    %397 = math.sqrt %396 : vector<2x128xf32>
    %398 = arith.minimumf %314, %393 : vector<2x128xf32>
    %399 = arith.mulf %383, %389 : vector<2x128xf32>
    %400 = arith.mulf %385, %387 : vector<2x128xf32>
    %401 = arith.subf %399, %400 : vector<2x128xf32>
    %cst_99 = arith.constant 0.000000e+00 : f32
    %402 = vector.broadcast %cst_99 : f32 to vector<2x128xf32>
    %403 = arith.cmpf oge, %401, %402 : vector<2x128xf32>
    %cst_100 = arith.constant 1.000000e+00 : f32
    %cst_101 = arith.constant -1.000000e+00 : f32
    %404 = vector.broadcast %cst_100 : f32 to vector<2x128xf32>
    %405 = vector.broadcast %cst_101 : f32 to vector<2x128xf32>
    %406 = arith.select %403, %404, %405 : vector<2x128xi1>, vector<2x128xf32>
    %407 = arith.mulf %383, %387 : vector<2x128xf32>
    %408 = arith.mulf %385, %389 : vector<2x128xf32>
    %409 = arith.addf %407, %408 : vector<2x128xf32>
    %410 = arith.mulf %393, %397 : vector<2x128xf32>
    %cst_102 = arith.constant 9.99999974E-5 : f32
    %411 = vector.broadcast %cst_102 : f32 to vector<2x128xf32>
    %412 = arith.addf %410, %411 : vector<2x128xf32>
    %413 = tpu.reciprocal %412 {approx = true} : vector<2x128xf32> -> vector<2x128xf32>
    %414 = arith.mulf %409, %413 : vector<2x128xf32>
    %cst_103 = arith.constant -0.999899983 : f32
    %cst_104 = arith.constant 0.999899983 : f32
    %415 = vector.broadcast %cst_103 : f32 to vector<2x128xf32>
    %416 = arith.maximumf %415, %414 : vector<2x128xf32>
    %417 = vector.broadcast %cst_104 : f32 to vector<2x128xf32>
    %418 = arith.minimumf %417, %416 : vector<2x128xf32>
    %419 = math.absf %418 : vector<2x128xf32>
    %cst_105 = arith.constant -1.872930e-02 : f32
    %420 = vector.broadcast %cst_105 : f32 to vector<2x128xf32>
    %421 = arith.mulf %419, %420 : vector<2x128xf32>
    %cst_106 = arith.constant 7.426100e-02 : f32
    %422 = vector.broadcast %cst_106 : f32 to vector<2x128xf32>
    %423 = arith.addf %422, %421 : vector<2x128xf32>
    %424 = arith.mulf %419, %423 : vector<2x128xf32>
    %cst_107 = arith.constant -0.212114394 : f32
    %425 = vector.broadcast %cst_107 : f32 to vector<2x128xf32>
    %426 = arith.addf %425, %424 : vector<2x128xf32>
    %427 = arith.mulf %419, %426 : vector<2x128xf32>
    %cst_108 = arith.constant 1.57072878 : f32
    %428 = vector.broadcast %cst_108 : f32 to vector<2x128xf32>
    %429 = arith.addf %428, %427 : vector<2x128xf32>
    %cst_109 = arith.constant 1.000000e+00 : f32
    %430 = vector.broadcast %cst_109 : f32 to vector<2x128xf32>
    %431 = arith.subf %430, %419 : vector<2x128xf32>
    %cst_110 = arith.constant 0.000000e+00 : f32
    %432 = vector.broadcast %cst_110 : f32 to vector<2x128xf32>
    %433 = arith.maximumf %431, %432 : vector<2x128xf32>
    %434 = math.sqrt %433 : vector<2x128xf32>
    %435 = arith.mulf %434, %429 : vector<2x128xf32>
    %cst_111 = arith.constant 0.000000e+00 : f32
    %436 = vector.broadcast %cst_111 : f32 to vector<2x128xf32>
    %437 = arith.cmpf oge, %418, %436 : vector<2x128xf32>
    %cst_112 = arith.constant 3.14159274 : f32
    %438 = vector.broadcast %cst_112 : f32 to vector<2x128xf32>
    %439 = arith.subf %438, %435 : vector<2x128xf32>
    %440 = arith.select %437, %435, %439 : vector<2x128xi1>, vector<2x128xf32>
    %441 = arith.mulf %406, %440 : vector<2x128xf32>
    %442 = arith.addf %358, %441 : vector<2x128xf32>
    %c5_i32 = arith.constant 5 : i32
    %c1_i32_113 = arith.constant 1 : i32
    %443 = arith.addi %c5_i32, %c1_i32_113 : i32
    %c16_i32_114 = arith.constant 16 : i32
    %c0_i32_115 = arith.constant 0 : i32
    %444 = arith.cmpi eq, %c16_i32_114, %c0_i32_115 : i32
    %c1_i32_116 = arith.constant 1 : i32
    %445 = arith.select %444, %c1_i32_116, %c16_i32_114 : i32
    %446 = arith.remsi %443, %445 : i32
    %c0_i32_117 = arith.constant 0 : i32
    %447 = arith.cmpi ne, %446, %c0_i32_117 : i32
    %c0_i32_118 = arith.constant 0 : i32
    %448 = arith.cmpi slt, %446, %c0_i32_118 : i32
    %c0_i32_119 = arith.constant 0 : i32
    %449 = arith.cmpi slt, %445, %c0_i32_119 : i32
    %450 = arith.xori %448, %449 : i1
    %451 = arith.andi %450, %447 : i1
    %452 = arith.addi %446, %445 : i32
    %453 = arith.select %451, %452, %446 : i32
    %454 = arith.index_cast %20 : i32 to index
    %455 = arith.index_cast %c5_i32 : i32 to index
    %456 = memref.load %arg1[%454, %455] : memref<2x16xf32, #tpu.memory_space<smem>>
    %457 = arith.index_cast %20 : i32 to index
    %458 = arith.index_cast %c5_i32 : i32 to index
    %459 = memref.load %arg2[%457, %458] : memref<2x16xf32, #tpu.memory_space<smem>>
    %460 = arith.index_cast %20 : i32 to index
    %461 = arith.index_cast %453 : i32 to index
    %462 = memref.load %arg1[%460, %461] : memref<2x16xf32, #tpu.memory_space<smem>>
    %463 = arith.index_cast %20 : i32 to index
    %464 = arith.index_cast %453 : i32 to index
    %465 = memref.load %arg2[%463, %464] : memref<2x16xf32, #tpu.memory_space<smem>>
    %466 = vector.broadcast %456 : f32 to vector<2x128xf32>
    %467 = arith.subf %466, %16 : vector<2x128xf32>
    %468 = vector.broadcast %459 : f32 to vector<2x128xf32>
    %469 = arith.subf %468, %18 : vector<2x128xf32>
    %470 = vector.broadcast %462 : f32 to vector<2x128xf32>
    %471 = arith.subf %470, %16 : vector<2x128xf32>
    %472 = vector.broadcast %465 : f32 to vector<2x128xf32>
    %473 = arith.subf %472, %18 : vector<2x128xf32>
    %474 = arith.mulf %467, %467 : vector<2x128xf32>
    %475 = arith.mulf %469, %469 : vector<2x128xf32>
    %476 = arith.addf %474, %475 : vector<2x128xf32>
    %477 = math.sqrt %476 : vector<2x128xf32>
    %478 = arith.mulf %471, %471 : vector<2x128xf32>
    %479 = arith.mulf %473, %473 : vector<2x128xf32>
    %480 = arith.addf %478, %479 : vector<2x128xf32>
    %481 = math.sqrt %480 : vector<2x128xf32>
    %482 = arith.minimumf %398, %477 : vector<2x128xf32>
    %483 = arith.mulf %467, %473 : vector<2x128xf32>
    %484 = arith.mulf %469, %471 : vector<2x128xf32>
    %485 = arith.subf %483, %484 : vector<2x128xf32>
    %cst_120 = arith.constant 0.000000e+00 : f32
    %486 = vector.broadcast %cst_120 : f32 to vector<2x128xf32>
    %487 = arith.cmpf oge, %485, %486 : vector<2x128xf32>
    %cst_121 = arith.constant 1.000000e+00 : f32
    %cst_122 = arith.constant -1.000000e+00 : f32
    %488 = vector.broadcast %cst_121 : f32 to vector<2x128xf32>
    %489 = vector.broadcast %cst_122 : f32 to vector<2x128xf32>
    %490 = arith.select %487, %488, %489 : vector<2x128xi1>, vector<2x128xf32>
    %491 = arith.mulf %467, %471 : vector<2x128xf32>
    %492 = arith.mulf %469, %473 : vector<2x128xf32>
    %493 = arith.addf %491, %492 : vector<2x128xf32>
    %494 = arith.mulf %477, %481 : vector<2x128xf32>
    %cst_123 = arith.constant 9.99999974E-5 : f32
    %495 = vector.broadcast %cst_123 : f32 to vector<2x128xf32>
    %496 = arith.addf %494, %495 : vector<2x128xf32>
    %497 = tpu.reciprocal %496 {approx = true} : vector<2x128xf32> -> vector<2x128xf32>
    %498 = arith.mulf %493, %497 : vector<2x128xf32>
    %cst_124 = arith.constant -0.999899983 : f32
    %cst_125 = arith.constant 0.999899983 : f32
    %499 = vector.broadcast %cst_124 : f32 to vector<2x128xf32>
    %500 = arith.maximumf %499, %498 : vector<2x128xf32>
    %501 = vector.broadcast %cst_125 : f32 to vector<2x128xf32>
    %502 = arith.minimumf %501, %500 : vector<2x128xf32>
    %503 = math.absf %502 : vector<2x128xf32>
    %cst_126 = arith.constant -1.872930e-02 : f32
    %504 = vector.broadcast %cst_126 : f32 to vector<2x128xf32>
    %505 = arith.mulf %503, %504 : vector<2x128xf32>
    %cst_127 = arith.constant 7.426100e-02 : f32
    %506 = vector.broadcast %cst_127 : f32 to vector<2x128xf32>
    %507 = arith.addf %506, %505 : vector<2x128xf32>
    %508 = arith.mulf %503, %507 : vector<2x128xf32>
    %cst_128 = arith.constant -0.212114394 : f32
    %509 = vector.broadcast %cst_128 : f32 to vector<2x128xf32>
    %510 = arith.addf %509, %508 : vector<2x128xf32>
    %511 = arith.mulf %503, %510 : vector<2x128xf32>
    %cst_129 = arith.constant 1.57072878 : f32
    %512 = vector.broadcast %cst_129 : f32 to vector<2x128xf32>
    %513 = arith.addf %512, %511 : vector<2x128xf32>
    %cst_130 = arith.constant 1.000000e+00 : f32
    %514 = vector.broadcast %cst_130 : f32 to vector<2x128xf32>
    %515 = arith.subf %514, %503 : vector<2x128xf32>
    %cst_131 = arith.constant 0.000000e+00 : f32
    %516 = vector.broadcast %cst_131 : f32 to vector<2x128xf32>
    %517 = arith.maximumf %515, %516 : vector<2x128xf32>
    %518 = math.sqrt %517 : vector<2x128xf32>
    %519 = arith.mulf %518, %513 : vector<2x128xf32>
    %cst_132 = arith.constant 0.000000e+00 : f32
    %520 = vector.broadcast %cst_132 : f32 to vector<2x128xf32>
    %521 = arith.cmpf oge, %502, %520 : vector<2x128xf32>
    %cst_133 = arith.constant 3.14159274 : f32
    %522 = vector.broadcast %cst_133 : f32 to vector<2x128xf32>
    %523 = arith.subf %522, %519 : vector<2x128xf32>
    %524 = arith.select %521, %519, %523 : vector<2x128xi1>, vector<2x128xf32>
    %525 = arith.mulf %490, %524 : vector<2x128xf32>
    %526 = arith.addf %442, %525 : vector<2x128xf32>
    %c6_i32 = arith.constant 6 : i32
    %c1_i32_134 = arith.constant 1 : i32
    %527 = arith.addi %c6_i32, %c1_i32_134 : i32
    %c16_i32_135 = arith.constant 16 : i32
    %c0_i32_136 = arith.constant 0 : i32
    %528 = arith.cmpi eq, %c16_i32_135, %c0_i32_136 : i32
    %c1_i32_137 = arith.constant 1 : i32
    %529 = arith.select %528, %c1_i32_137, %c16_i32_135 : i32
    %530 = arith.remsi %527, %529 : i32
    %c0_i32_138 = arith.constant 0 : i32
    %531 = arith.cmpi ne, %530, %c0_i32_138 : i32
    %c0_i32_139 = arith.constant 0 : i32
    %532 = arith.cmpi slt, %530, %c0_i32_139 : i32
    %c0_i32_140 = arith.constant 0 : i32
    %533 = arith.cmpi slt, %529, %c0_i32_140 : i32
    %534 = arith.xori %532, %533 : i1
    %535 = arith.andi %534, %531 : i1
    %536 = arith.addi %530, %529 : i32
    %537 = arith.select %535, %536, %530 : i32
    %538 = arith.index_cast %20 : i32 to index
    %539 = arith.index_cast %c6_i32 : i32 to index
    %540 = memref.load %arg1[%538, %539] : memref<2x16xf32, #tpu.memory_space<smem>>
    %541 = arith.index_cast %20 : i32 to index
    %542 = arith.index_cast %c6_i32 : i32 to index
    %543 = memref.load %arg2[%541, %542] : memref<2x16xf32, #tpu.memory_space<smem>>
    %544 = arith.index_cast %20 : i32 to index
    %545 = arith.index_cast %537 : i32 to index
    %546 = memref.load %arg1[%544, %545] : memref<2x16xf32, #tpu.memory_space<smem>>
    %547 = arith.index_cast %20 : i32 to index
    %548 = arith.index_cast %537 : i32 to index
    %549 = memref.load %arg2[%547, %548] : memref<2x16xf32, #tpu.memory_space<smem>>
    %550 = vector.broadcast %540 : f32 to vector<2x128xf32>
    %551 = arith.subf %550, %16 : vector<2x128xf32>
    %552 = vector.broadcast %543 : f32 to vector<2x128xf32>
    %553 = arith.subf %552, %18 : vector<2x128xf32>
    %554 = vector.broadcast %546 : f32 to vector<2x128xf32>
    %555 = arith.subf %554, %16 : vector<2x128xf32>
    %556 = vector.broadcast %549 : f32 to vector<2x128xf32>
    %557 = arith.subf %556, %18 : vector<2x128xf32>
    %558 = arith.mulf %551, %551 : vector<2x128xf32>
    %559 = arith.mulf %553, %553 : vector<2x128xf32>
    %560 = arith.addf %558, %559 : vector<2x128xf32>
    %561 = math.sqrt %560 : vector<2x128xf32>
    %562 = arith.mulf %555, %555 : vector<2x128xf32>
    %563 = arith.mulf %557, %557 : vector<2x128xf32>
    %564 = arith.addf %562, %563 : vector<2x128xf32>
    %565 = math.sqrt %564 : vector<2x128xf32>
    %566 = arith.minimumf %482, %561 : vector<2x128xf32>
    %567 = arith.mulf %551, %557 : vector<2x128xf32>
    %568 = arith.mulf %553, %555 : vector<2x128xf32>
    %569 = arith.subf %567, %568 : vector<2x128xf32>
    %cst_141 = arith.constant 0.000000e+00 : f32
    %570 = vector.broadcast %cst_141 : f32 to vector<2x128xf32>
    %571 = arith.cmpf oge, %569, %570 : vector<2x128xf32>
    %cst_142 = arith.constant 1.000000e+00 : f32
    %cst_143 = arith.constant -1.000000e+00 : f32
    %572 = vector.broadcast %cst_142 : f32 to vector<2x128xf32>
    %573 = vector.broadcast %cst_143 : f32 to vector<2x128xf32>
    %574 = arith.select %571, %572, %573 : vector<2x128xi1>, vector<2x128xf32>
    %575 = arith.mulf %551, %555 : vector<2x128xf32>
    %576 = arith.mulf %553, %557 : vector<2x128xf32>
    %577 = arith.addf %575, %576 : vector<2x128xf32>
    %578 = arith.mulf %561, %565 : vector<2x128xf32>
    %cst_144 = arith.constant 9.99999974E-5 : f32
    %579 = vector.broadcast %cst_144 : f32 to vector<2x128xf32>
    %580 = arith.addf %578, %579 : vector<2x128xf32>
    %581 = tpu.reciprocal %580 {approx = true} : vector<2x128xf32> -> vector<2x128xf32>
    %582 = arith.mulf %577, %581 : vector<2x128xf32>
    %cst_145 = arith.constant -0.999899983 : f32
    %cst_146 = arith.constant 0.999899983 : f32
    %583 = vector.broadcast %cst_145 : f32 to vector<2x128xf32>
    %584 = arith.maximumf %583, %582 : vector<2x128xf32>
    %585 = vector.broadcast %cst_146 : f32 to vector<2x128xf32>
    %586 = arith.minimumf %585, %584 : vector<2x128xf32>
    %587 = math.absf %586 : vector<2x128xf32>
    %cst_147 = arith.constant -1.872930e-02 : f32
    %588 = vector.broadcast %cst_147 : f32 to vector<2x128xf32>
    %589 = arith.mulf %587, %588 : vector<2x128xf32>
    %cst_148 = arith.constant 7.426100e-02 : f32
    %590 = vector.broadcast %cst_148 : f32 to vector<2x128xf32>
    %591 = arith.addf %590, %589 : vector<2x128xf32>
    %592 = arith.mulf %587, %591 : vector<2x128xf32>
    %cst_149 = arith.constant -0.212114394 : f32
    %593 = vector.broadcast %cst_149 : f32 to vector<2x128xf32>
    %594 = arith.addf %593, %592 : vector<2x128xf32>
    %595 = arith.mulf %587, %594 : vector<2x128xf32>
    %cst_150 = arith.constant 1.57072878 : f32
    %596 = vector.broadcast %cst_150 : f32 to vector<2x128xf32>
    %597 = arith.addf %596, %595 : vector<2x128xf32>
    %cst_151 = arith.constant 1.000000e+00 : f32
    %598 = vector.broadcast %cst_151 : f32 to vector<2x128xf32>
    %599 = arith.subf %598, %587 : vector<2x128xf32>
    %cst_152 = arith.constant 0.000000e+00 : f32
    %600 = vector.broadcast %cst_152 : f32 to vector<2x128xf32>
    %601 = arith.maximumf %599, %600 : vector<2x128xf32>
    %602 = math.sqrt %601 : vector<2x128xf32>
    %603 = arith.mulf %602, %597 : vector<2x128xf32>
    %cst_153 = arith.constant 0.000000e+00 : f32
    %604 = vector.broadcast %cst_153 : f32 to vector<2x128xf32>
    %605 = arith.cmpf oge, %586, %604 : vector<2x128xf32>
    %cst_154 = arith.constant 3.14159274 : f32
    %606 = vector.broadcast %cst_154 : f32 to vector<2x128xf32>
    %607 = arith.subf %606, %603 : vector<2x128xf32>
    %608 = arith.select %605, %603, %607 : vector<2x128xi1>, vector<2x128xf32>
    %609 = arith.mulf %574, %608 : vector<2x128xf32>
    %610 = arith.addf %526, %609 : vector<2x128xf32>
    %c7_i32 = arith.constant 7 : i32
    %c1_i32_155 = arith.constant 1 : i32
    %611 = arith.addi %c7_i32, %c1_i32_155 : i32
    %c16_i32_156 = arith.constant 16 : i32
    %c0_i32_157 = arith.constant 0 : i32
    %612 = arith.cmpi eq, %c16_i32_156, %c0_i32_157 : i32
    %c1_i32_158 = arith.constant 1 : i32
    %613 = arith.select %612, %c1_i32_158, %c16_i32_156 : i32
    %614 = arith.remsi %611, %613 : i32
    %c0_i32_159 = arith.constant 0 : i32
    %615 = arith.cmpi ne, %614, %c0_i32_159 : i32
    %c0_i32_160 = arith.constant 0 : i32
    %616 = arith.cmpi slt, %614, %c0_i32_160 : i32
    %c0_i32_161 = arith.constant 0 : i32
    %617 = arith.cmpi slt, %613, %c0_i32_161 : i32
    %618 = arith.xori %616, %617 : i1
    %619 = arith.andi %618, %615 : i1
    %620 = arith.addi %614, %613 : i32
    %621 = arith.select %619, %620, %614 : i32
    %622 = arith.index_cast %20 : i32 to index
    %623 = arith.index_cast %c7_i32 : i32 to index
    %624 = memref.load %arg1[%622, %623] : memref<2x16xf32, #tpu.memory_space<smem>>
    %625 = arith.index_cast %20 : i32 to index
    %626 = arith.index_cast %c7_i32 : i32 to index
    %627 = memref.load %arg2[%625, %626] : memref<2x16xf32, #tpu.memory_space<smem>>
    %628 = arith.index_cast %20 : i32 to index
    %629 = arith.index_cast %621 : i32 to index
    %630 = memref.load %arg1[%628, %629] : memref<2x16xf32, #tpu.memory_space<smem>>
    %631 = arith.index_cast %20 : i32 to index
    %632 = arith.index_cast %621 : i32 to index
    %633 = memref.load %arg2[%631, %632] : memref<2x16xf32, #tpu.memory_space<smem>>
    %634 = vector.broadcast %624 : f32 to vector<2x128xf32>
    %635 = arith.subf %634, %16 : vector<2x128xf32>
    %636 = vector.broadcast %627 : f32 to vector<2x128xf32>
    %637 = arith.subf %636, %18 : vector<2x128xf32>
    %638 = vector.broadcast %630 : f32 to vector<2x128xf32>
    %639 = arith.subf %638, %16 : vector<2x128xf32>
    %640 = vector.broadcast %633 : f32 to vector<2x128xf32>
    %641 = arith.subf %640, %18 : vector<2x128xf32>
    %642 = arith.mulf %635, %635 : vector<2x128xf32>
    %643 = arith.mulf %637, %637 : vector<2x128xf32>
    %644 = arith.addf %642, %643 : vector<2x128xf32>
    %645 = math.sqrt %644 : vector<2x128xf32>
    %646 = arith.mulf %639, %639 : vector<2x128xf32>
    %647 = arith.mulf %641, %641 : vector<2x128xf32>
    %648 = arith.addf %646, %647 : vector<2x128xf32>
    %649 = math.sqrt %648 : vector<2x128xf32>
    %650 = arith.minimumf %566, %645 : vector<2x128xf32>
    %651 = arith.mulf %635, %641 : vector<2x128xf32>
    %652 = arith.mulf %637, %639 : vector<2x128xf32>
    %653 = arith.subf %651, %652 : vector<2x128xf32>
    %cst_162 = arith.constant 0.000000e+00 : f32
    %654 = vector.broadcast %cst_162 : f32 to vector<2x128xf32>
    %655 = arith.cmpf oge, %653, %654 : vector<2x128xf32>
    %cst_163 = arith.constant 1.000000e+00 : f32
    %cst_164 = arith.constant -1.000000e+00 : f32
    %656 = vector.broadcast %cst_163 : f32 to vector<2x128xf32>
    %657 = vector.broadcast %cst_164 : f32 to vector<2x128xf32>
    %658 = arith.select %655, %656, %657 : vector<2x128xi1>, vector<2x128xf32>
    %659 = arith.mulf %635, %639 : vector<2x128xf32>
    %660 = arith.mulf %637, %641 : vector<2x128xf32>
    %661 = arith.addf %659, %660 : vector<2x128xf32>
    %662 = arith.mulf %645, %649 : vector<2x128xf32>
    %cst_165 = arith.constant 9.99999974E-5 : f32
    %663 = vector.broadcast %cst_165 : f32 to vector<2x128xf32>
    %664 = arith.addf %662, %663 : vector<2x128xf32>
    %665 = tpu.reciprocal %664 {approx = true} : vector<2x128xf32> -> vector<2x128xf32>
    %666 = arith.mulf %661, %665 : vector<2x128xf32>
    %cst_166 = arith.constant -0.999899983 : f32
    %cst_167 = arith.constant 0.999899983 : f32
    %667 = vector.broadcast %cst_166 : f32 to vector<2x128xf32>
    %668 = arith.maximumf %667, %666 : vector<2x128xf32>
    %669 = vector.broadcast %cst_167 : f32 to vector<2x128xf32>
    %670 = arith.minimumf %669, %668 : vector<2x128xf32>
    %671 = math.absf %670 : vector<2x128xf32>
    %cst_168 = arith.constant -1.872930e-02 : f32
    %672 = vector.broadcast %cst_168 : f32 to vector<2x128xf32>
    %673 = arith.mulf %671, %672 : vector<2x128xf32>
    %cst_169 = arith.constant 7.426100e-02 : f32
    %674 = vector.broadcast %cst_169 : f32 to vector<2x128xf32>
    %675 = arith.addf %674, %673 : vector<2x128xf32>
    %676 = arith.mulf %671, %675 : vector<2x128xf32>
    %cst_170 = arith.constant -0.212114394 : f32
    %677 = vector.broadcast %cst_170 : f32 to vector<2x128xf32>
    %678 = arith.addf %677, %676 : vector<2x128xf32>
    %679 = arith.mulf %671, %678 : vector<2x128xf32>
    %cst_171 = arith.constant 1.57072878 : f32
    %680 = vector.broadcast %cst_171 : f32 to vector<2x128xf32>
    %681 = arith.addf %680, %679 : vector<2x128xf32>
    %cst_172 = arith.constant 1.000000e+00 : f32
    %682 = vector.broadcast %cst_172 : f32 to vector<2x128xf32>
    %683 = arith.subf %682, %671 : vector<2x128xf32>
    %cst_173 = arith.constant 0.000000e+00 : f32
    %684 = vector.broadcast %cst_173 : f32 to vector<2x128xf32>
    %685 = arith.maximumf %683, %684 : vector<2x128xf32>
    %686 = math.sqrt %685 : vector<2x128xf32>
    %687 = arith.mulf %686, %681 : vector<2x128xf32>
    %cst_174 = arith.constant 0.000000e+00 : f32
    %688 = vector.broadcast %cst_174 : f32 to vector<2x128xf32>
    %689 = arith.cmpf oge, %670, %688 : vector<2x128xf32>
    %cst_175 = arith.constant 3.14159274 : f32
    %690 = vector.broadcast %cst_175 : f32 to vector<2x128xf32>
    %691 = arith.subf %690, %687 : vector<2x128xf32>
    %692 = arith.select %689, %687, %691 : vector<2x128xi1>, vector<2x128xf32>
    %693 = arith.mulf %658, %692 : vector<2x128xf32>
    %694 = arith.addf %610, %693 : vector<2x128xf32>
    %c8_i32 = arith.constant 8 : i32
    %c1_i32_176 = arith.constant 1 : i32
    %695 = arith.addi %c8_i32, %c1_i32_176 : i32
    %c16_i32_177 = arith.constant 16 : i32
    %c0_i32_178 = arith.constant 0 : i32
    %696 = arith.cmpi eq, %c16_i32_177, %c0_i32_178 : i32
    %c1_i32_179 = arith.constant 1 : i32
    %697 = arith.select %696, %c1_i32_179, %c16_i32_177 : i32
    %698 = arith.remsi %695, %697 : i32
    %c0_i32_180 = arith.constant 0 : i32
    %699 = arith.cmpi ne, %698, %c0_i32_180 : i32
    %c0_i32_181 = arith.constant 0 : i32
    %700 = arith.cmpi slt, %698, %c0_i32_181 : i32
    %c0_i32_182 = arith.constant 0 : i32
    %701 = arith.cmpi slt, %697, %c0_i32_182 : i32
    %702 = arith.xori %700, %701 : i1
    %703 = arith.andi %702, %699 : i1
    %704 = arith.addi %698, %697 : i32
    %705 = arith.select %703, %704, %698 : i32
    %706 = arith.index_cast %20 : i32 to index
    %707 = arith.index_cast %c8_i32 : i32 to index
    %708 = memref.load %arg1[%706, %707] : memref<2x16xf32, #tpu.memory_space<smem>>
    %709 = arith.index_cast %20 : i32 to index
    %710 = arith.index_cast %c8_i32 : i32 to index
    %711 = memref.load %arg2[%709, %710] : memref<2x16xf32, #tpu.memory_space<smem>>
    %712 = arith.index_cast %20 : i32 to index
    %713 = arith.index_cast %705 : i32 to index
    %714 = memref.load %arg1[%712, %713] : memref<2x16xf32, #tpu.memory_space<smem>>
    %715 = arith.index_cast %20 : i32 to index
    %716 = arith.index_cast %705 : i32 to index
    %717 = memref.load %arg2[%715, %716] : memref<2x16xf32, #tpu.memory_space<smem>>
    %718 = vector.broadcast %708 : f32 to vector<2x128xf32>
    %719 = arith.subf %718, %16 : vector<2x128xf32>
    %720 = vector.broadcast %711 : f32 to vector<2x128xf32>
    %721 = arith.subf %720, %18 : vector<2x128xf32>
    %722 = vector.broadcast %714 : f32 to vector<2x128xf32>
    %723 = arith.subf %722, %16 : vector<2x128xf32>
    %724 = vector.broadcast %717 : f32 to vector<2x128xf32>
    %725 = arith.subf %724, %18 : vector<2x128xf32>
    %726 = arith.mulf %719, %719 : vector<2x128xf32>
    %727 = arith.mulf %721, %721 : vector<2x128xf32>
    %728 = arith.addf %726, %727 : vector<2x128xf32>
    %729 = math.sqrt %728 : vector<2x128xf32>
    %730 = arith.mulf %723, %723 : vector<2x128xf32>
    %731 = arith.mulf %725, %725 : vector<2x128xf32>
    %732 = arith.addf %730, %731 : vector<2x128xf32>
    %733 = math.sqrt %732 : vector<2x128xf32>
    %734 = arith.minimumf %650, %729 : vector<2x128xf32>
    %735 = arith.mulf %719, %725 : vector<2x128xf32>
    %736 = arith.mulf %721, %723 : vector<2x128xf32>
    %737 = arith.subf %735, %736 : vector<2x128xf32>
    %cst_183 = arith.constant 0.000000e+00 : f32
    %738 = vector.broadcast %cst_183 : f32 to vector<2x128xf32>
    %739 = arith.cmpf oge, %737, %738 : vector<2x128xf32>
    %cst_184 = arith.constant 1.000000e+00 : f32
    %cst_185 = arith.constant -1.000000e+00 : f32
    %740 = vector.broadcast %cst_184 : f32 to vector<2x128xf32>
    %741 = vector.broadcast %cst_185 : f32 to vector<2x128xf32>
    %742 = arith.select %739, %740, %741 : vector<2x128xi1>, vector<2x128xf32>
    %743 = arith.mulf %719, %723 : vector<2x128xf32>
    %744 = arith.mulf %721, %725 : vector<2x128xf32>
    %745 = arith.addf %743, %744 : vector<2x128xf32>
    %746 = arith.mulf %729, %733 : vector<2x128xf32>
    %cst_186 = arith.constant 9.99999974E-5 : f32
    %747 = vector.broadcast %cst_186 : f32 to vector<2x128xf32>
    %748 = arith.addf %746, %747 : vector<2x128xf32>
    %749 = tpu.reciprocal %748 {approx = true} : vector<2x128xf32> -> vector<2x128xf32>
    %750 = arith.mulf %745, %749 : vector<2x128xf32>
    %cst_187 = arith.constant -0.999899983 : f32
    %cst_188 = arith.constant 0.999899983 : f32
    %751 = vector.broadcast %cst_187 : f32 to vector<2x128xf32>
    %752 = arith.maximumf %751, %750 : vector<2x128xf32>
    %753 = vector.broadcast %cst_188 : f32 to vector<2x128xf32>
    %754 = arith.minimumf %753, %752 : vector<2x128xf32>
    %755 = math.absf %754 : vector<2x128xf32>
    %cst_189 = arith.constant -1.872930e-02 : f32
    %756 = vector.broadcast %cst_189 : f32 to vector<2x128xf32>
    %757 = arith.mulf %755, %756 : vector<2x128xf32>
    %cst_190 = arith.constant 7.426100e-02 : f32
    %758 = vector.broadcast %cst_190 : f32 to vector<2x128xf32>
    %759 = arith.addf %758, %757 : vector<2x128xf32>
    %760 = arith.mulf %755, %759 : vector<2x128xf32>
    %cst_191 = arith.constant -0.212114394 : f32
    %761 = vector.broadcast %cst_191 : f32 to vector<2x128xf32>
    %762 = arith.addf %761, %760 : vector<2x128xf32>
    %763 = arith.mulf %755, %762 : vector<2x128xf32>
    %cst_192 = arith.constant 1.57072878 : f32
    %764 = vector.broadcast %cst_192 : f32 to vector<2x128xf32>
    %765 = arith.addf %764, %763 : vector<2x128xf32>
    %cst_193 = arith.constant 1.000000e+00 : f32
    %766 = vector.broadcast %cst_193 : f32 to vector<2x128xf32>
    %767 = arith.subf %766, %755 : vector<2x128xf32>
    %cst_194 = arith.constant 0.000000e+00 : f32
    %768 = vector.broadcast %cst_194 : f32 to vector<2x128xf32>
    %769 = arith.maximumf %767, %768 : vector<2x128xf32>
    %770 = math.sqrt %769 : vector<2x128xf32>
    %771 = arith.mulf %770, %765 : vector<2x128xf32>
    %cst_195 = arith.constant 0.000000e+00 : f32
    %772 = vector.broadcast %cst_195 : f32 to vector<2x128xf32>
    %773 = arith.cmpf oge, %754, %772 : vector<2x128xf32>
    %cst_196 = arith.constant 3.14159274 : f32
    %774 = vector.broadcast %cst_196 : f32 to vector<2x128xf32>
    %775 = arith.subf %774, %771 : vector<2x128xf32>
    %776 = arith.select %773, %771, %775 : vector<2x128xi1>, vector<2x128xf32>
    %777 = arith.mulf %742, %776 : vector<2x128xf32>
    %778 = arith.addf %694, %777 : vector<2x128xf32>
    %c9_i32 = arith.constant 9 : i32
    %c1_i32_197 = arith.constant 1 : i32
    %779 = arith.addi %c9_i32, %c1_i32_197 : i32
    %c16_i32_198 = arith.constant 16 : i32
    %c0_i32_199 = arith.constant 0 : i32
    %780 = arith.cmpi eq, %c16_i32_198, %c0_i32_199 : i32
    %c1_i32_200 = arith.constant 1 : i32
    %781 = arith.select %780, %c1_i32_200, %c16_i32_198 : i32
    %782 = arith.remsi %779, %781 : i32
    %c0_i32_201 = arith.constant 0 : i32
    %783 = arith.cmpi ne, %782, %c0_i32_201 : i32
    %c0_i32_202 = arith.constant 0 : i32
    %784 = arith.cmpi slt, %782, %c0_i32_202 : i32
    %c0_i32_203 = arith.constant 0 : i32
    %785 = arith.cmpi slt, %781, %c0_i32_203 : i32
    %786 = arith.xori %784, %785 : i1
    %787 = arith.andi %786, %783 : i1
    %788 = arith.addi %782, %781 : i32
    %789 = arith.select %787, %788, %782 : i32
    %790 = arith.index_cast %20 : i32 to index
    %791 = arith.index_cast %c9_i32 : i32 to index
    %792 = memref.load %arg1[%790, %791] : memref<2x16xf32, #tpu.memory_space<smem>>
    %793 = arith.index_cast %20 : i32 to index
    %794 = arith.index_cast %c9_i32 : i32 to index
    %795 = memref.load %arg2[%793, %794] : memref<2x16xf32, #tpu.memory_space<smem>>
    %796 = arith.index_cast %20 : i32 to index
    %797 = arith.index_cast %789 : i32 to index
    %798 = memref.load %arg1[%796, %797] : memref<2x16xf32, #tpu.memory_space<smem>>
    %799 = arith.index_cast %20 : i32 to index
    %800 = arith.index_cast %789 : i32 to index
    %801 = memref.load %arg2[%799, %800] : memref<2x16xf32, #tpu.memory_space<smem>>
    %802 = vector.broadcast %792 : f32 to vector<2x128xf32>
    %803 = arith.subf %802, %16 : vector<2x128xf32>
    %804 = vector.broadcast %795 : f32 to vector<2x128xf32>
    %805 = arith.subf %804, %18 : vector<2x128xf32>
    %806 = vector.broadcast %798 : f32 to vector<2x128xf32>
    %807 = arith.subf %806, %16 : vector<2x128xf32>
    %808 = vector.broadcast %801 : f32 to vector<2x128xf32>
    %809 = arith.subf %808, %18 : vector<2x128xf32>
    %810 = arith.mulf %803, %803 : vector<2x128xf32>
    %811 = arith.mulf %805, %805 : vector<2x128xf32>
    %812 = arith.addf %810, %811 : vector<2x128xf32>
    %813 = math.sqrt %812 : vector<2x128xf32>
    %814 = arith.mulf %807, %807 : vector<2x128xf32>
    %815 = arith.mulf %809, %809 : vector<2x128xf32>
    %816 = arith.addf %814, %815 : vector<2x128xf32>
    %817 = math.sqrt %816 : vector<2x128xf32>
    %818 = arith.minimumf %734, %813 : vector<2x128xf32>
    %819 = arith.mulf %803, %809 : vector<2x128xf32>
    %820 = arith.mulf %805, %807 : vector<2x128xf32>
    %821 = arith.subf %819, %820 : vector<2x128xf32>
    %cst_204 = arith.constant 0.000000e+00 : f32
    %822 = vector.broadcast %cst_204 : f32 to vector<2x128xf32>
    %823 = arith.cmpf oge, %821, %822 : vector<2x128xf32>
    %cst_205 = arith.constant 1.000000e+00 : f32
    %cst_206 = arith.constant -1.000000e+00 : f32
    %824 = vector.broadcast %cst_205 : f32 to vector<2x128xf32>
    %825 = vector.broadcast %cst_206 : f32 to vector<2x128xf32>
    %826 = arith.select %823, %824, %825 : vector<2x128xi1>, vector<2x128xf32>
    %827 = arith.mulf %803, %807 : vector<2x128xf32>
    %828 = arith.mulf %805, %809 : vector<2x128xf32>
    %829 = arith.addf %827, %828 : vector<2x128xf32>
    %830 = arith.mulf %813, %817 : vector<2x128xf32>
    %cst_207 = arith.constant 9.99999974E-5 : f32
    %831 = vector.broadcast %cst_207 : f32 to vector<2x128xf32>
    %832 = arith.addf %830, %831 : vector<2x128xf32>
    %833 = tpu.reciprocal %832 {approx = true} : vector<2x128xf32> -> vector<2x128xf32>
    %834 = arith.mulf %829, %833 : vector<2x128xf32>
    %cst_208 = arith.constant -0.999899983 : f32
    %cst_209 = arith.constant 0.999899983 : f32
    %835 = vector.broadcast %cst_208 : f32 to vector<2x128xf32>
    %836 = arith.maximumf %835, %834 : vector<2x128xf32>
    %837 = vector.broadcast %cst_209 : f32 to vector<2x128xf32>
    %838 = arith.minimumf %837, %836 : vector<2x128xf32>
    %839 = math.absf %838 : vector<2x128xf32>
    %cst_210 = arith.constant -1.872930e-02 : f32
    %840 = vector.broadcast %cst_210 : f32 to vector<2x128xf32>
    %841 = arith.mulf %839, %840 : vector<2x128xf32>
    %cst_211 = arith.constant 7.426100e-02 : f32
    %842 = vector.broadcast %cst_211 : f32 to vector<2x128xf32>
    %843 = arith.addf %842, %841 : vector<2x128xf32>
    %844 = arith.mulf %839, %843 : vector<2x128xf32>
    %cst_212 = arith.constant -0.212114394 : f32
    %845 = vector.broadcast %cst_212 : f32 to vector<2x128xf32>
    %846 = arith.addf %845, %844 : vector<2x128xf32>
    %847 = arith.mulf %839, %846 : vector<2x128xf32>
    %cst_213 = arith.constant 1.57072878 : f32
    %848 = vector.broadcast %cst_213 : f32 to vector<2x128xf32>
    %849 = arith.addf %848, %847 : vector<2x128xf32>
    %cst_214 = arith.constant 1.000000e+00 : f32
    %850 = vector.broadcast %cst_214 : f32 to vector<2x128xf32>
    %851 = arith.subf %850, %839 : vector<2x128xf32>
    %cst_215 = arith.constant 0.000000e+00 : f32
    %852 = vector.broadcast %cst_215 : f32 to vector<2x128xf32>
    %853 = arith.maximumf %851, %852 : vector<2x128xf32>
    %854 = math.sqrt %853 : vector<2x128xf32>
    %855 = arith.mulf %854, %849 : vector<2x128xf32>
    %cst_216 = arith.constant 0.000000e+00 : f32
    %856 = vector.broadcast %cst_216 : f32 to vector<2x128xf32>
    %857 = arith.cmpf oge, %838, %856 : vector<2x128xf32>
    %cst_217 = arith.constant 3.14159274 : f32
    %858 = vector.broadcast %cst_217 : f32 to vector<2x128xf32>
    %859 = arith.subf %858, %855 : vector<2x128xf32>
    %860 = arith.select %857, %855, %859 : vector<2x128xi1>, vector<2x128xf32>
    %861 = arith.mulf %826, %860 : vector<2x128xf32>
    %862 = arith.addf %778, %861 : vector<2x128xf32>
    %c10_i32 = arith.constant 10 : i32
    %c1_i32_218 = arith.constant 1 : i32
    %863 = arith.addi %c10_i32, %c1_i32_218 : i32
    %c16_i32_219 = arith.constant 16 : i32
    %c0_i32_220 = arith.constant 0 : i32
    %864 = arith.cmpi eq, %c16_i32_219, %c0_i32_220 : i32
    %c1_i32_221 = arith.constant 1 : i32
    %865 = arith.select %864, %c1_i32_221, %c16_i32_219 : i32
    %866 = arith.remsi %863, %865 : i32
    %c0_i32_222 = arith.constant 0 : i32
    %867 = arith.cmpi ne, %866, %c0_i32_222 : i32
    %c0_i32_223 = arith.constant 0 : i32
    %868 = arith.cmpi slt, %866, %c0_i32_223 : i32
    %c0_i32_224 = arith.constant 0 : i32
    %869 = arith.cmpi slt, %865, %c0_i32_224 : i32
    %870 = arith.xori %868, %869 : i1
    %871 = arith.andi %870, %867 : i1
    %872 = arith.addi %866, %865 : i32
    %873 = arith.select %871, %872, %866 : i32
    %874 = arith.index_cast %20 : i32 to index
    %875 = arith.index_cast %c10_i32 : i32 to index
    %876 = memref.load %arg1[%874, %875] : memref<2x16xf32, #tpu.memory_space<smem>>
    %877 = arith.index_cast %20 : i32 to index
    %878 = arith.index_cast %c10_i32 : i32 to index
    %879 = memref.load %arg2[%877, %878] : memref<2x16xf32, #tpu.memory_space<smem>>
    %880 = arith.index_cast %20 : i32 to index
    %881 = arith.index_cast %873 : i32 to index
    %882 = memref.load %arg1[%880, %881] : memref<2x16xf32, #tpu.memory_space<smem>>
    %883 = arith.index_cast %20 : i32 to index
    %884 = arith.index_cast %873 : i32 to index
    %885 = memref.load %arg2[%883, %884] : memref<2x16xf32, #tpu.memory_space<smem>>
    %886 = vector.broadcast %876 : f32 to vector<2x128xf32>
    %887 = arith.subf %886, %16 : vector<2x128xf32>
    %888 = vector.broadcast %879 : f32 to vector<2x128xf32>
    %889 = arith.subf %888, %18 : vector<2x128xf32>
    %890 = vector.broadcast %882 : f32 to vector<2x128xf32>
    %891 = arith.subf %890, %16 : vector<2x128xf32>
    %892 = vector.broadcast %885 : f32 to vector<2x128xf32>
    %893 = arith.subf %892, %18 : vector<2x128xf32>
    %894 = arith.mulf %887, %887 : vector<2x128xf32>
    %895 = arith.mulf %889, %889 : vector<2x128xf32>
    %896 = arith.addf %894, %895 : vector<2x128xf32>
    %897 = math.sqrt %896 : vector<2x128xf32>
    %898 = arith.mulf %891, %891 : vector<2x128xf32>
    %899 = arith.mulf %893, %893 : vector<2x128xf32>
    %900 = arith.addf %898, %899 : vector<2x128xf32>
    %901 = math.sqrt %900 : vector<2x128xf32>
    %902 = arith.minimumf %818, %897 : vector<2x128xf32>
    %903 = arith.mulf %887, %893 : vector<2x128xf32>
    %904 = arith.mulf %889, %891 : vector<2x128xf32>
    %905 = arith.subf %903, %904 : vector<2x128xf32>
    %cst_225 = arith.constant 0.000000e+00 : f32
    %906 = vector.broadcast %cst_225 : f32 to vector<2x128xf32>
    %907 = arith.cmpf oge, %905, %906 : vector<2x128xf32>
    %cst_226 = arith.constant 1.000000e+00 : f32
    %cst_227 = arith.constant -1.000000e+00 : f32
    %908 = vector.broadcast %cst_226 : f32 to vector<2x128xf32>
    %909 = vector.broadcast %cst_227 : f32 to vector<2x128xf32>
    %910 = arith.select %907, %908, %909 : vector<2x128xi1>, vector<2x128xf32>
    %911 = arith.mulf %887, %891 : vector<2x128xf32>
    %912 = arith.mulf %889, %893 : vector<2x128xf32>
    %913 = arith.addf %911, %912 : vector<2x128xf32>
    %914 = arith.mulf %897, %901 : vector<2x128xf32>
    %cst_228 = arith.constant 9.99999974E-5 : f32
    %915 = vector.broadcast %cst_228 : f32 to vector<2x128xf32>
    %916 = arith.addf %914, %915 : vector<2x128xf32>
    %917 = tpu.reciprocal %916 {approx = true} : vector<2x128xf32> -> vector<2x128xf32>
    %918 = arith.mulf %913, %917 : vector<2x128xf32>
    %cst_229 = arith.constant -0.999899983 : f32
    %cst_230 = arith.constant 0.999899983 : f32
    %919 = vector.broadcast %cst_229 : f32 to vector<2x128xf32>
    %920 = arith.maximumf %919, %918 : vector<2x128xf32>
    %921 = vector.broadcast %cst_230 : f32 to vector<2x128xf32>
    %922 = arith.minimumf %921, %920 : vector<2x128xf32>
    %923 = math.absf %922 : vector<2x128xf32>
    %cst_231 = arith.constant -1.872930e-02 : f32
    %924 = vector.broadcast %cst_231 : f32 to vector<2x128xf32>
    %925 = arith.mulf %923, %924 : vector<2x128xf32>
    %cst_232 = arith.constant 7.426100e-02 : f32
    %926 = vector.broadcast %cst_232 : f32 to vector<2x128xf32>
    %927 = arith.addf %926, %925 : vector<2x128xf32>
    %928 = arith.mulf %923, %927 : vector<2x128xf32>
    %cst_233 = arith.constant -0.212114394 : f32
    %929 = vector.broadcast %cst_233 : f32 to vector<2x128xf32>
    %930 = arith.addf %929, %928 : vector<2x128xf32>
    %931 = arith.mulf %923, %930 : vector<2x128xf32>
    %cst_234 = arith.constant 1.57072878 : f32
    %932 = vector.broadcast %cst_234 : f32 to vector<2x128xf32>
    %933 = arith.addf %932, %931 : vector<2x128xf32>
    %cst_235 = arith.constant 1.000000e+00 : f32
    %934 = vector.broadcast %cst_235 : f32 to vector<2x128xf32>
    %935 = arith.subf %934, %923 : vector<2x128xf32>
    %cst_236 = arith.constant 0.000000e+00 : f32
    %936 = vector.broadcast %cst_236 : f32 to vector<2x128xf32>
    %937 = arith.maximumf %935, %936 : vector<2x128xf32>
    %938 = math.sqrt %937 : vector<2x128xf32>
    %939 = arith.mulf %938, %933 : vector<2x128xf32>
    %cst_237 = arith.constant 0.000000e+00 : f32
    %940 = vector.broadcast %cst_237 : f32 to vector<2x128xf32>
    %941 = arith.cmpf oge, %922, %940 : vector<2x128xf32>
    %cst_238 = arith.constant 3.14159274 : f32
    %942 = vector.broadcast %cst_238 : f32 to vector<2x128xf32>
    %943 = arith.subf %942, %939 : vector<2x128xf32>
    %944 = arith.select %941, %939, %943 : vector<2x128xi1>, vector<2x128xf32>
    %945 = arith.mulf %910, %944 : vector<2x128xf32>
    %946 = arith.addf %862, %945 : vector<2x128xf32>
    %c11_i32 = arith.constant 11 : i32
    %c1_i32_239 = arith.constant 1 : i32
    %947 = arith.addi %c11_i32, %c1_i32_239 : i32
    %c16_i32_240 = arith.constant 16 : i32
    %c0_i32_241 = arith.constant 0 : i32
    %948 = arith.cmpi eq, %c16_i32_240, %c0_i32_241 : i32
    %c1_i32_242 = arith.constant 1 : i32
    %949 = arith.select %948, %c1_i32_242, %c16_i32_240 : i32
    %950 = arith.remsi %947, %949 : i32
    %c0_i32_243 = arith.constant 0 : i32
    %951 = arith.cmpi ne, %950, %c0_i32_243 : i32
    %c0_i32_244 = arith.constant 0 : i32
    %952 = arith.cmpi slt, %950, %c0_i32_244 : i32
    %c0_i32_245 = arith.constant 0 : i32
    %953 = arith.cmpi slt, %949, %c0_i32_245 : i32
    %954 = arith.xori %952, %953 : i1
    %955 = arith.andi %954, %951 : i1
    %956 = arith.addi %950, %949 : i32
    %957 = arith.select %955, %956, %950 : i32
    %958 = arith.index_cast %20 : i32 to index
    %959 = arith.index_cast %c11_i32 : i32 to index
    %960 = memref.load %arg1[%958, %959] : memref<2x16xf32, #tpu.memory_space<smem>>
    %961 = arith.index_cast %20 : i32 to index
    %962 = arith.index_cast %c11_i32 : i32 to index
    %963 = memref.load %arg2[%961, %962] : memref<2x16xf32, #tpu.memory_space<smem>>
    %964 = arith.index_cast %20 : i32 to index
    %965 = arith.index_cast %957 : i32 to index
    %966 = memref.load %arg1[%964, %965] : memref<2x16xf32, #tpu.memory_space<smem>>
    %967 = arith.index_cast %20 : i32 to index
    %968 = arith.index_cast %957 : i32 to index
    %969 = memref.load %arg2[%967, %968] : memref<2x16xf32, #tpu.memory_space<smem>>
    %970 = vector.broadcast %960 : f32 to vector<2x128xf32>
    %971 = arith.subf %970, %16 : vector<2x128xf32>
    %972 = vector.broadcast %963 : f32 to vector<2x128xf32>
    %973 = arith.subf %972, %18 : vector<2x128xf32>
    %974 = vector.broadcast %966 : f32 to vector<2x128xf32>
    %975 = arith.subf %974, %16 : vector<2x128xf32>
    %976 = vector.broadcast %969 : f32 to vector<2x128xf32>
    %977 = arith.subf %976, %18 : vector<2x128xf32>
    %978 = arith.mulf %971, %971 : vector<2x128xf32>
    %979 = arith.mulf %973, %973 : vector<2x128xf32>
    %980 = arith.addf %978, %979 : vector<2x128xf32>
    %981 = math.sqrt %980 : vector<2x128xf32>
    %982 = arith.mulf %975, %975 : vector<2x128xf32>
    %983 = arith.mulf %977, %977 : vector<2x128xf32>
    %984 = arith.addf %982, %983 : vector<2x128xf32>
    %985 = math.sqrt %984 : vector<2x128xf32>
    %986 = arith.minimumf %902, %981 : vector<2x128xf32>
    %987 = arith.mulf %971, %977 : vector<2x128xf32>
    %988 = arith.mulf %973, %975 : vector<2x128xf32>
    %989 = arith.subf %987, %988 : vector<2x128xf32>
    %cst_246 = arith.constant 0.000000e+00 : f32
    %990 = vector.broadcast %cst_246 : f32 to vector<2x128xf32>
    %991 = arith.cmpf oge, %989, %990 : vector<2x128xf32>
    %cst_247 = arith.constant 1.000000e+00 : f32
    %cst_248 = arith.constant -1.000000e+00 : f32
    %992 = vector.broadcast %cst_247 : f32 to vector<2x128xf32>
    %993 = vector.broadcast %cst_248 : f32 to vector<2x128xf32>
    %994 = arith.select %991, %992, %993 : vector<2x128xi1>, vector<2x128xf32>
    %995 = arith.mulf %971, %975 : vector<2x128xf32>
    %996 = arith.mulf %973, %977 : vector<2x128xf32>
    %997 = arith.addf %995, %996 : vector<2x128xf32>
    %998 = arith.mulf %981, %985 : vector<2x128xf32>
    %cst_249 = arith.constant 9.99999974E-5 : f32
    %999 = vector.broadcast %cst_249 : f32 to vector<2x128xf32>
    %1000 = arith.addf %998, %999 : vector<2x128xf32>
    %1001 = tpu.reciprocal %1000 {approx = true} : vector<2x128xf32> -> vector<2x128xf32>
    %1002 = arith.mulf %997, %1001 : vector<2x128xf32>
    %cst_250 = arith.constant -0.999899983 : f32
    %cst_251 = arith.constant 0.999899983 : f32
    %1003 = vector.broadcast %cst_250 : f32 to vector<2x128xf32>
    %1004 = arith.maximumf %1003, %1002 : vector<2x128xf32>
    %1005 = vector.broadcast %cst_251 : f32 to vector<2x128xf32>
    %1006 = arith.minimumf %1005, %1004 : vector<2x128xf32>
    %1007 = math.absf %1006 : vector<2x128xf32>
    %cst_252 = arith.constant -1.872930e-02 : f32
    %1008 = vector.broadcast %cst_252 : f32 to vector<2x128xf32>
    %1009 = arith.mulf %1007, %1008 : vector<2x128xf32>
    %cst_253 = arith.constant 7.426100e-02 : f32
    %1010 = vector.broadcast %cst_253 : f32 to vector<2x128xf32>
    %1011 = arith.addf %1010, %1009 : vector<2x128xf32>
    %1012 = arith.mulf %1007, %1011 : vector<2x128xf32>
    %cst_254 = arith.constant -0.212114394 : f32
    %1013 = vector.broadcast %cst_254 : f32 to vector<2x128xf32>
    %1014 = arith.addf %1013, %1012 : vector<2x128xf32>
    %1015 = arith.mulf %1007, %1014 : vector<2x128xf32>
    %cst_255 = arith.constant 1.57072878 : f32
    %1016 = vector.broadcast %cst_255 : f32 to vector<2x128xf32>
    %1017 = arith.addf %1016, %1015 : vector<2x128xf32>
    %cst_256 = arith.constant 1.000000e+00 : f32
    %1018 = vector.broadcast %cst_256 : f32 to vector<2x128xf32>
    %1019 = arith.subf %1018, %1007 : vector<2x128xf32>
    %cst_257 = arith.constant 0.000000e+00 : f32
    %1020 = vector.broadcast %cst_257 : f32 to vector<2x128xf32>
    %1021 = arith.maximumf %1019, %1020 : vector<2x128xf32>
    %1022 = math.sqrt %1021 : vector<2x128xf32>
    %1023 = arith.mulf %1022, %1017 : vector<2x128xf32>
    %cst_258 = arith.constant 0.000000e+00 : f32
    %1024 = vector.broadcast %cst_258 : f32 to vector<2x128xf32>
    %1025 = arith.cmpf oge, %1006, %1024 : vector<2x128xf32>
    %cst_259 = arith.constant 3.14159274 : f32
    %1026 = vector.broadcast %cst_259 : f32 to vector<2x128xf32>
    %1027 = arith.subf %1026, %1023 : vector<2x128xf32>
    %1028 = arith.select %1025, %1023, %1027 : vector<2x128xi1>, vector<2x128xf32>
    %1029 = arith.mulf %994, %1028 : vector<2x128xf32>
    %1030 = arith.addf %946, %1029 : vector<2x128xf32>
    %c12_i32 = arith.constant 12 : i32
    %c1_i32_260 = arith.constant 1 : i32
    %1031 = arith.addi %c12_i32, %c1_i32_260 : i32
    %c16_i32_261 = arith.constant 16 : i32
    %c0_i32_262 = arith.constant 0 : i32
    %1032 = arith.cmpi eq, %c16_i32_261, %c0_i32_262 : i32
    %c1_i32_263 = arith.constant 1 : i32
    %1033 = arith.select %1032, %c1_i32_263, %c16_i32_261 : i32
    %1034 = arith.remsi %1031, %1033 : i32
    %c0_i32_264 = arith.constant 0 : i32
    %1035 = arith.cmpi ne, %1034, %c0_i32_264 : i32
    %c0_i32_265 = arith.constant 0 : i32
    %1036 = arith.cmpi slt, %1034, %c0_i32_265 : i32
    %c0_i32_266 = arith.constant 0 : i32
    %1037 = arith.cmpi slt, %1033, %c0_i32_266 : i32
    %1038 = arith.xori %1036, %1037 : i1
    %1039 = arith.andi %1038, %1035 : i1
    %1040 = arith.addi %1034, %1033 : i32
    %1041 = arith.select %1039, %1040, %1034 : i32
    %1042 = arith.index_cast %20 : i32 to index
    %1043 = arith.index_cast %c12_i32 : i32 to index
    %1044 = memref.load %arg1[%1042, %1043] : memref<2x16xf32, #tpu.memory_space<smem>>
    %1045 = arith.index_cast %20 : i32 to index
    %1046 = arith.index_cast %c12_i32 : i32 to index
    %1047 = memref.load %arg2[%1045, %1046] : memref<2x16xf32, #tpu.memory_space<smem>>
    %1048 = arith.index_cast %20 : i32 to index
    %1049 = arith.index_cast %1041 : i32 to index
    %1050 = memref.load %arg1[%1048, %1049] : memref<2x16xf32, #tpu.memory_space<smem>>
    %1051 = arith.index_cast %20 : i32 to index
    %1052 = arith.index_cast %1041 : i32 to index
    %1053 = memref.load %arg2[%1051, %1052] : memref<2x16xf32, #tpu.memory_space<smem>>
    %1054 = vector.broadcast %1044 : f32 to vector<2x128xf32>
    %1055 = arith.subf %1054, %16 : vector<2x128xf32>
    %1056 = vector.broadcast %1047 : f32 to vector<2x128xf32>
    %1057 = arith.subf %1056, %18 : vector<2x128xf32>
    %1058 = vector.broadcast %1050 : f32 to vector<2x128xf32>
    %1059 = arith.subf %1058, %16 : vector<2x128xf32>
    %1060 = vector.broadcast %1053 : f32 to vector<2x128xf32>
    %1061 = arith.subf %1060, %18 : vector<2x128xf32>
    %1062 = arith.mulf %1055, %1055 : vector<2x128xf32>
    %1063 = arith.mulf %1057, %1057 : vector<2x128xf32>
    %1064 = arith.addf %1062, %1063 : vector<2x128xf32>
    %1065 = math.sqrt %1064 : vector<2x128xf32>
    %1066 = arith.mulf %1059, %1059 : vector<2x128xf32>
    %1067 = arith.mulf %1061, %1061 : vector<2x128xf32>
    %1068 = arith.addf %1066, %1067 : vector<2x128xf32>
    %1069 = math.sqrt %1068 : vector<2x128xf32>
    %1070 = arith.minimumf %986, %1065 : vector<2x128xf32>
    %1071 = arith.mulf %1055, %1061 : vector<2x128xf32>
    %1072 = arith.mulf %1057, %1059 : vector<2x128xf32>
    %1073 = arith.subf %1071, %1072 : vector<2x128xf32>
    %cst_267 = arith.constant 0.000000e+00 : f32
    %1074 = vector.broadcast %cst_267 : f32 to vector<2x128xf32>
    %1075 = arith.cmpf oge, %1073, %1074 : vector<2x128xf32>
    %cst_268 = arith.constant 1.000000e+00 : f32
    %cst_269 = arith.constant -1.000000e+00 : f32
    %1076 = vector.broadcast %cst_268 : f32 to vector<2x128xf32>
    %1077 = vector.broadcast %cst_269 : f32 to vector<2x128xf32>
    %1078 = arith.select %1075, %1076, %1077 : vector<2x128xi1>, vector<2x128xf32>
    %1079 = arith.mulf %1055, %1059 : vector<2x128xf32>
    %1080 = arith.mulf %1057, %1061 : vector<2x128xf32>
    %1081 = arith.addf %1079, %1080 : vector<2x128xf32>
    %1082 = arith.mulf %1065, %1069 : vector<2x128xf32>
    %cst_270 = arith.constant 9.99999974E-5 : f32
    %1083 = vector.broadcast %cst_270 : f32 to vector<2x128xf32>
    %1084 = arith.addf %1082, %1083 : vector<2x128xf32>
    %1085 = tpu.reciprocal %1084 {approx = true} : vector<2x128xf32> -> vector<2x128xf32>
    %1086 = arith.mulf %1081, %1085 : vector<2x128xf32>
    %cst_271 = arith.constant -0.999899983 : f32
    %cst_272 = arith.constant 0.999899983 : f32
    %1087 = vector.broadcast %cst_271 : f32 to vector<2x128xf32>
    %1088 = arith.maximumf %1087, %1086 : vector<2x128xf32>
    %1089 = vector.broadcast %cst_272 : f32 to vector<2x128xf32>
    %1090 = arith.minimumf %1089, %1088 : vector<2x128xf32>
    %1091 = math.absf %1090 : vector<2x128xf32>
    %cst_273 = arith.constant -1.872930e-02 : f32
    %1092 = vector.broadcast %cst_273 : f32 to vector<2x128xf32>
    %1093 = arith.mulf %1091, %1092 : vector<2x128xf32>
    %cst_274 = arith.constant 7.426100e-02 : f32
    %1094 = vector.broadcast %cst_274 : f32 to vector<2x128xf32>
    %1095 = arith.addf %1094, %1093 : vector<2x128xf32>
    %1096 = arith.mulf %1091, %1095 : vector<2x128xf32>
    %cst_275 = arith.constant -0.212114394 : f32
    %1097 = vector.broadcast %cst_275 : f32 to vector<2x128xf32>
    %1098 = arith.addf %1097, %1096 : vector<2x128xf32>
    %1099 = arith.mulf %1091, %1098 : vector<2x128xf32>
    %cst_276 = arith.constant 1.57072878 : f32
    %1100 = vector.broadcast %cst_276 : f32 to vector<2x128xf32>
    %1101 = arith.addf %1100, %1099 : vector<2x128xf32>
    %cst_277 = arith.constant 1.000000e+00 : f32
    %1102 = vector.broadcast %cst_277 : f32 to vector<2x128xf32>
    %1103 = arith.subf %1102, %1091 : vector<2x128xf32>
    %cst_278 = arith.constant 0.000000e+00 : f32
    %1104 = vector.broadcast %cst_278 : f32 to vector<2x128xf32>
    %1105 = arith.maximumf %1103, %1104 : vector<2x128xf32>
    %1106 = math.sqrt %1105 : vector<2x128xf32>
    %1107 = arith.mulf %1106, %1101 : vector<2x128xf32>
    %cst_279 = arith.constant 0.000000e+00 : f32
    %1108 = vector.broadcast %cst_279 : f32 to vector<2x128xf32>
    %1109 = arith.cmpf oge, %1090, %1108 : vector<2x128xf32>
    %cst_280 = arith.constant 3.14159274 : f32
    %1110 = vector.broadcast %cst_280 : f32 to vector<2x128xf32>
    %1111 = arith.subf %1110, %1107 : vector<2x128xf32>
    %1112 = arith.select %1109, %1107, %1111 : vector<2x128xi1>, vector<2x128xf32>
    %1113 = arith.mulf %1078, %1112 : vector<2x128xf32>
    %1114 = arith.addf %1030, %1113 : vector<2x128xf32>
    %c13_i32 = arith.constant 13 : i32
    %c1_i32_281 = arith.constant 1 : i32
    %1115 = arith.addi %c13_i32, %c1_i32_281 : i32
    %c16_i32_282 = arith.constant 16 : i32
    %c0_i32_283 = arith.constant 0 : i32
    %1116 = arith.cmpi eq, %c16_i32_282, %c0_i32_283 : i32
    %c1_i32_284 = arith.constant 1 : i32
    %1117 = arith.select %1116, %c1_i32_284, %c16_i32_282 : i32
    %1118 = arith.remsi %1115, %1117 : i32
    %c0_i32_285 = arith.constant 0 : i32
    %1119 = arith.cmpi ne, %1118, %c0_i32_285 : i32
    %c0_i32_286 = arith.constant 0 : i32
    %1120 = arith.cmpi slt, %1118, %c0_i32_286 : i32
    %c0_i32_287 = arith.constant 0 : i32
    %1121 = arith.cmpi slt, %1117, %c0_i32_287 : i32
    %1122 = arith.xori %1120, %1121 : i1
    %1123 = arith.andi %1122, %1119 : i1
    %1124 = arith.addi %1118, %1117 : i32
    %1125 = arith.select %1123, %1124, %1118 : i32
    %1126 = arith.index_cast %20 : i32 to index
    %1127 = arith.index_cast %c13_i32 : i32 to index
    %1128 = memref.load %arg1[%1126, %1127] : memref<2x16xf32, #tpu.memory_space<smem>>
    %1129 = arith.index_cast %20 : i32 to index
    %1130 = arith.index_cast %c13_i32 : i32 to index
    %1131 = memref.load %arg2[%1129, %1130] : memref<2x16xf32, #tpu.memory_space<smem>>
    %1132 = arith.index_cast %20 : i32 to index
    %1133 = arith.index_cast %1125 : i32 to index
    %1134 = memref.load %arg1[%1132, %1133] : memref<2x16xf32, #tpu.memory_space<smem>>
    %1135 = arith.index_cast %20 : i32 to index
    %1136 = arith.index_cast %1125 : i32 to index
    %1137 = memref.load %arg2[%1135, %1136] : memref<2x16xf32, #tpu.memory_space<smem>>
    %1138 = vector.broadcast %1128 : f32 to vector<2x128xf32>
    %1139 = arith.subf %1138, %16 : vector<2x128xf32>
    %1140 = vector.broadcast %1131 : f32 to vector<2x128xf32>
    %1141 = arith.subf %1140, %18 : vector<2x128xf32>
    %1142 = vector.broadcast %1134 : f32 to vector<2x128xf32>
    %1143 = arith.subf %1142, %16 : vector<2x128xf32>
    %1144 = vector.broadcast %1137 : f32 to vector<2x128xf32>
    %1145 = arith.subf %1144, %18 : vector<2x128xf32>
    %1146 = arith.mulf %1139, %1139 : vector<2x128xf32>
    %1147 = arith.mulf %1141, %1141 : vector<2x128xf32>
    %1148 = arith.addf %1146, %1147 : vector<2x128xf32>
    %1149 = math.sqrt %1148 : vector<2x128xf32>
    %1150 = arith.mulf %1143, %1143 : vector<2x128xf32>
    %1151 = arith.mulf %1145, %1145 : vector<2x128xf32>
    %1152 = arith.addf %1150, %1151 : vector<2x128xf32>
    %1153 = math.sqrt %1152 : vector<2x128xf32>
    %1154 = arith.minimumf %1070, %1149 : vector<2x128xf32>
    %1155 = arith.mulf %1139, %1145 : vector<2x128xf32>
    %1156 = arith.mulf %1141, %1143 : vector<2x128xf32>
    %1157 = arith.subf %1155, %1156 : vector<2x128xf32>
    %cst_288 = arith.constant 0.000000e+00 : f32
    %1158 = vector.broadcast %cst_288 : f32 to vector<2x128xf32>
    %1159 = arith.cmpf oge, %1157, %1158 : vector<2x128xf32>
    %cst_289 = arith.constant 1.000000e+00 : f32
    %cst_290 = arith.constant -1.000000e+00 : f32
    %1160 = vector.broadcast %cst_289 : f32 to vector<2x128xf32>
    %1161 = vector.broadcast %cst_290 : f32 to vector<2x128xf32>
    %1162 = arith.select %1159, %1160, %1161 : vector<2x128xi1>, vector<2x128xf32>
    %1163 = arith.mulf %1139, %1143 : vector<2x128xf32>
    %1164 = arith.mulf %1141, %1145 : vector<2x128xf32>
    %1165 = arith.addf %1163, %1164 : vector<2x128xf32>
    %1166 = arith.mulf %1149, %1153 : vector<2x128xf32>
    %cst_291 = arith.constant 9.99999974E-5 : f32
    %1167 = vector.broadcast %cst_291 : f32 to vector<2x128xf32>
    %1168 = arith.addf %1166, %1167 : vector<2x128xf32>
    %1169 = tpu.reciprocal %1168 {approx = true} : vector<2x128xf32> -> vector<2x128xf32>
    %1170 = arith.mulf %1165, %1169 : vector<2x128xf32>
    %cst_292 = arith.constant -0.999899983 : f32
    %cst_293 = arith.constant 0.999899983 : f32
    %1171 = vector.broadcast %cst_292 : f32 to vector<2x128xf32>
    %1172 = arith.maximumf %1171, %1170 : vector<2x128xf32>
    %1173 = vector.broadcast %cst_293 : f32 to vector<2x128xf32>
    %1174 = arith.minimumf %1173, %1172 : vector<2x128xf32>
    %1175 = math.absf %1174 : vector<2x128xf32>
    %cst_294 = arith.constant -1.872930e-02 : f32
    %1176 = vector.broadcast %cst_294 : f32 to vector<2x128xf32>
    %1177 = arith.mulf %1175, %1176 : vector<2x128xf32>
    %cst_295 = arith.constant 7.426100e-02 : f32
    %1178 = vector.broadcast %cst_295 : f32 to vector<2x128xf32>
    %1179 = arith.addf %1178, %1177 : vector<2x128xf32>
    %1180 = arith.mulf %1175, %1179 : vector<2x128xf32>
    %cst_296 = arith.constant -0.212114394 : f32
    %1181 = vector.broadcast %cst_296 : f32 to vector<2x128xf32>
    %1182 = arith.addf %1181, %1180 : vector<2x128xf32>
    %1183 = arith.mulf %1175, %1182 : vector<2x128xf32>
    %cst_297 = arith.constant 1.57072878 : f32
    %1184 = vector.broadcast %cst_297 : f32 to vector<2x128xf32>
    %1185 = arith.addf %1184, %1183 : vector<2x128xf32>
    %cst_298 = arith.constant 1.000000e+00 : f32
    %1186 = vector.broadcast %cst_298 : f32 to vector<2x128xf32>
    %1187 = arith.subf %1186, %1175 : vector<2x128xf32>
    %cst_299 = arith.constant 0.000000e+00 : f32
    %1188 = vector.broadcast %cst_299 : f32 to vector<2x128xf32>
    %1189 = arith.maximumf %1187, %1188 : vector<2x128xf32>
    %1190 = math.sqrt %1189 : vector<2x128xf32>
    %1191 = arith.mulf %1190, %1185 : vector<2x128xf32>
    %cst_300 = arith.constant 0.000000e+00 : f32
    %1192 = vector.broadcast %cst_300 : f32 to vector<2x128xf32>
    %1193 = arith.cmpf oge, %1174, %1192 : vector<2x128xf32>
    %cst_301 = arith.constant 3.14159274 : f32
    %1194 = vector.broadcast %cst_301 : f32 to vector<2x128xf32>
    %1195 = arith.subf %1194, %1191 : vector<2x128xf32>
    %1196 = arith.select %1193, %1191, %1195 : vector<2x128xi1>, vector<2x128xf32>
    %1197 = arith.mulf %1162, %1196 : vector<2x128xf32>
    %1198 = arith.addf %1114, %1197 : vector<2x128xf32>
    %c14_i32 = arith.constant 14 : i32
    %c1_i32_302 = arith.constant 1 : i32
    %1199 = arith.addi %c14_i32, %c1_i32_302 : i32
    %c16_i32_303 = arith.constant 16 : i32
    %c0_i32_304 = arith.constant 0 : i32
    %1200 = arith.cmpi eq, %c16_i32_303, %c0_i32_304 : i32
    %c1_i32_305 = arith.constant 1 : i32
    %1201 = arith.select %1200, %c1_i32_305, %c16_i32_303 : i32
    %1202 = arith.remsi %1199, %1201 : i32
    %c0_i32_306 = arith.constant 0 : i32
    %1203 = arith.cmpi ne, %1202, %c0_i32_306 : i32
    %c0_i32_307 = arith.constant 0 : i32
    %1204 = arith.cmpi slt, %1202, %c0_i32_307 : i32
    %c0_i32_308 = arith.constant 0 : i32
    %1205 = arith.cmpi slt, %1201, %c0_i32_308 : i32
    %1206 = arith.xori %1204, %1205 : i1
    %1207 = arith.andi %1206, %1203 : i1
    %1208 = arith.addi %1202, %1201 : i32
    %1209 = arith.select %1207, %1208, %1202 : i32
    %1210 = arith.index_cast %20 : i32 to index
    %1211 = arith.index_cast %c14_i32 : i32 to index
    %1212 = memref.load %arg1[%1210, %1211] : memref<2x16xf32, #tpu.memory_space<smem>>
    %1213 = arith.index_cast %20 : i32 to index
    %1214 = arith.index_cast %c14_i32 : i32 to index
    %1215 = memref.load %arg2[%1213, %1214] : memref<2x16xf32, #tpu.memory_space<smem>>
    %1216 = arith.index_cast %20 : i32 to index
    %1217 = arith.index_cast %1209 : i32 to index
    %1218 = memref.load %arg1[%1216, %1217] : memref<2x16xf32, #tpu.memory_space<smem>>
    %1219 = arith.index_cast %20 : i32 to index
    %1220 = arith.index_cast %1209 : i32 to index
    %1221 = memref.load %arg2[%1219, %1220] : memref<2x16xf32, #tpu.memory_space<smem>>
    %1222 = vector.broadcast %1212 : f32 to vector<2x128xf32>
    %1223 = arith.subf %1222, %16 : vector<2x128xf32>
    %1224 = vector.broadcast %1215 : f32 to vector<2x128xf32>
    %1225 = arith.subf %1224, %18 : vector<2x128xf32>
    %1226 = vector.broadcast %1218 : f32 to vector<2x128xf32>
    %1227 = arith.subf %1226, %16 : vector<2x128xf32>
    %1228 = vector.broadcast %1221 : f32 to vector<2x128xf32>
    %1229 = arith.subf %1228, %18 : vector<2x128xf32>
    %1230 = arith.mulf %1223, %1223 : vector<2x128xf32>
    %1231 = arith.mulf %1225, %1225 : vector<2x128xf32>
    %1232 = arith.addf %1230, %1231 : vector<2x128xf32>
    %1233 = math.sqrt %1232 : vector<2x128xf32>
    %1234 = arith.mulf %1227, %1227 : vector<2x128xf32>
    %1235 = arith.mulf %1229, %1229 : vector<2x128xf32>
    %1236 = arith.addf %1234, %1235 : vector<2x128xf32>
    %1237 = math.sqrt %1236 : vector<2x128xf32>
    %1238 = arith.minimumf %1154, %1233 : vector<2x128xf32>
    %1239 = arith.mulf %1223, %1229 : vector<2x128xf32>
    %1240 = arith.mulf %1225, %1227 : vector<2x128xf32>
    %1241 = arith.subf %1239, %1240 : vector<2x128xf32>
    %cst_309 = arith.constant 0.000000e+00 : f32
    %1242 = vector.broadcast %cst_309 : f32 to vector<2x128xf32>
    %1243 = arith.cmpf oge, %1241, %1242 : vector<2x128xf32>
    %cst_310 = arith.constant 1.000000e+00 : f32
    %cst_311 = arith.constant -1.000000e+00 : f32
    %1244 = vector.broadcast %cst_310 : f32 to vector<2x128xf32>
    %1245 = vector.broadcast %cst_311 : f32 to vector<2x128xf32>
    %1246 = arith.select %1243, %1244, %1245 : vector<2x128xi1>, vector<2x128xf32>
    %1247 = arith.mulf %1223, %1227 : vector<2x128xf32>
    %1248 = arith.mulf %1225, %1229 : vector<2x128xf32>
    %1249 = arith.addf %1247, %1248 : vector<2x128xf32>
    %1250 = arith.mulf %1233, %1237 : vector<2x128xf32>
    %cst_312 = arith.constant 9.99999974E-5 : f32
    %1251 = vector.broadcast %cst_312 : f32 to vector<2x128xf32>
    %1252 = arith.addf %1250, %1251 : vector<2x128xf32>
    %1253 = tpu.reciprocal %1252 {approx = true} : vector<2x128xf32> -> vector<2x128xf32>
    %1254 = arith.mulf %1249, %1253 : vector<2x128xf32>
    %cst_313 = arith.constant -0.999899983 : f32
    %cst_314 = arith.constant 0.999899983 : f32
    %1255 = vector.broadcast %cst_313 : f32 to vector<2x128xf32>
    %1256 = arith.maximumf %1255, %1254 : vector<2x128xf32>
    %1257 = vector.broadcast %cst_314 : f32 to vector<2x128xf32>
    %1258 = arith.minimumf %1257, %1256 : vector<2x128xf32>
    %1259 = math.absf %1258 : vector<2x128xf32>
    %cst_315 = arith.constant -1.872930e-02 : f32
    %1260 = vector.broadcast %cst_315 : f32 to vector<2x128xf32>
    %1261 = arith.mulf %1259, %1260 : vector<2x128xf32>
    %cst_316 = arith.constant 7.426100e-02 : f32
    %1262 = vector.broadcast %cst_316 : f32 to vector<2x128xf32>
    %1263 = arith.addf %1262, %1261 : vector<2x128xf32>
    %1264 = arith.mulf %1259, %1263 : vector<2x128xf32>
    %cst_317 = arith.constant -0.212114394 : f32
    %1265 = vector.broadcast %cst_317 : f32 to vector<2x128xf32>
    %1266 = arith.addf %1265, %1264 : vector<2x128xf32>
    %1267 = arith.mulf %1259, %1266 : vector<2x128xf32>
    %cst_318 = arith.constant 1.57072878 : f32
    %1268 = vector.broadcast %cst_318 : f32 to vector<2x128xf32>
    %1269 = arith.addf %1268, %1267 : vector<2x128xf32>
    %cst_319 = arith.constant 1.000000e+00 : f32
    %1270 = vector.broadcast %cst_319 : f32 to vector<2x128xf32>
    %1271 = arith.subf %1270, %1259 : vector<2x128xf32>
    %cst_320 = arith.constant 0.000000e+00 : f32
    %1272 = vector.broadcast %cst_320 : f32 to vector<2x128xf32>
    %1273 = arith.maximumf %1271, %1272 : vector<2x128xf32>
    %1274 = math.sqrt %1273 : vector<2x128xf32>
    %1275 = arith.mulf %1274, %1269 : vector<2x128xf32>
    %cst_321 = arith.constant 0.000000e+00 : f32
    %1276 = vector.broadcast %cst_321 : f32 to vector<2x128xf32>
    %1277 = arith.cmpf oge, %1258, %1276 : vector<2x128xf32>
    %cst_322 = arith.constant 3.14159274 : f32
    %1278 = vector.broadcast %cst_322 : f32 to vector<2x128xf32>
    %1279 = arith.subf %1278, %1275 : vector<2x128xf32>
    %1280 = arith.select %1277, %1275, %1279 : vector<2x128xi1>, vector<2x128xf32>
    %1281 = arith.mulf %1246, %1280 : vector<2x128xf32>
    %1282 = arith.addf %1198, %1281 : vector<2x128xf32>
    %c15_i32 = arith.constant 15 : i32
    %c1_i32_323 = arith.constant 1 : i32
    %1283 = arith.addi %c15_i32, %c1_i32_323 : i32
    %c16_i32_324 = arith.constant 16 : i32
    %c0_i32_325 = arith.constant 0 : i32
    %1284 = arith.cmpi eq, %c16_i32_324, %c0_i32_325 : i32
    %c1_i32_326 = arith.constant 1 : i32
    %1285 = arith.select %1284, %c1_i32_326, %c16_i32_324 : i32
    %1286 = arith.remsi %1283, %1285 : i32
    %c0_i32_327 = arith.constant 0 : i32
    %1287 = arith.cmpi ne, %1286, %c0_i32_327 : i32
    %c0_i32_328 = arith.constant 0 : i32
    %1288 = arith.cmpi slt, %1286, %c0_i32_328 : i32
    %c0_i32_329 = arith.constant 0 : i32
    %1289 = arith.cmpi slt, %1285, %c0_i32_329 : i32
    %1290 = arith.xori %1288, %1289 : i1
    %1291 = arith.andi %1290, %1287 : i1
    %1292 = arith.addi %1286, %1285 : i32
    %1293 = arith.select %1291, %1292, %1286 : i32
    %1294 = arith.index_cast %20 : i32 to index
    %1295 = arith.index_cast %c15_i32 : i32 to index
    %1296 = memref.load %arg1[%1294, %1295] : memref<2x16xf32, #tpu.memory_space<smem>>
    %1297 = arith.index_cast %20 : i32 to index
    %1298 = arith.index_cast %c15_i32 : i32 to index
    %1299 = memref.load %arg2[%1297, %1298] : memref<2x16xf32, #tpu.memory_space<smem>>
    %1300 = arith.index_cast %20 : i32 to index
    %1301 = arith.index_cast %1293 : i32 to index
    %1302 = memref.load %arg1[%1300, %1301] : memref<2x16xf32, #tpu.memory_space<smem>>
    %1303 = arith.index_cast %20 : i32 to index
    %1304 = arith.index_cast %1293 : i32 to index
    %1305 = memref.load %arg2[%1303, %1304] : memref<2x16xf32, #tpu.memory_space<smem>>
    %1306 = vector.broadcast %1296 : f32 to vector<2x128xf32>
    %1307 = arith.subf %1306, %16 : vector<2x128xf32>
    %1308 = vector.broadcast %1299 : f32 to vector<2x128xf32>
    %1309 = arith.subf %1308, %18 : vector<2x128xf32>
    %1310 = vector.broadcast %1302 : f32 to vector<2x128xf32>
    %1311 = arith.subf %1310, %16 : vector<2x128xf32>
    %1312 = vector.broadcast %1305 : f32 to vector<2x128xf32>
    %1313 = arith.subf %1312, %18 : vector<2x128xf32>
    %1314 = arith.mulf %1307, %1307 : vector<2x128xf32>
    %1315 = arith.mulf %1309, %1309 : vector<2x128xf32>
    %1316 = arith.addf %1314, %1315 : vector<2x128xf32>
    %1317 = math.sqrt %1316 : vector<2x128xf32>
    %1318 = arith.mulf %1311, %1311 : vector<2x128xf32>
    %1319 = arith.mulf %1313, %1313 : vector<2x128xf32>
    %1320 = arith.addf %1318, %1319 : vector<2x128xf32>
    %1321 = math.sqrt %1320 : vector<2x128xf32>
    %1322 = arith.minimumf %1238, %1317 : vector<2x128xf32>
    %1323 = arith.mulf %1307, %1313 : vector<2x128xf32>
    %1324 = arith.mulf %1309, %1311 : vector<2x128xf32>
    %1325 = arith.subf %1323, %1324 : vector<2x128xf32>
    %cst_330 = arith.constant 0.000000e+00 : f32
    %1326 = vector.broadcast %cst_330 : f32 to vector<2x128xf32>
    %1327 = arith.cmpf oge, %1325, %1326 : vector<2x128xf32>
    %cst_331 = arith.constant 1.000000e+00 : f32
    %cst_332 = arith.constant -1.000000e+00 : f32
    %1328 = vector.broadcast %cst_331 : f32 to vector<2x128xf32>
    %1329 = vector.broadcast %cst_332 : f32 to vector<2x128xf32>
    %1330 = arith.select %1327, %1328, %1329 : vector<2x128xi1>, vector<2x128xf32>
    %1331 = arith.mulf %1307, %1311 : vector<2x128xf32>
    %1332 = arith.mulf %1309, %1313 : vector<2x128xf32>
    %1333 = arith.addf %1331, %1332 : vector<2x128xf32>
    %1334 = arith.mulf %1317, %1321 : vector<2x128xf32>
    %cst_333 = arith.constant 9.99999974E-5 : f32
    %1335 = vector.broadcast %cst_333 : f32 to vector<2x128xf32>
    %1336 = arith.addf %1334, %1335 : vector<2x128xf32>
    %1337 = tpu.reciprocal %1336 {approx = true} : vector<2x128xf32> -> vector<2x128xf32>
    %1338 = arith.mulf %1333, %1337 : vector<2x128xf32>
    %cst_334 = arith.constant -0.999899983 : f32
    %cst_335 = arith.constant 0.999899983 : f32
    %1339 = vector.broadcast %cst_334 : f32 to vector<2x128xf32>
    %1340 = arith.maximumf %1339, %1338 : vector<2x128xf32>
    %1341 = vector.broadcast %cst_335 : f32 to vector<2x128xf32>
    %1342 = arith.minimumf %1341, %1340 : vector<2x128xf32>
    %1343 = math.absf %1342 : vector<2x128xf32>
    %cst_336 = arith.constant -1.872930e-02 : f32
    %1344 = vector.broadcast %cst_336 : f32 to vector<2x128xf32>
    %1345 = arith.mulf %1343, %1344 : vector<2x128xf32>
    %cst_337 = arith.constant 7.426100e-02 : f32
    %1346 = vector.broadcast %cst_337 : f32 to vector<2x128xf32>
    %1347 = arith.addf %1346, %1345 : vector<2x128xf32>
    %1348 = arith.mulf %1343, %1347 : vector<2x128xf32>
    %cst_338 = arith.constant -0.212114394 : f32
    %1349 = vector.broadcast %cst_338 : f32 to vector<2x128xf32>
    %1350 = arith.addf %1349, %1348 : vector<2x128xf32>
    %1351 = arith.mulf %1343, %1350 : vector<2x128xf32>
    %cst_339 = arith.constant 1.57072878 : f32
    %1352 = vector.broadcast %cst_339 : f32 to vector<2x128xf32>
    %1353 = arith.addf %1352, %1351 : vector<2x128xf32>
    %cst_340 = arith.constant 1.000000e+00 : f32
    %1354 = vector.broadcast %cst_340 : f32 to vector<2x128xf32>
    %1355 = arith.subf %1354, %1343 : vector<2x128xf32>
    %cst_341 = arith.constant 0.000000e+00 : f32
    %1356 = vector.broadcast %cst_341 : f32 to vector<2x128xf32>
    %1357 = arith.maximumf %1355, %1356 : vector<2x128xf32>
    %1358 = math.sqrt %1357 : vector<2x128xf32>
    %1359 = arith.mulf %1358, %1353 : vector<2x128xf32>
    %cst_342 = arith.constant 0.000000e+00 : f32
    %1360 = vector.broadcast %cst_342 : f32 to vector<2x128xf32>
    %1361 = arith.cmpf oge, %1342, %1360 : vector<2x128xf32>
    %cst_343 = arith.constant 3.14159274 : f32
    %1362 = vector.broadcast %cst_343 : f32 to vector<2x128xf32>
    %1363 = arith.subf %1362, %1359 : vector<2x128xf32>
    %1364 = arith.select %1361, %1359, %1363 : vector<2x128xi1>, vector<2x128xf32>
    %1365 = arith.mulf %1330, %1364 : vector<2x128xf32>
    %1366 = arith.addf %1282, %1365 : vector<2x128xf32>
    %c16_i32_344 = arith.constant 16 : i32
    %1367 = math.absf %1366 : vector<2x128xf32>
    %cst_345 = arith.constant 0.159154937 : f32
    %1368 = vector.broadcast %cst_345 : f32 to vector<2x128xf32>
    %1369 = arith.mulf %1367, %1368 : vector<2x128xf32>
    %cst_346 = arith.constant 0.000000e+00 : f32
    %cst_347 = arith.constant 1.000000e+00 : f32
    %1370 = vector.broadcast %cst_346 : f32 to vector<2x128xf32>
    %1371 = arith.maximumf %1370, %1369 : vector<2x128xf32>
    %1372 = vector.broadcast %cst_347 : f32 to vector<2x128xf32>
    %1373 = arith.minimumf %1372, %1371 : vector<2x128xf32>
    %1374 = arith.mulf %1322, %1373 : vector<2x128xf32>
    %1375 = vector.shape_cast %1374 : vector<2x128xf32> to vector<1x2x128xf32>
    %cst_348 = arith.constant dense<0xFF800000> : vector<1xf32>
    %1376 = vector.multi_reduction <maximumf>, %1375, %cst_348 [1, 2] : vector<1x2x128xf32> to vector<1xf32>
    %1377 = vector.shape_cast %1376 : vector<1xf32> to vector<1x1x1xf32>
    %1378 = vector.extract %1377[0, 0, 0] : f32 from vector<1x1x1xf32>
    %1379 = vector.broadcast %1378 : f32 to vector<1x1xf32>
    %cst_349 = arith.constant 9.99999974E-5 : f32
    %1380 = vector.broadcast %cst_349 : f32 to vector<1x1xf32>
    %1381 = arith.addf %1379, %1380 : vector<1x1xf32>
    %1382 = tpu.reciprocal %1381 {approx = true} : vector<1x1xf32> -> vector<1x1xf32>
    %1383 = vector.broadcast %1382 : vector<1x1xf32> to vector<2x128xf32>
    %1384 = arith.mulf %1374, %1383 : vector<2x128xf32>
    %cst_350 = arith.constant 0.000000e+00 : f32
    %1385 = vector.broadcast %cst_350 : f32 to vector<2x128xf32>
    %1386 = arith.subf %1384, %1385 : vector<2x128xf32>
    %1387 = arith.mulf %1386, %1386 : vector<2x128xf32>
    %cst_351 = arith.constant -22.1807098 : f32
    %1388 = vector.broadcast %cst_351 : f32 to vector<2x128xf32>
    %1389 = arith.mulf %1387, %1388 : vector<2x128xf32>
    %1390 = math.exp %1389 : vector<2x128xf32>
    %1391 = arith.mulf %1373, %1390 : vector<2x128xf32>
    %c0 = arith.constant 0 : index
    %c0_352 = arith.constant 0 : index
    %c0_353 = arith.constant 0 : index
    %c0_354 = arith.constant 0 : index
    %1392 = vector.load %arg3[%c0, %c0_352, %c0_353, %c0_354] : memref<1x3x2x128xf32, #tpu.memory_space<vmem>>, vector<1x1x2x128xf32>
    %1393 = vector.shape_cast %1392 : vector<1x1x2x128xf32> to vector<2x128xf32>
    %1394 = vector.shape_cast %1391 : vector<2x128xf32> to vector<1x1x2x128xf32>
    tpu.vector_store %arg3[%c0, %c0_352, %c0_353, %c0_354], %1394 {strides = array<i32>} : memref<1x3x2x128xf32, #tpu.memory_space<vmem>>, vector<1x1x2x128xf32>,
    %cst_355 = arith.constant 5.000000e-01 : f32
    %1395 = vector.broadcast %cst_355 : f32 to vector<2x128xf32>
    %1396 = arith.subf %1384, %1395 : vector<2x128xf32>
    %1397 = arith.mulf %1396, %1396 : vector<2x128xf32>
    %cst_356 = arith.constant -22.1807098 : f32
    %1398 = vector.broadcast %cst_356 : f32 to vector<2x128xf32>
    %1399 = arith.mulf %1397, %1398 : vector<2x128xf32>
    %1400 = math.exp %1399 : vector<2x128xf32>
    %1401 = arith.mulf %1373, %1400 : vector<2x128xf32>
    %c0_357 = arith.constant 0 : index
    %c1 = arith.constant 1 : index
    %c0_358 = arith.constant 0 : index
    %c0_359 = arith.constant 0 : index
    %1402 = vector.load %arg3[%c0_357, %c1, %c0_358, %c0_359] : memref<1x3x2x128xf32, #tpu.memory_space<vmem>>, vector<1x1x2x128xf32>
    %1403 = vector.shape_cast %1402 : vector<1x1x2x128xf32> to vector<2x128xf32>
    %1404 = vector.shape_cast %1401 : vector<2x128xf32> to vector<1x1x2x128xf32>
    tpu.vector_store %arg3[%c0_357, %c1, %c0_358, %c0_359], %1404 {strides = array<i32>} : memref<1x3x2x128xf32, #tpu.memory_space<vmem>>, vector<1x1x2x128xf32>,
    %cst_360 = arith.constant 1.000000e+00 : f32
    %1405 = vector.broadcast %cst_360 : f32 to vector<2x128xf32>
    %1406 = arith.subf %1384, %1405 : vector<2x128xf32>
    %1407 = arith.mulf %1406, %1406 : vector<2x128xf32>
    %cst_361 = arith.constant -22.1807098 : f32
    %1408 = vector.broadcast %cst_361 : f32 to vector<2x128xf32>
    %1409 = arith.mulf %1407, %1408 : vector<2x128xf32>
    %1410 = math.exp %1409 : vector<2x128xf32>
    %1411 = arith.mulf %1373, %1410 : vector<2x128xf32>
    %c0_362 = arith.constant 0 : index
    %c2 = arith.constant 2 : index
    %c0_363 = arith.constant 0 : index
    %c0_364 = arith.constant 0 : index
    %1412 = vector.load %arg3[%c0_362, %c2, %c0_363, %c0_364] : memref<1x3x2x128xf32, #tpu.memory_space<vmem>>, vector<1x1x2x128xf32>
    %1413 = vector.shape_cast %1412 : vector<1x1x2x128xf32> to vector<2x128xf32>
    %1414 = vector.shape_cast %1411 : vector<2x128xf32> to vector<1x1x2x128xf32>
    tpu.vector_store %arg3[%c0_362, %c2, %c0_363, %c0_364], %1414 {strides = array<i32>} : memref<1x3x2x128xf32, #tpu.memory_space<vmem>>, vector<1x1x2x128xf32>,
    %c0_365 = arith.constant 0 : index
    %c0_366 = arith.constant 0 : index
    %c0_367 = arith.constant 0 : index
    %c0_368 = arith.constant 0 : index
    %1415 = vector.load %arg4[%c0_365, %c0_366, %c0_367, %c0_368] : memref<1x1x2x128xf32, #tpu.memory_space<vmem>>, vector<1x1x2x128xf32>
    %1416 = vector.shape_cast %1415 : vector<1x1x2x128xf32> to vector<2x128xf32>
    %1417 = vector.shape_cast %1373 : vector<2x128xf32> to vector<1x1x2x128xf32>
    tpu.vector_store %arg4[%c0_365, %c0_366, %c0_367, %c0_368], %1417 {strides = array<i32>} : memref<1x1x2x128xf32, #tpu.memory_space<vmem>>, vector<1x1x2x128xf32>,
    return
  }
  func.func @transform_0(%arg0: i32) -> (i32, i32) {
    %c0_i32 = arith.constant 0 : i32
    %c0_i32_0 = arith.constant 0 : i32
    %c0_i32_1 = arith.constant 0 : i32
    return %c0_i32, %c0_i32_0 : i32, i32
  }
  func.func @transform_1(%arg0: i32) -> (i32, i32) {
    %c0_i32 = arith.constant 0 : i32
    %c0_i32_0 = arith.constant 0 : i32
    %c0_i32_1 = arith.constant 0 : i32
    return %c0_i32, %c0_i32_0 : i32, i32
  }
  func.func @transform_2(%arg0: i32) -> (i32, i32, i32, i32) {
    %c0_i32 = arith.constant 0 : i32
    %c0_i32_0 = arith.constant 0 : i32
    %c0_i32_1 = arith.constant 0 : i32
    %c0_i32_2 = arith.constant 0 : i32
    return %arg0, %c0_i32, %c0_i32_0, %c0_i32_1 : i32, i32, i32, i32
  }
  func.func @transform_3(%arg0: i32) -> (i32, i32, i32, i32) {
    %c0_i32 = arith.constant 0 : i32
    %c0_i32_0 = arith.constant 0 : i32
    %c0_i32_1 = arith.constant 0 : i32
    %c0_i32_2 = arith.constant 0 : i32
    return %arg0, %c0_i32, %c0_i32_0, %c0_i32_1 : i32, i32, i32, i32
  }
}

</mosaic_0001>

<bundles_post_ra>
// kernel: tpu_custom_call.1
= control target key start
LH: loop header
LB: loop body
LE: loop exit
PB: predicated region body
PF: predicated region fallthrough
CT: control target
= control target key end

     0   :  { %9 = vsyncpa [#allocation4], 0  ;;  %s3230_s0 = inlined_call_operand.hbm [shape: f32[2,16], index: 0, kind: input, shape index: {}]   ;;  %s3231_s1 = inlined_call_operand.hbm [shape: f32[2,16], index: 1, kind: input, shape index: {}]   ;;  %s3232_s2 = inlined_call_operand.hbm [shape: f32[2,3,2,128], index: 2, kind: output, shape index: {0}]   ;;  %s3233_s3 = inlined_call_operand.hbm [shape: f32[2,1,2,128], index: 3, kind: output, shape index: {1}]  }
   0x1   :  { %10 = vsyncpa [#allocation6], 0 }
   0x2   :  { %11 = vsyncpa [#allocation3], 0 }
   0x3   :  { %13 = vsyncpa [#allocation3 + $0x1], 0 }
   0x4   :  { %14 = vsyncpa [#allocation9], 0 }
   0x5   :  { %16 = vsyncpa [#allocation9 + $0x1], 0  ;;  %s1777_s12 = smov 0   ;;  %s1779_s13 = smov 0  }
   0x6   :  { %s1781_s14 = smov 0   ;;  %s1783_s15 = smov 0  }
   0x7 LB: > { %s1798_s16 = sadd.s32 4294967295, %s1750_s15   ;;  %s1408_s17 = sadd.s32 4294967294, %s1750_s15   ;;  %s1750_s15 = sphi %s1783_s15, %s3296_s15   ;;  %s1746_s14 = sphi %s1781_s14, %s3295_s14   ;;  %s1742_s13 = sphi %s1779_s13, %s3294_s13   ;;  %s1738_s12 = sphi %s1777_s12, %s3293_s12  }
   0x8   : > { %s1802_s18 = sadd.s32 1, %s1750_s15   ;;  %s71_s19 = sadd.s32 1, %s1746_s14 }
   0x9   : > { %s68_s20 = ssub.s32 %s1750_s15, %s1802_s18  ;;  %p81_p0 = scmp.ne.s32.totalorder %s1746_s14, %s1742_s13 }
   0xa   : > { %p69_p1 = scmp.eq.s32.totalorder %s68_s20, 0  ;;  %p82_p2 = scmp.eq.s32.totalorder %s1798_s16, 1 }
   0xb   : > { %p87_p3 = scmp.ne.s32.totalorder %s1742_s13, %s1738_s12  ;;  %p88_p4 = scmp.eq.s32.totalorder %s1408_s17, 1 }
   0xc   : > { %s1813_s21 = scalar_select %p69_p1, %s1746_s14, %s71_s19  }
   0xd   : > { %p1815_p5 = por %p82_p2, %p81_p0  ;;  %p1819_p6 = por %p88_p4, %p87_p3 }
   0xe   : > { %p1409_p7 = scmp.ge.s32.totalorder %s1750_s15, 1  ;;  %p121_p8 = scmp.lt.s32.totalorder %s1750_s15, 3 }
   0xf   : > { %p1472_p9 = scmp.eq.s32.totalorder %s1798_s16, 0  ;;  %s133_s26 = sshll.u32 %s3230_s0, 4  ;;  %s134_s26 = int_to_ptr.hbm [resolvable:$true] %s133_s26 }
  0x10   : > { %p122_p10 = pnand %p1409_p7, %p121_p8  ;;  %s143_s29 = sshll.u32 %s3231_s1, 4  ;;  %s144_s29 = int_to_ptr.hbm [resolvable:$true] %s143_s29 }
  0x11   : > { %s1752_s30 = smov [#allocation2]   ;;  %s1753_s4 = smov [#allocation5]  }
  0x12   : > { %p1458_p11 = pneg %p122_p10 }
  0x13   : > { %156 = sbr.rel (%p122_p10) target bundleno = 532 (0x214), region = 28 }
  0x14   : > { %p1459_p12 = pnand %p1472_p9, %p1458_p11 }
  0x16   : > { %1461 = dma.hbm_to_smem (!%p1459_p12), %s134_s26, 32, %s1752_s30, [#allocation4]  }
  0x17   : > { %1464 = dma.hbm_to_smem (!%p1459_p12), %s144_s29, 32, %s1753_s4, [#allocation6]  }
  0x18   : > { %1721 = dma.done.wait (%p1472_p9), [#allocation4], 32  }
  0x19   : > { %1723 = vsyncadd (%p1472_p9), [#allocation4], 4294967264 }
  0x1a   : > { %1725 = dma.done.wait (%p1472_p9), [#allocation6], 32  }
  0x1b   : > { %1727 = vsyncadd (%p1472_p9), [#allocation6], 4294967264 }
  0x1c   : > { %168 = sfence }
  0x1d   : > { %v187_v0 = vlaneseq  ;;  %s1843_s5 = sshll.u32 %s1798_s16, 7 }
  0x1e   : > { %s1846_s6 = sld [smem:[#allocation2 + %s1843_s5]]  ;;  %s205_s7 = sadd.s32 1, %s1843_s5 }
  0x1f   : > { %v188_v1 = vshrl.u32 %v187_v0, 7  ;;  %v191_v2 = vand.u32 127, %v187_v0  ;;  %s204_s8 = sld [smem:[#allocation5 + %s1843_s5]]  ;;  %s287_s9 = sadd.s32 2, %s1843_s5 }
  0x20   : > { %s1851_s10 = sld [smem:[#allocation2 + %s205_s7]]  ;;  %s351_s17 = sadd.s32 3, %s1843_s5 }
  0x21   : > { %v189_v3 = vcvt.s32.f32 %v188_v1  ;;  %v192_v4 = vcvt.s32.f32 %v191_v2  ;;  %s207_s11 = sld [smem:[#allocation5 + %s205_s7]]  ;;  %s415_s24 = sadd.s32 4, %s1843_s5 }
  0x22   : > { %s289_s19 = sld [smem:[#allocation5 + %s287_s9]]  ;;  %s479_s29 = sadd.s32 5, %s1843_s5 }
  0x23   : > { %v193_v5 = vmul.f32 128.0, %v189_v3  ;;  %s1854_s20 = sld [smem:[#allocation2 + %s287_s9]]  ;;  %s607_s9 = sadd.s32 7, %s1843_s5 }
  0x24   : > { %s353_s25 = sld [smem:[#allocation5 + %s351_s17]]  ;;  %v208_v16 = vstv %s1846_s6  ;;  %s543_s6 = sadd.s32 6, %s1843_s5 }
  0x25   : > { %v194_v6 = vadd.f32 %v193_v5, %v192_v4  ;;  %s1857_s26 = sld [smem:[#allocation2 + %s351_s17]]  ;;  %v210_v10 = vstv %s204_s8  ;;  %s671_s17 = sadd.s32 8, %s1843_s5 }
  0x26   : > { %s1859_s27 = sld [smem:[#allocation2 + %s415_s24]]  ;;  %v212_v19 = vstv %s1851_s10 }
  0x27   : > { %v195_v7 = vadd.f32 0.5, %v194_v6  ;;  %s1861_s28 = sld [smem:[#allocation5 + %s415_s24]]  ;;  %v214_v11 = vstv %s207_s11  ;;  %s735_s24 = sadd.s32 9, %s1843_s5 }
  0x28   : > { %v292_v14 = vstv %s289_s19  ;;  %s1874_s30 = sld [smem:[#allocation2 + %s479_s29]] }
  0x29   : > { %v196_v8 = vmul.f32 0.0625, %v195_v7  ;;  %v290_v21 = vstv %s1854_s20  ;;  %s1884_s4 = sld [smem:[#allocation5 + %s479_s29]] }
  0x2a   : > { %v356_v15 = vstv %s353_s25  ;;  %s1939_s7 = sld [smem:[#allocation2 + %s543_s6]] }
  0x2b   : > { %v197_v9 = vfloor.f32 %v196_v8  ;;  %v354_v23 = vstv %s1857_s26  ;;  %s1947_s8 = sld [smem:[#allocation5 + %s543_s6]] }
  0x2c   : > { %v418_v28 = vstv %s1859_s27  ;;  %s2029_s10 = sld [smem:[#allocation2 + %s607_s9]]  ;;  %s799_s27 = sadd.s32 10, %s1843_s5 }
  0x2d   : > { %v198_v12 = vmul.f32 16.0, %v197_v9  ;;  %v1864_v13 = vmul.f32 0.06666667, %v197_v9  ;;  %v420_v29 = vstv %s1861_s28  ;;  %s2039_s11 = sld [smem:[#allocation5 + %s607_s9]] }
  0x2e   : > { %v482_v49 = vstv %s1874_s30  ;;  %s2112_s19 = sld [smem:[#allocation2 + %s671_s17]]  ;;  %s863_s30 = sadd.s32 11, %s1843_s5 }
  0x2f   : > { %v199_v17 = vsub.f32 %v194_v6, %v198_v12  ;;  %v1868_v18 = vsub.f32 %v210_v10, %v1864_v13  ;;  %v1872_v20 = vsub.f32 %v214_v11, %v1864_v13  ;;  %v1878_v22 = vsub.f32 %v292_v14, %v1864_v13  ;;  %s2159_s20 = sld [smem:[#allocation5 + %s671_s17]] }
  0x30   : > { %v1882_v24 = vsub.f32 %v356_v15, %v1864_v13  ;;  %v1931_v43 = vsub.f32 %v420_v29, %v1864_v13  ;;  %v484_v50 = vstv %s1884_s4  ;;  %v546_v59 = vstv %s1939_s7  ;;  %s2377_s25 = sld [smem:[#allocation2 + %s735_s24]]  ;;  %s927_s7 = sadd.s32 12, %s1843_s5 }
  0x31   : > { %3248 = vst [vmem:[#allocation14_spill] sm:$0xff] %v1868_v18  ;;  %v1886_v25 = vmul.f32 0.06666667, %v199_v17  ;;  %v217_v26 = vmul.f32 %v1868_v18, %v1868_v18  ;;  %v232_v27 = vmul.f32 %v1872_v20, %v1872_v20  ;;  %v295_v34 = vmul.f32 %v1878_v22, %v1878_v22  ;;  %s2381_s26 = sld [smem:[#allocation5 + %s735_s24]] }
  0x32   : > { %v359_v35 = vmul.f32 %v1882_v24, %v1882_v24  ;;  %v423_v52 = vmul.f32 %v1931_v43, %v1931_v43  ;;  %v1960_v54 = vsub.f32 %v484_v50, %v1864_v13  ;;  %v548_v62 = vstv %s1947_s8  ;;  %s2418_s28 = sld [smem:[#allocation2 + %s799_s27]] }
  0x33   : > { %v1895_v30 = vsub.f32 %v208_v16, %v1886_v25  ;;  %v1898_v31 = vsub.f32 %v212_v19, %v1886_v25  ;;  %v1901_v32 = vsub.f32 %v290_v21, %v1886_v25  ;;  %v1904_v33 = vsub.f32 %v354_v23, %v1886_v25  ;;  %s2426_s29 = sld [smem:[#allocation5 + %s799_s27]]  ;;  %s3171_s27 = sand.u32 1, %s1742_s13  }
  0x34   : > { %v1928_v42 = vsub.f32 %v418_v28, %v1886_v25  ;;  %v1957_v53 = vsub.f32 %v482_v49, %v1886_v25  ;;  %v487_v58 = vmul.f32 %v1960_v54, %v1960_v54  ;;  %v1981_v2 = vmul.f32 %v1872_v20, %v1868_v18  ;;  %s2480_s4 = sld [smem:[#allocation2 + %s863_s30]] }
  0x35   : > { %3249 = vst [vmem:[#allocation15_spill] sm:$0xff] %v1895_v30  ;;  %v216_v36 = vmul.f32 %v1895_v30, %v1895_v30  ;;  %v231_v37 = vmul.f32 %v1898_v31, %v1898_v31  ;;  %v1917_v38 = vmul.f32 %v1872_v20, %v1895_v30  ;;  %v1921_v39 = vmul.f32 %v1898_v31, %v1868_v18  ;;  %s2500_s6 = sld [smem:[#allocation5 + %s863_s30]]  ;;  %s1439_s30 = sshll.u32 %s1798_s16, 1 }
  0x36   : > { %v294_v40 = vmul.f32 %v1901_v32, %v1901_v32  ;;  %v358_v41 = vmul.f32 %v1904_v33, %v1904_v33  ;;  %v422_v51 = vmul.f32 %v1928_v42, %v1928_v42  ;;  %v486_v57 = vmul.f32 %v1957_v53, %v1957_v53  ;;  %s2557_s8 = sld [smem:[#allocation2 + %s927_s7]] }
  0x37   : > { %v1933_v44 = vadd.f32 %v217_v26, %v216_v36  ;;  %v1935_v45 = vadd.f32 %v232_v27, %v231_v37  ;;  %v248_v46 = vsub.f32 %v1917_v38, %v1921_v39  ;;  %v1977_v1 = vmul.f32 %v1898_v31, %v1895_v30  ;;  %s2569_s9 = sld [smem:[#allocation5 + %s927_s7]]  ;;  %s1301_s7 = scalar_lea.hbm %s3233_s3, %s1439_s30 }
  0x38   : > { %v1941_v47 = vadd.f32 %v295_v34, %v294_v40  ;;  %v1943_v48 = vadd.f32 %v359_v35, %v358_v41  ;;  %v1963_v55 = vadd.f32 %v423_v52, %v422_v51  ;;  %v1985_v6 = vadd.f32 %v487_v58, %v486_v57 }
  0x39   : > { %1514 = vrsqrt.f32 %v1933_v44  ;;  %vm226_vm0 = vcmp.eq.f32.partialorder %v1933_v44, inf  ;;  %vm228_vm1 = vcmp.eq.f32.partialorder %v1933_v44, 0.0  ;;  %v1988_v7 = vsub.f32 %v546_v59, %v1886_v25 }
  0x3a   : > { %1516 = vrsqrt.f32 %v1935_v45  ;;  %v229_v8 = vand.u32 2147483648, %v1933_v44  ;;  %v1993_v11 = vsub.f32 %v548_v62, %v1864_v13  ;;  %vm241_vm2 = vcmp.eq.f32.partialorder %v1935_v45, inf }
  0x3b   : > { %1518 = vrsqrt.f32 %v1941_v47  ;;  %vm243_vm3 = vcmp.eq.f32.partialorder %v1935_v45, 0.0  ;;  %v244_v16 = vand.u32 2147483648, %v1935_v45  ;;  %v550_v26 = vmul.f32 %v1988_v7, %v1988_v7 }
  0x3c   : > { %1520 = vrsqrt.f32 %v1943_v48  ;;  %v551_v27 = vmul.f32 %v1993_v11, %v1993_v11  ;;  %vm304_vm4 = vcmp.eq.f32.partialorder %v1941_v47, inf  ;;  %vm306_vm5 = vcmp.eq.f32.partialorder %v1941_v47, 0.0 }
  0x3d   : > { %1522 = vrsqrt.f32 %v1963_v55  ;;  %v307_v41 = vand.u32 2147483648, %v1941_v47  ;;  %vm368_vm6 = vcmp.eq.f32.partialorder %v1943_v48, inf  ;;  %vm370_vm7 = vcmp.eq.f32.partialorder %v1943_v48, 0.0 }
  0x3e   : > { %1524 = vrsqrt.f32 %v1985_v6  ;;  %v2006_v37 = vadd.f32 %v551_v27, %v550_v26  ;;  %vm432_vm8 = vcmp.eq.f32.partialorder %v1963_v55, inf  ;;  %vm434_vm9 = vcmp.eq.f32.partialorder %v1963_v55, 0.0 }
  0x3f   : > { %v1515_v56 = vpop.eup %1514  ;;  %v315_v27 = vmul.f32 %v1901_v32, %v1898_v31  ;;  %vm496_vm10 = vcmp.eq.f32.partialorder %v1985_v6, inf  ;;  %vm2090_vm11 = vcmp.ge.f32.partialorder %v248_v46, 0.0  ;;  %vm498_vm12 = vcmp.eq.f32.partialorder %v1985_v6, 0.0 }
  0x40   : > { %v1517_v60 = vpop.eup %1516  ;;  %v220_v61 = vmul.f32 %v1515_v56, %v1933_v44  ;;  %1526 = vrsqrt.f32 %v2006_v37  ;;  %vm560_vm13 = vcmp.eq.f32.partialorder %v2006_v37, inf  ;;  %vm562_vm15 = vcmp.eq.f32.partialorder %v2006_v37, 0.0 }
  0x41   : > { %v1519_v63 = vpop.eup %1518  ;;  %v235_v0 = vmul.f32 %v1517_v60, %v1935_v45 }
  0x42   : > { %v1521_v3 = vpop.eup %1520  ;;  %v221_v4 = vmul.f32 %v1515_v56, %v220_v61  ;;  %v298_v5 = vmul.f32 %v1519_v63, %v1941_v47 }
  0x43   : > { %v236_v9 = vmul.f32 %v1517_v60, %v235_v0  ;;  %v362_v10 = vmul.f32 %v1521_v3, %v1943_v48  ;;  %v1523_v19 = vpop.eup %1522  ;;  %v371_v0 = vand.u32 2147483648, %v1943_v48 }
  0x44   : > { %v222_v12 = vmul.f32 0.5, %v221_v4  ;;  %v299_v14 = vmul.f32 %v1519_v63, %v298_v5  ;;  %v426_v34 = vmul.f32 %v1523_v19, %v1963_v55  ;;  %v1525_v51 = vpop.eup %1524 }
  0x45   : > { %v237_v15 = vmul.f32 0.5, %v236_v9  ;;  %v363_v17 = vmul.f32 %v1521_v3, %v362_v10  ;;  %v490_v61 = vmul.f32 %v1525_v51, %v1985_v6 }
  0x46   : > { %v223_v21 = vsub.f32 1.5, %v222_v12  ;;  %v300_v23 = vmul.f32 0.5, %v299_v14  ;;  %v427_v50 = vmul.f32 %v1523_v19, %v426_v34  ;;  %v379_v34 = vmul.f32 %v1904_v33, %v1901_v32 }
  0x47   : > { %v238_v28 = vsub.f32 1.5, %v237_v15  ;;  %v364_v29 = vmul.f32 0.5, %v363_v17  ;;  %v435_v17 = vand.u32 2147483648, %v1963_v55 }
  0x48   : > { %v224_v35 = vmul.f32 %v1515_v56, %v223_v21  ;;  %v301_v36 = vsub.f32 1.5, %v300_v23  ;;  %v428_v59 = vmul.f32 0.5, %v427_v50  ;;  %v253_v50 = vadd.f32 %v1981_v2, %v1977_v1 }
  0x49   : > { %v239_v40 = vmul.f32 %v1517_v60, %v238_v28  ;;  %v365_v49 = vsub.f32 1.5, %v364_v29 }
  0x4a   : > { %v225_v52 = vmul.f32 %v224_v35, %v1933_v44  ;;  %v302_v57 = vmul.f32 %v1519_v63, %v301_v36  ;;  %v429_v5 = vsub.f32 1.5, %v428_v59 }
  0x4b   : > { %v240_v56 = vmul.f32 %v239_v40, %v1935_v45  ;;  %v366_v58 = vmul.f32 %v1521_v3, %v365_v49  ;;  %v380_v40 = vmul.f32 %v1882_v24, %v1878_v22 }
  0x4c   : > { %v227_v60 = vsel %vm226_vm0, %v1933_v44, %v225_v52  ;;  %v303_v62 = vmul.f32 %v302_v57, %v1941_v47  ;;  %v491_v44 = vmul.f32 %v1525_v51, %v490_v61  ;;  %v430_v14 = vmul.f32 %v1523_v19, %v429_v5  ;;  %v2061_v19 = vpop.eup %1526 }
  0x4d   : > { %v2023_v63 = vsel %vm228_vm1, %v229_v8, %v227_v60  ;;  %v242_v3 = vsel %vm241_vm2, %v1935_v45, %v240_v56  ;;  %v367_v4 = vmul.f32 %v366_v58, %v1943_v48  ;;  %v610_v52 = vstv %s2029_s10  ;;  %s991_s10 = sadd.s32 13, %s1843_s5 }
  0x4e   : > { %v2033_v9 = vsel %vm243_vm3, %v244_v16, %v242_v3  ;;  %v305_v10 = vsel %vm304_vm4, %v1941_v47, %v303_v62  ;;  %v492_v21 = vmul.f32 0.5, %v491_v44  ;;  %v431_v26 = vmul.f32 %v430_v14, %v1963_v55  ;;  %s2705_s17 = sld [smem:[#allocation5 + %s991_s10]] }
  0x4f   : > { %v254_v8 = vmul.f32 %v2033_v9, %v2023_v63  ;;  %v2045_v12 = vsel %vm306_vm5, %v307_v41, %v305_v10  ;;  %v369_v45 = vsel %vm368_vm6, %v1943_v48, %v367_v4  ;;  %v316_v48 = vmul.f32 %v1878_v22, %v1872_v20 }
  0x50   : > { %v318_v15 = vmul.f32 %v2045_v12, %v2033_v9  ;;  %v2054_v16 = vsel %vm370_vm7, %v371_v0, %v369_v45  ;;  %v493_v29 = vsub.f32 1.5, %v492_v21  ;;  %v433_v36 = vsel %vm432_vm8, %v1963_v55, %v431_v26 }
  0x51   : > { %3250 = vst [vmem:[#allocation16_spill] sm:$0xff] %v2054_v16  ;;  %v255_v23 = vadd.f32 0.0001, %v254_v8  ;;  %v382_v47 = vmul.f32 %v2054_v16, %v2045_v12  ;;  %v2074_v41 = vsel %vm434_vm9, %v435_v17, %v433_v36  ;;  %v554_v55 = vmul.f32 %v2061_v19, %v2006_v37 }
  0x52   : > { %v319_v28 = vadd.f32 0.0001, %v318_v15  ;;  %3251 = vst [vmem:[#allocation17_spill] sm:$0xff] %v2074_v41  ;;  %v494_v49 = vmul.f32 %v1525_v51, %v493_v29  ;;  %v446_v57 = vmul.f32 %v2074_v41, %v2054_v16  ;;  %v612_v58 = vstv %s2039_s11  ;;  %s2651_s11 = sld [smem:[#allocation2 + %s991_s10]]  ;;  %s1274_s10 = scalar_lea.sflag [#allocation9], %s3171_s27 }
  0x53   : > { %1528 = vrcp.f32 %v255_v23  ;;  %v383_v35 = vadd.f32 0.0001, %v382_v47  ;;  %v317_v59 = vadd.f32 %v316_v48, %v315_v27  ;;  %v381_v2 = vadd.f32 %v380_v40, %v379_v34 }
  0x54   : > { %1530 = vrcp.f32 %v319_v28  ;;  %v495_v56 = vmul.f32 %v494_v49, %v1985_v6  ;;  %v499_v51 = vand.u32 2147483648, %v1985_v6  ;;  %v2098_v60 = vmul.f32 %v1878_v22, %v1898_v31 }
  0x55   : > { %1532 = vrcp.f32 %v383_v35  ;;  %v2102_v62 = vmul.f32 %v1901_v32, %v1872_v20  ;;  %v2105_v38 = vsub.f32 %v610_v52, %v1886_v25  ;;  %v2108_v39 = vsub.f32 %v612_v58, %v1864_v13 }
  0x56   : > { %v447_v3 = vadd.f32 0.0001, %v446_v57  ;;  %v497_v31 = vsel %vm496_vm10, %v1985_v6, %v495_v56  ;;  %v555_v4 = vmul.f32 %v2061_v19, %v554_v55  ;;  %v2124_v44 = vmul.f32 %v1882_v24, %v1901_v32 }
  0x57   : > { %v312_v20 = vsub.f32 %v2098_v60, %v2102_v62  ;;  %v2128_v8 = vmul.f32 %v1904_v33, %v1878_v22  ;;  %v3235_v45 = vmov -1.0   ;;  %v443_v21 = vmul.f32 %v1928_v42, %v1904_v33 }
  0x58   : > { %v2133_v14 = vsel %vm2090_vm11, 1.0, %v3235_v45  ;;  %v444_v22 = vmul.f32 %v1931_v43, %v1882_v24  ;;  %v2147_v47 = vsel %vm498_vm12, %v499_v51, %v497_v31  ;;  %v507_v27 = vmul.f32 %v1957_v53, %v1928_v42 }
  0x59   : > { %v1529_v61 = vpop.eup %1528  ;;  %v556_v48 = vmul.f32 0.5, %v555_v4  ;;  %v614_v28 = vmul.f32 %v2105_v38, %v2105_v38  ;;  %1534 = vrcp.f32 %v447_v3  ;;  %v615_v34 = vmul.f32 %v2108_v39, %v2108_v39 }
  0x5a   : > { %v1531_v46 = vpop.eup %1530  ;;  %v2114_v0 = vmul.f32 %v1529_v61, %v253_v50  ;;  %v2172_v40 = vmul.f32 %v1931_v43, %v1904_v33  ;;  %v510_v49 = vmul.f32 %v2147_v47, %v2074_v41  ;;  %v508_v57 = vmul.f32 %v1960_v54, %v1931_v43 }
  0x5b   : > { %v1533_v5 = vpop.eup %1532  ;;  %v2120_v10 = vmul.f32 %v1531_v46, %v317_v59  ;;  %v674_v56 = vstv %s2112_s19  ;;  %v2189_v33 = vmul.f32 %v1928_v42, %v1882_v24  ;;  %v557_v59 = vsub.f32 1.5, %v556_v48  ;;  %s1055_s19 = sadd.s32 14, %s1843_s5 }
  0x5c   : > { %v3238_v15 = vclamps-f32 %v2114_v0, 0.9999  ;;  %v2136_v17 = vmul.f32 %v1533_v5, %v381_v2  ;;  %v2194_v61 = vadd.f32 %v615_v34, %v614_v28  ;;  %v445_v62 = vadd.f32 %v444_v22, %v443_v21  ;;  %s2780_s24 = sld [smem:[#allocation5 + %s1055_s19]] }
  0x5d   : > { %v3237_v32 = vclamps-f32 %v2120_v10, 0.9999  ;;  %v511_v46 = vadd.f32 0.0001, %v510_v49  ;;  %v509_v24 = vadd.f32 %v508_v57, %v507_v27  ;;  %v571_v31 = vmul.f32 %v1988_v7, %v1957_v53 }
  0x5e   : > { %v2151_v26 = vand.u32 2147483647, %v3238_v15  ;;  %v3234_v29 = vclamps-f32 %v2136_v17, 0.9999  ;;  %v572_v4 = vmul.f32 %v1993_v11, %v1960_v54  ;;  %v558_v48 = vmul.f32 %v2061_v19, %v557_v59 }
  0x5f   : > { %v2163_v6 = vand.u32 2147483647, %v3237_v32  ;;  %v1535_v3 = vpop.eup %1534  ;;  %v2206_v28 = vsub.f32 %v674_v56, %v1886_v25  ;;  %v676_v21 = vstv %s2159_s20  ;;  %vm2215_vm14 = vcmp.ge.f32.partialorder %v312_v20, 0.0  ;;  %s2762_s20 = sld [smem:[#allocation2 + %s1055_s19]] }
  0x60   : > { %v261_v35 = vmul.f32 -0.0187293, %v2151_v26  ;;  %v267_v36 = vsub.f32 1.0, %v2151_v26  ;;  %v2179_v52 = vand.u32 2147483647, %v3234_v29  ;;  %v563_v49 = vand.u32 2147483648, %v2006_v37 }
  0x61   : > { %v331_v50 = vsub.f32 1.0, %v2163_v6  ;;  %v325_v58 = vmul.f32 -0.0187293, %v2163_v6  ;;  %v559_v20 = vmul.f32 %v558_v48, %v2006_v37  ;;  %v2233_v59 = vmul.f32 %v2206_v28, %v2206_v28 }
  0x62   : > { %v2184_v55 = vmax.f32 %v267_v36, 0.0  ;;  %v262_v1 = vadd.f32 0.074261, %v261_v35  ;;  %v395_v51 = vsub.f32 1.0, %v2179_v52  ;;  %v389_v60 = vmul.f32 -0.0187293, %v2179_v52 }
  0x63   : > { %v2191_v2 = vmax.f32 %v331_v50, 0.0  ;;  %v326_v5 = vadd.f32 0.074261, %v325_v58  ;;  %v2219_v36 = vmul.f32 %v1535_v3, %v445_v62  ;;  %v2224_v50 = vadd.f32 %v572_v4, %v571_v31 }
  0x64   : > { %1536 = vrsqrt.f32 %v2184_v55  ;;  %v263_v22 = vmul.f32 %v262_v1, %v2151_v26  ;;  %v2210_v34 = vmax.f32 %v395_v51, 0.0  ;;  %v390_v19 = vadd.f32 0.074261, %v389_v60 }
  0x65   : > { %1538 = vrsqrt.f32 %v2191_v2  ;;  %v327_v56 = vmul.f32 %v326_v5, %v2163_v6  ;;  %v2229_v58 = vsub.f32 %v676_v21, %v1864_v13  ;;  %v2239_v62 = vsel %vm2215_vm14, 1.0, %v3235_v45 }
  0x66   : > { %1540 = vrsqrt.f32 %v2194_v61  ;;  %v264_v51 = vadd.f32 -0.2121144, %v263_v22  ;;  %vm276_vm0 = vcmp.eq.f32.partialorder %v2184_v55, inf  ;;  %v391_v31 = vmul.f32 %v390_v19, %v2179_v52 }
  0x67   : > { %1542 = vrcp.f32 %v511_v46  ;;  %v3239_v46 = vclamps-f32 %v2219_v36, 0.9999  ;;  %v2247_v4 = vmul.f32 %v1960_v54, %v1928_v42  ;;  %v2251_v5 = vmul.f32 %v1957_v53, %v1931_v43 }
  0x68   : > { %1544 = vrsqrt.f32 %v2210_v34  ;;  %vm278_vm1 = vcmp.eq.f32.partialorder %v2184_v55, 0.0  ;;  %v279_v22 = vand.u32 2147483648, %v2184_v55  ;;  %vm340_vm2 = vcmp.eq.f32.partialorder %v2191_v2, inf }
  0x69   : > { %v2260_v35 = vand.u32 2147483647, %v3239_v46  ;;  %v328_v42 = vadd.f32 -0.2121144, %v327_v56  ;;  %vm342_vm3 = vcmp.eq.f32.partialorder %v2191_v2, 0.0  ;;  %v343_v43 = vand.u32 2147483648, %v2191_v2 }
  0x6a   : > { %v1537_v57 = vpop.eup %1536  ;;  %v265_v45 = vmul.f32 %v264_v51, %v2151_v26  ;;  %v392_v41 = vadd.f32 -0.2121144, %v391_v31  ;;  %v3256_v26 = vclamps-f32 %v2114_v0, 0.9999  ;;  %vm404_vm6 = vcmp.eq.f32.partialorder %v2210_v34, inf }
  0x6b   : > { %v1539_v1 = vpop.eup %1538  ;;  %v270_v60 = vmul.f32 %v1537_v57, %v2184_v55  ;;  %v453_v32 = vmul.f32 -0.0187293, %v2260_v35  ;;  %v459_v15 = vsub.f32 1.0, %v2260_v35  ;;  %vm406_vm7 = vcmp.eq.f32.partialorder %v2210_v34, 0.0 }
  0x6c   : > { %v334_v3 = vmul.f32 %v1539_v1, %v2191_v2  ;;  %v2253_v48 = vpop.eup %1540  ;;  %vm2279_vm4 = vcmp.ge.f32.partialorder %v3256_v26, 0.0  ;;  %v3265_v51 = vmov -1.0   ;;  %vm624_vm14 = vcmp.eq.f32.partialorder %v2194_v61, inf }
  0x6d   : > { %v271_v21 = vmul.f32 %v1537_v57, %v270_v60  ;;  %v1543_v19 = vpop.eup %1542  ;;  %v454_v18 = vadd.f32 0.074261, %v453_v32  ;;  %v2272_v30 = vmax.f32 %v459_v15, 0.0  ;;  %v561_v60 = vsel %vm560_vm13, %v2006_v37, %v559_v20 }
  0x6e   : > { %v335_v27 = vmul.f32 %v1539_v1, %v334_v3  ;;  %v1545_v29 = vpop.eup %1544  ;;  %v2270_v3 = vmul.f32 %v1543_v19, %v509_v24  ;;  %v3259_v15 = vclamps-f32 %v2120_v10, 0.9999 }
  0x6f   : > { %v272_v23 = vmul.f32 0.5, %v271_v21  ;;  %v398_v56 = vmul.f32 %v1545_v29, %v2210_v34  ;;  %1546 = vrsqrt.f32 %v2272_v30  ;;  %vm468_vm11 = vcmp.eq.f32.partialorder %v2272_v30, inf }
  0x70   : > { %v336_v46 = vmul.f32 0.5, %v335_v27  ;;  %v329_v27 = vmul.f32 %v328_v42, %v2163_v6  ;;  %v1421_v24 = vclamps-f32 %v2270_v3, 0.9999  ;;  %vm2287_vm5 = vcmp.ge.f32.partialorder %v3259_v15, 0.0 }
  0x71   : > { %v273_v16 = vsub.f32 1.5, %v272_v23  ;;  %v399_v21 = vmul.f32 %v1545_v29, %v398_v56  ;;  %v3262_v6 = vsub.f32 %v2124_v44, %v2128_v8  ;;  %v455_v42 = vmul.f32 %v454_v18, %v2260_v35 }
  0x72   : > { %v337_v31 = vsub.f32 1.5, %v336_v46  ;;  %v266_v46 = vadd.f32 1.5707288, %v265_v45  ;;  %v330_v44 = vadd.f32 1.5707288, %v329_v27  ;;  %vm470_vm12 = vcmp.eq.f32.partialorder %v2272_v30, 0.0 }
  0x73   : > { %v274_v23 = vmul.f32 %v1537_v57, %v273_v16  ;;  %vm2297_vm8 = vcmp.ge.f32.partialorder %v3262_v6, 0.0  ;;  %v393_v16 = vmul.f32 %v392_v41, %v2179_v52  ;;  %v400_v10 = vmul.f32 0.5, %v399_v21 }
  0x74   : > { %v338_v0 = vmul.f32 %v1539_v1, %v337_v31  ;;  %v2304_v57 = vsel %vm562_vm15, %v563_v49, %v561_v60  ;;  %v2310_v1 = vand.u32 2147483647, %v1421_v24  ;;  %v407_v41 = vand.u32 2147483648, %v2210_v34 }
  0x75   : > { %v275_v19 = vmul.f32 %v274_v23, %v2184_v55  ;;  %v401_v56 = vsub.f32 1.5, %v400_v10  ;;  %v574_v18 = vmul.f32 %v2304_v57, %v2147_v47  ;;  %v394_v26 = vadd.f32 1.5707288, %v393_v16  ;;  %v1547_v31 = vpop.eup %1546 }
  0x76   : > { %v339_v8 = vmul.f32 %v338_v0, %v2191_v2  ;;  %v517_v45 = vmul.f32 -0.0187293, %v2310_v1  ;;  %v523_v52 = vsub.f32 1.0, %v2310_v1  ;;  %v456_v15 = vadd.f32 -0.2121144, %v455_v42 }
  0x77   : > { %v277_v37 = vsel %vm276_vm0, %v2184_v55, %v275_v19  ;;  %v402_v27 = vmul.f32 %v1545_v29, %v401_v56  ;;  %v462_v19 = vmul.f32 %v1547_v31, %v2272_v30  ;;  %v2338_v29 = vmul.f32 %v1988_v7, %v1960_v54 }
  0x78   : > { %v280_v49 = vsel %vm278_vm1, %v279_v22, %v277_v37  ;;  %v341_v60 = vsel %vm340_vm2, %v2191_v2, %v339_v8  ;;  %v518_v0 = vadd.f32 0.074261, %v517_v45  ;;  %v2330_v55 = vmax.f32 %v523_v52, 0.0 }
  0x79   : > { %v281_v21 = vmul.f32 %v280_v49, %v266_v46  ;;  %v344_v23 = vsel %vm342_vm3, %v343_v43, %v341_v60  ;;  %v403_v10 = vmul.f32 %v402_v27, %v2210_v34  ;;  %v2334_v8 = vmul.f32 %v1993_v11, %v1957_v53 }
  0x7a   : > { %v345_v6 = vmul.f32 %v344_v23, %v330_v44  ;;  %v575_v2 = vadd.f32 0.0001, %v574_v18  ;;  %v463_v46 = vmul.f32 %v1547_v31, %v462_v19  ;;  %1548 = vrsqrt.f32 %v2330_v55 }
  0x7b   : > { %v283_v22 = vsub.f32 3.1415927, %v281_v21  ;;  %v405_v16 = vsel %vm404_vm6, %v2210_v34, %v403_v10  ;;  %v519_v44 = vmul.f32 %v518_v0, %v2310_v1  ;;  %v618_v54 = vmul.f32 %v2253_v48, %v2194_v61 }
  0x7c   : > { %v347_v43 = vsub.f32 3.1415927, %v345_v6  ;;  %v408_v53 = vsel %vm406_vm7, %v407_v41, %v405_v16  ;;  %v464_v52 = vmul.f32 0.5, %v463_v46  ;;  %v378_v34 = vsel %vm2297_vm8, 1.0, %v3265_v51 }
  0x7d   : > { %v284_v42 = vsel %vm2279_vm4, %v281_v21, %v283_v22  ;;  %v409_v45 = vmul.f32 %v408_v53, %v394_v26  ;;  %v3266_v41 = vclamps-f32 %v2136_v17, 0.9999  ;;  %v457_v49 = vmul.f32 %v456_v15, %v2260_v35 }
  0x7e   : > { %v285_v56 = vmul.f32 %v284_v42, %v2133_v14  ;;  %v348_v37 = vsel %vm2287_vm5, %v345_v6, %v347_v43  ;;  %v465_v27 = vsub.f32 1.5, %v464_v52  ;;  %v568_v14 = vsub.f32 %v2334_v8, %v2338_v29 }
  0x7f   : > { %v349_v18 = vmul.f32 %v348_v37, %v2239_v62  ;;  %vm410_vm9 = vcmp.ge.f32.partialorder %v3266_v41, 0.0  ;;  %v411_v60 = vsub.f32 3.1415927, %v409_v45  ;;  %1550 = vrcp.f32 %v575_v2 }
  0x80   : > { %v3267_v62 = vsub.f32 %v2172_v40, %v2189_v33  ;;  %v619_v17 = vmul.f32 %v2253_v48, %v618_v54  ;;  %v679_v35 = vmul.f32 %v2229_v58, %v2229_v58  ;;  %v1549_v20 = vpop.eup %1548  ;;  %v466_v23 = vmul.f32 %v1547_v31, %v465_v27 }
  0x81   : > { %v350_v32 = vadd.f32 %v349_v18, %v285_v56  ;;  %v412_v21 = vsel %vm410_vm9, %v409_v45, %v411_v60  ;;  %v520_v15 = vadd.f32 -0.2121144, %v519_v44  ;;  %v471_v6 = vand.u32 2147483648, %v2272_v30 }
  0x82   : > { %vm2367_vm10 = vcmp.ge.f32.partialorder %v3267_v62, 0.0  ;;  %v413_v0 = vmul.f32 %v412_v21, %v378_v34  ;;  %v526_v40 = vmul.f32 %v1549_v20, %v2330_v55  ;;  %v620_v33 = vmul.f32 0.5, %v619_v17 }
  0x83   : > { %v458_v10 = vadd.f32 1.5707288, %v457_v49  ;;  %v467_v19 = vmul.f32 %v466_v23, %v2272_v30  ;;  %v2384_v43 = vadd.f32 %v679_v35, %v2233_v59  ;;  %v442_v46 = vsel %vm2367_vm10, 1.0, %v3265_v51 }
  0x84   : > { %v414_v22 = vadd.f32 %v413_v0, %v350_v32  ;;  %v527_v31 = vmul.f32 %v1549_v20, %v526_v40  ;;  %v621_v2 = vsub.f32 1.5, %v620_v33  ;;  %v3270_v53 = vclamps-f32 %v2219_v36, 0.9999 }
  0x85   : > { %v1551_v16 = vpop.eup %1550  ;;  %v469_v42 = vsel %vm468_vm11, %v2272_v30, %v467_v19  ;;  %v521_v54 = vmul.f32 %v520_v15, %v2310_v1  ;;  %v627_v30 = vand.u32 2147483648, %v2194_v61  ;;  %1552 = vrsqrt.f32 %v2384_v43 }
  0x86   : > { %vm2394_vm13 = vcmp.ge.f32.partialorder %v3270_v53, 0.0  ;;  %v472_v56 = vsel %vm470_vm12, %v471_v6, %v469_v42  ;;  %v528_v59 = vmul.f32 0.5, %v527_v31  ;;  %v2400_v37 = vmul.f32 %v1551_v16, %v2224_v50 }
  0x87   : > { %v622_v45 = vmul.f32 %v2253_v48, %v621_v2  ;;  %v473_v52 = vmul.f32 %v472_v56, %v458_v10  ;;  %vm626_vm15 = vcmp.eq.f32.partialorder %v2194_v61, 0.0  ;;  %vm532_vm0 = vcmp.eq.f32.partialorder %v2330_v55, inf }
  0x88   : > { %v529_v36 = vsub.f32 1.5, %v528_v59  ;;  %v1422_v1 = vclamps-f32 %v2400_v37, 0.9999  ;;  %vm534_vm1 = vcmp.eq.f32.partialorder %v2330_v55, 0.0  ;;  %v535_v48 = vand.u32 2147483648, %v2330_v55 }
  0x89   : > { %v623_v18 = vmul.f32 %v622_v45, %v2194_v61  ;;  %v475_v50 = vsub.f32 3.1415927, %v473_v52  ;;  %v522_v34 = vadd.f32 1.5707288, %v521_v54  ;;  %v738_v62 = vstv %s2377_s25  ;;  %s1119_s25 = sadd.s32 15, %s1843_s5 }
  0x8a   : > { %v530_v41 = vmul.f32 %v1549_v20, %v529_v36  ;;  %v2415_v49 = vand.u32 2147483647, %v1422_v1  ;;  %v740_v26 = vstv %s2381_s26  ;;  %v635_v0 = vmul.f32 %v2105_v38, %v1988_v7  ;;  %s2878_s5 = sld [smem:[#allocation2 + %s1119_s25]] }
  0x8b   : > { %v625_v60 = vsel %vm624_vm14, %v2194_v61, %v623_v18  ;;  %v476_v27 = vsel %vm2394_vm13, %v473_v52, %v475_v50  ;;  %v1553_v23 = vpop.eup %1552  ;;  %v3273_v61 = vsub.f32 %v2247_v4, %v2251_v5  ;;  %v636_v6 = vmul.f32 %v2108_v39, %v1993_v11  ;;  %s2894_s26 = sld [smem:[#allocation5 + %s1119_s25]] }
  0x8c   : > { %v2422_v32 = vsel %vm626_vm15, %v627_v30, %v625_v60  ;;  %v477_v17 = vmul.f32 %v476_v27, %v442_v46  ;;  %v531_v35 = vmul.f32 %v530_v41, %v2330_v55  ;;  %v581_v20 = vmul.f32 -0.0187293, %v2415_v49 }
  0x8d   : > { %v587_v21 = vsub.f32 1.0, %v2415_v49  ;;  %vm2434_vm2 = vcmp.ge.f32.partialorder %v3273_v61, 0.0  ;;  %v638_v40 = vmul.f32 %v2422_v32, %v2304_v57  ;;  %v2450_v4 = vsub.f32 %v738_v62, %v1886_v25 }
  0x8e   : > { %v478_v33 = vadd.f32 %v477_v17, %v414_v22  ;;  %v533_v10 = vsel %vm532_vm0, %v2330_v55, %v531_v35  ;;  %v682_v2 = vmul.f32 %v1553_v23, %v2384_v43  ;;  %v2456_v22 = vsub.f32 %v740_v26, %v1864_v13 }
  0x8f   : > { %v2447_v19 = vmax.f32 %v587_v21, 0.0  ;;  %v536_v5 = vsel %vm534_vm1, %v535_v48, %v533_v10  ;;  %v639_v31 = vadd.f32 0.0001, %v638_v40  ;;  %v582_v46 = vadd.f32 0.074261, %v581_v20 }
  0x90   : > { %v537_v16 = vmul.f32 %v536_v5, %v522_v34  ;;  %vm538_vm3 = vcmp.ge.f32.partialorder %v1421_v24, 0.0  ;;  %v506_v55 = vsel %vm2434_vm2, 1.0, %v3265_v51  ;;  %v637_v53 = vadd.f32 %v636_v6, %v635_v0 }
  0x91   : > { %1554 = vrsqrt.f32 %v2447_v19  ;;  %v683_v44 = vmul.f32 %v1553_v23, %v682_v2  ;;  %v742_v54 = vmul.f32 %v2450_v4, %v2450_v4  ;;  %v743_v56 = vmul.f32 %v2456_v22, %v2456_v22 }
  0x92   : > { %1556 = vrcp.f32 %v639_v31  ;;  %v539_v42 = vsub.f32 3.1415927, %v537_v16  ;;  %v802_v59 = vstv %s2418_s28  ;;  %v804_v45 = vstv %s2426_s29  ;;  %s1415_s28 = sshll.u32 %s3171_s27, 1 }
  0x93   : > { %v583_v3 = vmul.f32 %v582_v46, %v2415_v49  ;;  %v684_v24 = vmul.f32 0.5, %v683_v44  ;;  %v2473_v30 = vsub.f32 %v802_v59, %v1886_v25  ;;  %v2475_v18 = vadd.f32 %v743_v56, %v742_v54  ;;  %s186_s29 = scalar_lea.vmem [#allocation8], %s1415_s28 }
  0x94   : > { %v540_v52 = vsel %vm538_vm3, %v537_v16, %v539_v42  ;;  %v2478_v34 = vsub.f32 %v804_v45, %v1864_v13  ;;  %vm569_vm4 = vcmp.ge.f32.partialorder %v568_v14, 0.0  ;;  %vm688_vm5 = vcmp.eq.f32.partialorder %v2384_v43, inf }
  0x95   : > { %v541_v36 = vmul.f32 %v540_v52, %v506_v55  ;;  %v685_v48 = vsub.f32 1.5, %v684_v24  ;;  %1558 = vrsqrt.f32 %v2475_v18  ;;  %v806_v62 = vmul.f32 %v2473_v30, %v2473_v30 }
  0x96   : > { %v584_v26 = vadd.f32 -0.2121144, %v583_v3  ;;  %v691_v21 = vand.u32 2147483648, %v2384_v43  ;;  %v807_v61 = vmul.f32 %v2478_v34, %v2478_v34  ;;  %vm690_vm6 = vcmp.eq.f32.partialorder %v2384_v43, 0.0 }
  0x97   : > { %v1555_v50 = vpop.eup %1554  ;;  %v2482_v60 = vadd.f32 %v541_v36, %v478_v33  ;;  %v686_v35 = vmul.f32 %v1553_v23, %v685_v48  ;;  %v2503_v8 = vsel %vm569_vm4, 1.0, %v3265_v51  ;;  %v699_v33 = vmul.f32 %v2206_v28, %v2105_v38 }
  0x98   : > { %v1557_v41 = vpop.eup %1556  ;;  %v590_v27 = vmul.f32 %v1555_v50, %v2447_v19  ;;  %v2505_v14 = vadd.f32 %v807_v61, %v806_v62  ;;  %v585_v23 = vmul.f32 %v584_v26, %v2415_v49  ;;  %v700_v2 = vmul.f32 %v2229_v58, %v2108_v39 }
  0x99   : > { %v2491_v17 = vmul.f32 %v1557_v41, %v637_v53  ;;  %v687_v0 = vmul.f32 %v686_v35, %v2384_v43  ;;  %v2522_v49 = vmul.f32 %v2108_v39, %v1988_v7  ;;  %v866_v46 = vstv %s2480_s4 }
  0x9a   : > { %v591_v20 = vmul.f32 %v1555_v50, %v590_v27  ;;  %1560 = vrsqrt.f32 %v2505_v14  ;;  %vm596_vm7 = vcmp.eq.f32.partialorder %v2447_v19, inf  ;;  %v586_v44 = vadd.f32 1.5707288, %v585_v23 }
  0x9b   : > { %v1423_v15 = vclamps-f32 %v2491_v17, 0.9999  ;;  %v689_v40 = vsel %vm688_vm5, %v2384_v43, %v687_v0  ;;  %v1559_v10 = vpop.eup %1558  ;;  %v2526_v43 = vmul.f32 %v2105_v38, %v1993_v11  ;;  %vm598_vm8 = vcmp.eq.f32.partialorder %v2447_v19, 0.0 }
  0x9c   : > { %v592_v29 = vmul.f32 0.5, %v591_v20  ;;  %v2515_v31 = vsel %vm690_vm6, %v691_v21, %v689_v40  ;;  %v746_v53 = vmul.f32 %v1559_v10, %v2475_v18  ;;  %v599_v7 = vand.u32 2147483648, %v2447_v19 }
  0x9d   : > { %v2510_v6 = vand.u32 2147483647, %v1423_v15  ;;  %v702_v42 = vmul.f32 %v2515_v31, %v2422_v32  ;;  %v2541_v45 = vsub.f32 %v866_v46, %v1886_v25  ;;  %v701_v3 = vadd.f32 %v700_v2, %v699_v33 }
  0x9e   : > { %v593_v5 = vsub.f32 1.5, %v592_v29  ;;  %v747_v59 = vmul.f32 %v1559_v10, %v746_v53  ;;  %v868_v24 = vstv %s2500_s6  ;;  %vm2551_vm9 = vcmp.ge.f32.partialorder %v1422_v1, 0.0 }
  0x9f   : > { %v651_v16 = vsub.f32 1.0, %v2510_v6  ;;  %v703_v56 = vadd.f32 0.0001, %v702_v42  ;;  %v645_v52 = vmul.f32 -0.0187293, %v2510_v6  ;;  %v632_v41 = vsub.f32 %v2522_v49, %v2526_v43 }
  0xa0   : > { %v594_v55 = vmul.f32 %v1555_v50, %v593_v5  ;;  %v1561_v36 = vpop.eup %1560  ;;  %v748_v62 = vmul.f32 0.5, %v747_v59  ;;  %v2563_v26 = vmul.f32 %v2450_v4, %v2206_v28  ;;  %v2567_v37 = vmul.f32 %v2456_v22, %v2229_v58 }
  0xa1   : > { %v2536_v54 = vmax.f32 %v651_v16, 0.0  ;;  %v810_v35 = vmul.f32 %v1561_v36, %v2505_v14  ;;  %v2573_v20 = vsub.f32 %v868_v24, %v1864_v13  ;;  %v646_v21 = vadd.f32 0.074261, %v645_v52 }
  0xa2   : > { %v595_v11 = vmul.f32 %v594_v55, %v2447_v19  ;;  %v749_v61 = vsub.f32 1.5, %v748_v62  ;;  %vm752_vm10 = vcmp.eq.f32.partialorder %v2475_v18, inf  ;;  %vm754_vm11 = vcmp.eq.f32.partialorder %v2475_v18, 0.0 }
  0xa3   : > { %1562 = vrsqrt.f32 %v2536_v54  ;;  %v755_v29 = vand.u32 2147483648, %v2475_v18  ;;  %v811_v23 = vmul.f32 %v1561_v36, %v810_v35  ;;  %v871_v40 = vmul.f32 %v2573_v20, %v2573_v20 }
  0xa4   : > { %v597_v50 = vsel %vm596_vm7, %v2447_v19, %v595_v11  ;;  %1564 = vrcp.f32 %v703_v56  ;;  %v870_v19 = vmul.f32 %v2541_v45, %v2541_v45  ;;  %v694_v5 = vmul.f32 %v2229_v58, %v2105_v38 }
  0xa5   : > { %v600_v27 = vsel %vm598_vm8, %v599_v7, %v597_v50  ;;  %v695_v2 = vmul.f32 %v2206_v28, %v2108_v39  ;;  %v750_v16 = vmul.f32 %v1559_v10, %v749_v61  ;;  %vm816_vm12 = vcmp.eq.f32.partialorder %v2505_v14, inf }
  0xa6   : > { %v601_v1 = vmul.f32 %v600_v27, %v586_v44  ;;  %v812_v53 = vmul.f32 0.5, %v811_v23  ;;  %v2590_v44 = vadd.f32 %v871_v40, %v870_v19  ;;  %v647_v38 = vmul.f32 %v646_v21, %v2510_v6 }
  0xa7   : > { %v751_v39 = vmul.f32 %v750_v16, %v2475_v18  ;;  %v930_v59 = vstv %s2557_s8  ;;  %v932_v50 = vstv %s2569_s9  ;;  %vm818_vm13 = vcmp.eq.f32.partialorder %v2505_v14, 0.0  ;;  %s1303_s8 = sshll.u32 %s186_s29, 4  ;;  %s1305_s9 = sshll.u32 %s1301_s7, 4  ;;  %s1304_s8 = int_to_ptr.vmem [resolvable:$true] %s1303_s8  ;;  %s1306_s9 = int_to_ptr.hbm [resolvable:$true] %s1305_s9 }
  0xa8   : > { %v603_v0 = vsub.f32 3.1415927, %v601_v1  ;;  %v813_v56 = vsub.f32 1.5, %v812_v53  ;;  %1566 = vrsqrt.f32 %v2590_v44  ;;  %v2620_v35 = vsub.f32 %v930_v59, %v1886_v25 }
  0xa9   : > { %v1563_v33 = vpop.eup %1562  ;;  %v696_v21 = vsub.f32 %v694_v5, %v695_v2  ;;  %v648_v61 = vadd.f32 -0.2121144, %v647_v38  ;;  %v2631_v23 = vmul.f32 %v2456_v22, %v2206_v28  ;;  %v2635_v5 = vmul.f32 %v2450_v4, %v2229_v58 }
  0xaa   : > { %v1565_v46 = vpop.eup %1564  ;;  %v604_v55 = vsel %vm2551_vm9, %v601_v1, %v603_v0  ;;  %v654_v42 = vmul.f32 %v1563_v33, %v2536_v54  ;;  %v814_v27 = vmul.f32 %v1561_v36, %v813_v56  ;;  %v819_v1 = vand.u32 2147483648, %v2505_v14 }
  0xab   : > { %v605_v7 = vmul.f32 %v604_v55, %v2503_v8  ;;  %v2594_v11 = vmul.f32 %v1565_v46, %v701_v3  ;;  %v753_v8 = vsel %vm752_vm10, %v2475_v18, %v751_v39  ;;  %v2624_v36 = vsub.f32 %v932_v50, %v1864_v13 }
  0xac   : > { %v655_v10 = vmul.f32 %v1563_v33, %v654_v42  ;;  %v2609_v48 = vsel %vm754_vm11, %v755_v29, %v753_v8  ;;  %v815_v18 = vmul.f32 %v814_v27, %v2505_v14  ;;  %v760_v58 = vsub.f32 %v2631_v23, %v2635_v5 }
  0xad   : > { %v2600_v52 = vadd.f32 %v605_v7, %v2482_v60  ;;  %v1424_v24 = vclamps-f32 %v2594_v11, 0.9999  ;;  %v766_v62 = vmul.f32 %v2609_v48, %v2515_v31  ;;  %vm2662_vm14 = vcmp.ge.f32.partialorder %v632_v41, 0.0 }
  0xae   : > { %v656_v3 = vmul.f32 0.5, %v655_v10  ;;  %v1567_v40 = vpop.eup %1566  ;;  %v817_v46 = vsel %vm816_vm12, %v2505_v14, %v815_v18  ;;  %v935_v14 = vmul.f32 %v2624_v36, %v2624_v36  ;;  %v827_v39 = vmul.f32 %v2473_v30, %v2450_v4 }
  0xaf   : > { %v2614_v60 = vand.u32 2147483647, %v1424_v24  ;;  %v767_v2 = vadd.f32 0.0001, %v766_v62  ;;  %v2644_v42 = vsel %vm818_vm13, %v819_v1, %v817_v46  ;;  %v874_v28 = vmul.f32 %v1567_v40, %v2590_v44 }
  0xb0   : > { %v657_v19 = vsub.f32 1.5, %v656_v3  ;;  %v830_v53 = vmul.f32 %v2644_v42, %v2609_v48  ;;  %vm660_vm15 = vcmp.eq.f32.partialorder %v2536_v54, inf  ;;  %v828_v56 = vmul.f32 %v2478_v34, %v2456_v22 }
  0xb1   : > { %v709_v0 = vmul.f32 -0.0187293, %v2614_v60  ;;  %v715_v29 = vsub.f32 1.0, %v2614_v60  ;;  %1568 = vrcp.f32 %v767_v2  ;;  %v649_v49 = vmul.f32 %v648_v61, %v2510_v6 }
  0xb2   : > { %v658_v16 = vmul.f32 %v1563_v33, %v657_v19  ;;  %v934_v33 = vmul.f32 %v2620_v35, %v2620_v35  ;;  %v831_v59 = vadd.f32 0.0001, %v830_v53  ;;  %vm697_vm0 = vcmp.ge.f32.partialorder %v696_v21, 0.0 }
  0xb3   : > { %v2640_v55 = vmax.f32 %v715_v29, 0.0  ;;  %v710_v10 = vadd.f32 0.074261, %v709_v0  ;;  %v765_v43 = vadd.f32 %v2567_v37, %v2563_v26  ;;  %v875_v41 = vmul.f32 %v1567_v40, %v874_v28 }
  0xb4   : > { %v659_v38 = vmul.f32 %v658_v16, %v2536_v54  ;;  %v663_v8 = vand.u32 2147483648, %v2536_v54  ;;  %v2677_v50 = vadd.f32 %v935_v14, %v934_v33  ;;  %vm662_vm1 = vcmp.eq.f32.partialorder %v2536_v54, 0.0 }
  0xb5   : > { %1570 = vrsqrt.f32 %v2640_v55  ;;  %v876_v27 = vmul.f32 0.5, %v875_v41  ;;  %v2684_v6 = vsel %vm2662_vm14, 1.0, %v3265_v51  ;;  %v2687_v26 = vsel %vm697_vm0, 1.0, %v3265_v51 }
  0xb6   : > { %1572 = vrcp.f32 %v831_v59  ;;  %v661_v3 = vsel %vm660_vm15, %v2536_v54, %v659_v38  ;;  %v711_v37 = vmul.f32 %v710_v10, %v2614_v60  ;;  %v829_v1 = vadd.f32 %v828_v56, %v827_v39 }
  0xb7   : > { %v1569_v62 = vpop.eup %1568  ;;  %v650_v21 = vadd.f32 1.5707288, %v649_v49  ;;  %v877_v61 = vsub.f32 1.5, %v876_v27  ;;  %v994_v54 = vstv %s2651_s11  ;;  %v664_v0 = vsel %vm662_vm1, %v663_v8, %v661_v3  ;;  %s1662_s11 = sshra.s32 %s1306_s9, 4  ;;  %s1663_s11 = int_to_ptr.hbm [resolvable:$true] %s1662_s11 }
  0xb8   : > { %v2690_v18 = vmul.f32 %v1569_v62, %v765_v43  ;;  %vm2695_vm2 = vcmp.ge.f32.partialorder %v1423_v15, 0.0  ;;  %v891_v2 = vmul.f32 %v2541_v45, %v2473_v30  ;;  %1574 = vrsqrt.f32 %v2677_v50  ;;  %p1669_p2 = scmp.lt.s32.totalorder %s1663_s11, %s3233_s3 }
  0xb9   : > { %v2710_v28 = vmul.f32 %v2478_v34, %v2450_v4  ;;  %v2714_v17 = vmul.f32 %v2473_v30, %v2456_v22  ;;  %vm880_vm3 = vcmp.eq.f32.partialorder %v2590_v44, inf  ;;  %v712_v33 = vadd.f32 -0.2121144, %v711_v37 }
  0xba   : > { %v1425_v46 = vclamps-f32 %v2690_v18, 0.9999  ;;  %v878_v14 = vmul.f32 %v1567_v40, %v877_v61  ;;  %vm882_vm4 = vcmp.eq.f32.partialorder %v2590_v44, 0.0  ;;  %v665_v7 = vmul.f32 %v664_v0, %v650_v21 }
  0xbb   : > { %v1571_v19 = vpop.eup %1570  ;;  %v824_v4 = vsub.f32 %v2710_v28, %v2714_v17  ;;  %v883_v22 = vand.u32 2147483648, %v2590_v44  ;;  %v892_v40 = vmul.f32 %v2573_v20, %v2478_v34  ;;  %vm724_vm5 = vcmp.eq.f32.partialorder %v2640_v55, inf }
  0xbc   : > { %v718_v16 = vmul.f32 %v1571_v19, %v2640_v55  ;;  %v1573_v15 = vpop.eup %1572  ;;  %v2720_v38 = vand.u32 2147483647, %v1425_v46  ;;  %v879_v56 = vmul.f32 %v878_v14, %v2590_v44  ;;  %vm726_vm6 = vcmp.eq.f32.partialorder %v2640_v55, 0.0 }
  0xbd   : > { %v2725_v10 = vmul.f32 %v1573_v15, %v829_v1  ;;  %v713_v41 = vmul.f32 %v712_v33, %v2614_v60  ;;  %v667_v62 = vsub.f32 3.1415927, %v665_v7  ;;  %v727_v37 = vand.u32 2147483648, %v2640_v55 }
  0xbe   : > { %v719_v53 = vmul.f32 %v1571_v19, %v718_v16  ;;  %v773_v59 = vmul.f32 -0.0187293, %v2720_v38  ;;  %v779_v49 = vsub.f32 1.0, %v2720_v38  ;;  %v2734_v43 = vpop.eup %1574  ;;  %v881_v27 = vsel %vm880_vm3, %v2590_v44, %v879_v56 }
  0xbf   : > { %v1426_v3 = vclamps-f32 %v2725_v10, 0.9999  ;;  %v2747_v21 = vsel %vm882_vm4, %v883_v22, %v881_v27  ;;  %v996_v16 = vstv %s2705_s17  ;;  %v938_v33 = vmul.f32 %v2734_v43, %v2677_v50  ;;  %s1664_s17 = scalar_lea.hbm %s1663_s11, 2 }
  0xc0   : > { %v720_v39 = vmul.f32 0.5, %v719_v53  ;;  %v2743_v1 = vmax.f32 %v779_v49, 0.0  ;;  %v774_v0 = vadd.f32 0.074261, %v773_v59  ;;  %v894_v15 = vmul.f32 %v2747_v21, %v2644_v42  ;;  %p1665_p13 = scmp.ne.s32.totalorder %s1663_s11, %s1664_s17 }
  0xc1   : > { %v2751_v60 = vand.u32 2147483647, %v1426_v3  ;;  %v2760_v53 = vsub.f32 %v994_v54, %v1886_v25  ;;  %v714_v44 = vadd.f32 1.5707288, %v713_v41  ;;  %v2771_v56 = vmul.f32 %v2573_v20, %v2473_v30 }
  0xc2   : > { %v721_v8 = vsub.f32 1.5, %v720_v39  ;;  %1576 = vrsqrt.f32 %v2743_v1  ;;  %v668_v39 = vsel %vm2695_vm2, %v665_v7, %v667_v62  ;;  %v2775_v54 = vmul.f32 %v2541_v45, %v2478_v34  ;;  %p1666_p0 = pnand %p1665_p13, %p1815_p5 }
  0xc3   : > { %v837_v14 = vmul.f32 -0.0187293, %v2751_v60  ;;  %v843_v22 = vsub.f32 1.0, %v2751_v60  ;;  %v2778_v59 = vsub.f32 %v996_v16, %v1864_v13  ;;  %v775_v29 = vmul.f32 %v774_v0, %v2720_v38 }
  0xc4   : > { %v722_v61 = vmul.f32 %v1571_v19, %v721_v8  ;;  %v895_v8 = vadd.f32 0.0001, %v894_v15  ;;  %v939_v27 = vmul.f32 %v2734_v43, %v938_v33  ;;  %vm2795_vm7 = vcmp.ge.f32.partialorder %v1424_v24, 0.0  ;;  %p1667_p1 = pneg %p1666_p0 }
  0xc5   : > { %v838_v7 = vadd.f32 0.074261, %v837_v14  ;;  %v2786_v41 = vmax.f32 %v843_v22, 0.0  ;;  %vm944_vm8 = vcmp.eq.f32.partialorder %v2677_v50, inf  ;;  %vm946_vm9 = vcmp.eq.f32.partialorder %v2677_v50, 0.0 }
  0xc6   : > { %v723_v19 = vmul.f32 %v722_v61, %v2640_v55  ;;  %v893_v61 = vadd.f32 %v892_v40, %v891_v2  ;;  %v947_v0 = vand.u32 2147483648, %v2677_v50  ;;  %v998_v11 = vmul.f32 %v2760_v53, %v2760_v53 }
  0xc7   : > { %1578 = vrsqrt.f32 %v2786_v41  ;;  %v776_v16 = vadd.f32 -0.2121144, %v775_v29  ;;  %v839_v33 = vmul.f32 %v838_v7, %v2751_v60  ;;  %v940_v2 = vmul.f32 0.5, %v939_v27 }
  0xc8   : > { %v725_v49 = vsel %vm724_vm5, %v2640_v55, %v723_v19  ;;  %v1577_v55 = vpop.eup %1576  ;;  %1580 = vrcp.f32 %v895_v8  ;;  %v999_v40 = vmul.f32 %v2778_v59, %v2778_v59  ;;  %v2813_v14 = vmul.f32 %v2620_v35, %v2541_v45 }
  0xc9   : > { %v728_v30 = vsel %vm726_vm6, %v727_v37, %v725_v49  ;;  %v669_v37 = vmul.f32 %v668_v39, %v2684_v6  ;;  %v782_v15 = vmul.f32 %v1577_v55, %v2743_v1  ;;  %v1058_v6 = vstv %s2762_s20 }
  0xca   : > { %v729_v24 = vmul.f32 %v728_v30, %v714_v44  ;;  %v2817_v22 = vmul.f32 %v2624_v36, %v2573_v20  ;;  %v2820_v44 = vsub.f32 %v1058_v6, %v1886_v25  ;;  %v941_v49 = vsub.f32 1.5, %v940_v2 }
  0xcb   : > { %v783_v19 = vmul.f32 %v1577_v55, %v782_v15  ;;  %v2823_v39 = vadd.f32 %v669_v37, %v2600_v52  ;;  %v2825_v29 = vadd.f32 %v999_v40, %v998_v11  ;;  %v1060_v7 = vstv %s2780_s24  ;;  %s1668_s24 = scalar_lea.hbm %s3233_s3, 4 }
  0xcc   : > { %v731_v8 = vsub.f32 3.1415927, %v729_v24  ;;  %v777_v27 = vmul.f32 %v776_v16, %v2720_v38  ;;  %v2830_v34 = vsub.f32 %v1060_v7, %v1864_v13  ;;  %vm2835_vm10 = vcmp.ge.f32.partialorder %v760_v58, 0.0  ;;  %p1670_p3 = scmp.lt.s32.totalorder %s1668_s24, %s1664_s17 }
  0xcd   : > { %v1579_v30 = vpop.eup %1578  ;;  %v784_v15 = vmul.f32 0.5, %v783_v19  ;;  %v840_v52 = vadd.f32 -0.2121144, %v839_v33  ;;  %v942_v11 = vmul.f32 %v2734_v43, %v941_v49  ;;  %1582 = vrsqrt.f32 %v2825_v29 }
  0xce   : > { %v846_v37 = vmul.f32 %v1579_v30, %v2786_v41  ;;  %vm788_vm11 = vcmp.eq.f32.partialorder %v2743_v1, inf  ;;  %vm790_vm12 = vcmp.eq.f32.partialorder %v2743_v1, 0.0  ;;  %v1062_v23 = vmul.f32 %v2820_v44, %v2820_v44  ;;  %v1581_v5 = vpop.eup %1580  ;;  %p1671_p4 = por %p1670_p3, %p1669_p2 }
  0xcf   : > { %v785_v38 = vsub.f32 1.5, %v784_v15  ;;  %v791_v58 = vand.u32 2147483648, %v2743_v1  ;;  %vm2849_vm13 = vcmp.ge.f32.partialorder %v1425_v46, 0.0  ;;  %vm852_vm14 = vcmp.eq.f32.partialorder %v2786_v41, inf }
  0xd0   : > { %v847_v43 = vmul.f32 %v1579_v30, %v846_v37  ;;  %v943_v33 = vmul.f32 %v942_v11, %v2677_v50  ;;  %v778_v2 = vadd.f32 1.5707288, %v777_v27  ;;  %v2855_v19 = vmul.f32 %v1581_v5, %v893_v61  ;;  %p1672_p7 = pnand %p1671_p4, %p1667_p1 }
  0xd1   : > { %v786_v40 = vmul.f32 %v1577_v55, %v785_v38  ;;  %v1063_v49 = vmul.f32 %v2830_v34, %v2830_v34  ;;  %v732_v18 = vsel %vm2795_vm7, %v729_v24, %v731_v8  ;;  %v841_v46 = vmul.f32 %v840_v52, %v2751_v60 }
  0xd2   : > { %v848_v7 = vmul.f32 0.5, %v847_v43  ;;  %v945_v15 = vsel %vm944_vm8, %v2677_v50, %v943_v33  ;;  %v1427_v55 = vclamps-f32 %v2855_v19, 0.9999  ;;  %vm854_vm15 = vcmp.eq.f32.partialorder %v2786_v41, 0.0 }
  0xd3   : > { %v787_v37 = vmul.f32 %v786_v40, %v2743_v1  ;;  %v2870_v61 = vsel %vm946_vm9, %v947_v0, %v945_v15  ;;  %v2872_v27 = vadd.f32 %v1063_v49, %v1062_v23  ;;  %v1583_v11 = vpop.eup %1582  ;;  %v855_v60 = vand.u32 2147483648, %v2786_v41 }
  0xd4   : > { %v849_v62 = vsub.f32 1.5, %v848_v7  ;;  %v958_v24 = vmul.f32 %v2870_v61, %v2747_v21  ;;  %v733_v8 = vmul.f32 %v732_v18, %v2687_v26  ;;  %v2886_v0 = vand.u32 2147483647, %v1427_v55 }
  0xd5   : > { %v789_v50 = vsel %vm788_vm11, %v2743_v1, %v787_v37  ;;  %v1002_v52 = vmul.f32 %v1583_v11, %v2825_v29  ;;  %1584 = vrsqrt.f32 %v2872_v27  ;;  %v842_v33 = vadd.f32 1.5707288, %v841_v46 }
  0xd6   : > { %v792_v38 = vsel %vm790_vm12, %v791_v58, %v789_v50  ;;  %v850_v23 = vmul.f32 %v1579_v30, %v849_v62  ;;  %v959_v5 = vadd.f32 0.0001, %v958_v24  ;;  %v901_v26 = vmul.f32 -0.0187293, %v2886_v0 }
  0xd7   : > { %v793_v43 = vmul.f32 %v792_v38, %v778_v2  ;;  %v907_v40 = vsub.f32 1.0, %v2886_v0  ;;  %v2899_v18 = vmul.f32 %v2624_v36, %v2541_v45  ;;  %v2903_v1 = vmul.f32 %v2620_v35, %v2573_v20 }
  0xd8   : > { %v851_v49 = vmul.f32 %v850_v23, %v2786_v41  ;;  %1586 = vrcp.f32 %v959_v5  ;;  %v762_v30 = vsel %vm2835_vm10, 1.0, %v3265_v51  ;;  %v1003_v46 = vmul.f32 %v1583_v11, %v1002_v52 }
  0xd9   : > { %v795_v58 = vsub.f32 3.1415927, %v793_v43  ;;  %v2908_v2 = vmax.f32 %v907_v40, 0.0  ;;  %v734_v7 = vadd.f32 %v733_v8, %v2823_v39  ;;  %v952_v20 = vsub.f32 %v2899_v18, %v2903_v1 }
  0xda   : > { %v853_v45 = vsel %vm852_vm14, %v2786_v41, %v851_v49  ;;  %v957_v15 = vadd.f32 %v2817_v22, %v2813_v14  ;;  %vm825_vm0 = vcmp.ge.f32.partialorder %v824_v4, 0.0  ;;  %v902_v8 = vadd.f32 0.074261, %v901_v26 }
  0xdb   : > { %v796_v6 = vsel %vm2849_vm13, %v793_v43, %v795_v58  ;;  %v856_v39 = vsel %vm854_vm15, %v855_v60, %v853_v45  ;;  %1588 = vrsqrt.f32 %v2908_v2  ;;  %v1585_v37 = vpop.eup %1584  ;;  %v1122_v50 = vstv %s2878_s5 }
  0xdc   : > { %v797_v62 = vmul.f32 %v796_v6, %v762_v30  ;;  %v857_v24 = vmul.f32 %v856_v39, %v842_v33  ;;  %vm858_vm1 = vcmp.ge.f32.partialorder %v1426_v3, 0.0  ;;  %v1004_v14 = vmul.f32 0.5, %v1003_v46 }
  0xdd   : > { %v826_v28 = vsel %vm825_vm0, 1.0, %v3265_v51  ;;  %v1066_v4 = vmul.f32 %v1585_v37, %v2872_v27  ;;  %v2934_v52 = vsub.f32 %v1122_v50, %v1886_v25  ;;  %v1124_v38 = vstv %s2894_s26 }
  0xde   : > { %v1587_v22 = vpop.eup %1586  ;;  %v798_v16 = vadd.f32 %v797_v62, %v734_v7  ;;  %v859_v17 = vsub.f32 3.1415927, %v857_v24  ;;  %v1005_v60 = vsub.f32 1.5, %v1004_v14  ;;  %v903_v5 = vmul.f32 %v902_v8, %v2886_v0 }
  0xdf   : > { %v2931_v41 = vmul.f32 %v1587_v22, %v957_v15  ;;  %vm1008_vm2 = vcmp.eq.f32.partialorder %v2825_v29, inf  ;;  %v1067_v10 = vmul.f32 %v1585_v37, %v1066_v4  ;;  %vm1010_vm3 = vcmp.eq.f32.partialorder %v2825_v29, 0.0 }
  0xe0   : > { %v860_v23 = vsel %vm858_vm1, %v857_v24, %v859_v17  ;;  %v1006_v26 = vmul.f32 %v1583_v11, %v1005_v60  ;;  %v1011_v49 = vand.u32 2147483648, %v2825_v29  ;;  %v2944_v30 = vsub.f32 %v1124_v38, %v1864_v13 }
  0xe1   : > { %v1589_v3 = vpop.eup %1588  ;;  %v861_v43 = vmul.f32 %v860_v23, %v826_v28  ;;  %v1428_v33 = vclamps-f32 %v2931_v41, 0.9999  ;;  %v1068_v25 = vmul.f32 0.5, %v1067_v10  ;;  %v1126_v11 = vmul.f32 %v2934_v52, %v2934_v52 }
  0xe2   : > { %v910_v40 = vmul.f32 %v1589_v3, %v2908_v2  ;;  %v1007_v7 = vmul.f32 %v1006_v26, %v2825_v29  ;;  %v904_v45 = vadd.f32 -0.2121144, %v903_v5  ;;  %v1127_v39 = vmul.f32 %v2944_v30, %v2944_v30 }
  0xe3   : > { %v2946_v58 = vadd.f32 %v861_v43, %v798_v16  ;;  %v2950_v46 = vand.u32 2147483647, %v1428_v33  ;;  %v1069_v6 = vsub.f32 1.5, %v1068_v25  ;;  %v2968_v14 = vmul.f32 %v2778_v59, %v2620_v35 }
  0xe4   : > { %v911_v15 = vmul.f32 %v1589_v3, %v910_v40  ;;  %v1009_v24 = vsel %vm1008_vm2, %v2825_v29, %v1007_v7  ;;  %v2972_v22 = vmul.f32 %v2760_v53, %v2624_v36  ;;  %v1019_v28 = vmul.f32 %v2760_v53, %v2620_v35 }
  0xe5   : > { %v965_v13 = vmul.f32 -0.0187293, %v2950_v46  ;;  %v971_v62 = vsub.f32 1.0, %v2950_v46  ;;  %v2964_v50 = vsel %vm1010_vm3, %v1011_v49, %v1009_v24  ;;  %v1070_v4 = vmul.f32 %v1585_v37, %v1069_v6 }
  0xe6   : > { %v912_v8 = vmul.f32 0.5, %v911_v15  ;;  %v1022_v17 = vmul.f32 %v2964_v50, %v2870_v61  ;;  %v905_v29 = vmul.f32 %v904_v45, %v2886_v0  ;;  %v1016_v38 = vsub.f32 %v2968_v14, %v2972_v22 }
  0xe7   : > { %v2974_v16 = vmax.f32 %v971_v62, 0.0  ;;  %v2983_v23 = vadd.f32 %v1127_v39, %v1126_v11  ;;  %v966_v5 = vadd.f32 0.074261, %v965_v13  ;;  %v1020_v10 = vmul.f32 %v2778_v59, %v2624_v36 }
  0xe8   : > { %v913_v60 = vsub.f32 1.5, %v912_v8  ;;  %vm1072_vm4 = vcmp.eq.f32.partialorder %v2872_v27, inf  ;;  %v1023_v43 = vadd.f32 0.0001, %v1022_v17  ;;  %vm1074_vm5 = vcmp.eq.f32.partialorder %v2872_v27, 0.0 }
  0xe9   : > { %1590 = vrsqrt.f32 %v2974_v16  ;;  %v1075_v0 = vand.u32 2147483648, %v2872_v27  ;;  %vm916_vm6 = vcmp.eq.f32.partialorder %v2908_v2, inf  ;;  %v919_v37 = vand.u32 2147483648, %v2908_v2 }
  0xea   : > { %v914_v35 = vmul.f32 %v1589_v3, %v913_v60  ;;  %v1071_v26 = vmul.f32 %v1070_v4, %v2872_v27  ;;  %1592 = vrsqrt.f32 %v2983_v23  ;;  %v906_v40 = vadd.f32 1.5707288, %v905_v29 }
  0xeb   : > { %vm918_vm7 = vcmp.eq.f32.partialorder %v2908_v2, 0.0  ;;  %1594 = vrcp.f32 %v1023_v43  ;;  %v3288_v36 = vsub.f32 %v2771_v56, %v2775_v54  ;;  %v967_v3 = vmul.f32 %v966_v5, %v2950_v46 }
  0xec   : > { %v915_v49 = vmul.f32 %v914_v35, %v2908_v2  ;;  %v1073_v25 = vsel %vm1072_vm4, %v2872_v27, %v1071_v26  ;;  %v1021_v6 = vadd.f32 %v1020_v10, %v1019_v28  ;;  %vm922_vm9 = vcmp.ge.f32.partialorder %v1427_v55, 0.0 }
  0xed   : > { %vm889_vm8 = vcmp.ge.f32.partialorder %v3288_v36, 0.0  ;;  %v3003_v11 = vsel %vm1074_vm5, %v1075_v0, %v1073_v25  ;;  %v968_v27 = vadd.f32 -0.2121144, %v967_v3  ;;  %v1084_v4 = vmul.f32 %v2830_v34, %v2778_v59 }
  0xee   : > { %v917_v7 = vsel %vm916_vm6, %v2908_v2, %v915_v49  ;;  %v1086_v39 = vmul.f32 %v3003_v11, %v2964_v50  ;;  %v890_v13 = vsel %vm889_vm8, 1.0, %v3265_v51  ;;  %v1083_v2 = vmul.f32 %v2820_v44, %v2760_v53 }
  0xef   : > { %v1591_v45 = vpop.eup %1590  ;;  %v920_v15 = vsel %vm918_vm7, %v919_v37, %v917_v7  ;;  %v969_v35 = vmul.f32 %v968_v27, %v2950_v46  ;;  %vm980_vm10 = vcmp.eq.f32.partialorder %v2974_v16, inf  ;;  %vm982_vm11 = vcmp.eq.f32.partialorder %v2974_v16, 0.0 }
  0xf0   : > { %v921_v62 = vmul.f32 %v920_v15, %v906_v40  ;;  %v974_v56 = vmul.f32 %v1591_v45, %v2974_v16  ;;  %v1593_v54 = vpop.eup %1592  ;;  %v1087_v24 = vadd.f32 0.0001, %v1086_v39  ;;  %v1085_v37 = vadd.f32 %v1084_v4, %v1083_v2 }
  0xf1   : > { %v1595_v8 = vpop.eup %1594  ;;  %v1130_v29 = vmul.f32 %v1593_v54, %v2983_v23  ;;  %v3027_v3 = vmul.f32 %v2830_v34, %v2760_v53  ;;  %v3031_v46 = vmul.f32 %v2820_v44, %v2778_v59  ;;  %v970_v15 = vadd.f32 1.5707288, %v969_v35 }
  0xf2   : > { %v923_v17 = vsub.f32 3.1415927, %v921_v62  ;;  %v975_v28 = vmul.f32 %v1591_v45, %v974_v56  ;;  %v3016_v60 = vmul.f32 %v1595_v8, %v1021_v6  ;;  %1596 = vrcp.f32 %v1087_v24 }
  0xf3   : > { %v1131_v19 = vmul.f32 %v1593_v54, %v1130_v29  ;;  %vm953_vm12 = vcmp.ge.f32.partialorder %v952_v20, 0.0  ;;  %vm1136_vm13 = vcmp.eq.f32.partialorder %v2983_v23, inf  ;;  %v1139_v24 = vand.u32 2147483648, %v2983_v23 }
  0xf4   : > { %v924_v5 = vsel %vm922_vm9, %v921_v62, %v923_v17  ;;  %v976_v10 = vmul.f32 0.5, %v975_v28  ;;  %v1429_v43 = vclamps-f32 %v3016_v60, 0.9999  ;;  %vm1138_vm14 = vcmp.eq.f32.partialorder %v2983_v23, 0.0 }
  0xf5   : > { %v925_v55 = vmul.f32 %v924_v5, %v890_v13  ;;  %v1132_v26 = vmul.f32 0.5, %v1131_v19  ;;  %vm986_vm15 = vcmp.ge.f32.partialorder %v1428_v33, 0.0  ;;  %v954_v17 = vsel %vm953_vm12, 1.0, %v3265_v51 }
  0xf6   : > { %v977_v0 = vsub.f32 1.5, %v976_v10  ;;  %v1028_v49 = vand.u32 2147483647, %v1429_v43  ;;  %v3069_v41 = vmul.f32 %v2944_v30, %v2820_v44  ;;  %v3073_v33 = vmul.f32 %v2934_v52, %v2830_v34 }
  0xf7   : > { %v926_v40 = vadd.f32 %v925_v55, %v2946_v58  ;;  %v1133_v25 = vsub.f32 1.5, %v1132_v26  ;;  %v983_v58 = vand.u32 2147483648, %v2974_v16  ;;  %v309_v55 = vmin.f32 %v2023_v63, %v2033_v9 }
  0xf8   : > { %v978_v36 = vmul.f32 %v1591_v45, %v977_v0  ;;  %v1597_v7 = vpop.eup %1596  ;;  %v1029_v6 = vmul.f32 -0.0187293, %v1028_v49  ;;  %v1035_v39 = vsub.f32 1.0, %v1028_v49  ;;  %v1080_v45 = vsub.f32 %v3027_v3, %v3031_v46 }
  0xf9   : > { %v3037_v62 = vmul.f32 %v1597_v7, %v1085_v37  ;;  %v1134_v53 = vmul.f32 %v1593_v54, %v1133_v25  ;;  %v1144_v26 = vsub.f32 %v3069_v41, %v3073_v33  ;;  %v1147_v9 = vmul.f32 %v2934_v52, %v2820_v44 }
  0xfa   : > { %v979_v13 = vmul.f32 %v978_v36, %v2974_v16  ;;  %v3042_v59 = vmax.f32 %v1035_v39, 0.0  ;;  %v1030_v8 = vadd.f32 0.074261, %v1029_v6  ;;  %v1148_v39 = vmul.f32 %v2944_v30, %v2830_v34 }
  0xfb   : > { %v1430_v27 = vclamps-f32 %v3037_v62, 0.9999  ;;  %v1135_v2 = vmul.f32 %v1134_v53, %v2983_v23  ;;  %vm1017_vm2 = vcmp.ge.f32.partialorder %v1016_v38, 0.0  ;;  %vm1050_vm3 = vcmp.ge.f32.partialorder %v1429_v43, 0.0 }
  0xfc   : > { %v981_v56 = vsel %vm980_vm10, %v2974_v16, %v979_v13  ;;  %1598 = vrsqrt.f32 %v3042_v59  ;;  %v1031_v4 = vmul.f32 %v1030_v8, %v1028_v49  ;;  %v373_v13 = vmin.f32 %v309_v55, %v2045_v12 }
  0xfd   : > { %v984_v54 = vsel %vm982_vm11, %v983_v58, %v981_v56  ;;  %v3059_v1 = vand.u32 2147483647, %v1430_v27  ;;  %v1137_v20 = vsel %vm1136_vm13, %v2983_v23, %v1135_v2  ;;  %v3289_v2 = vld [vmem:[#allocation15_spill] sm:$0xff]  ;;  %v1149_v44 = vadd.f32 %v1148_v39, %v1147_v9 }
  0xfe   : > { %v985_v18 = vmul.f32 %v984_v54, %v970_v15  ;;  %v3063_v16 = vsel %vm1138_vm14, %v1139_v24, %v1137_v20  ;;  %v1032_v15 = vadd.f32 -0.2121144, %v1031_v4  ;;  %vm1044_vm0 = vcmp.eq.f32.partialorder %v3042_v59, inf }
  0xff   : > { %v1093_v29 = vmul.f32 -0.0187293, %v3059_v1  ;;  %v1099_v5 = vsub.f32 1.0, %v3059_v1  ;;  %v1150_v23 = vmul.f32 %v3063_v16, %v3003_v11  ;;  %v1192_v25 = vmul.f32 %v3063_v16, %v2023_v63 }
 0x100   : > { %v987_v28 = vsub.f32 3.1415927, %v985_v18  ;;  %v1189_v63 = vmul.f32 %v2934_v52, %v3289_v2  ;;  %v1033_v54 = vmul.f32 %v1032_v15, %v1028_v49  ;;  %vm1046_vm1 = vcmp.eq.f32.partialorder %v3042_v59, 0.0 }
 0x101   : > { %v3079_v0 = vmax.f32 %v1099_v5, 0.0  ;;  %v1151_v36 = vadd.f32 0.0001, %v1150_v23  ;;  %v1094_v58 = vadd.f32 0.074261, %v1093_v29  ;;  %v1047_v49 = vand.u32 2147483648, %v3042_v59 }
 0x102   : > { %v988_v10 = vsel %vm986_vm15, %v985_v18, %v987_v28  ;;  %v1599_v19 = vpop.eup %1598  ;;  %v1193_v53 = vadd.f32 0.0001, %v1192_v25  ;;  %v1034_v5 = vadd.f32 1.5707288, %v1033_v54  ;;  %v3117_v15 = vmul.f32 %v2944_v30, %v3289_v2 }
 0x103   : > { %v989_v35 = vmul.f32 %v988_v10, %v954_v17  ;;  %v1038_v37 = vmul.f32 %v1599_v19, %v3042_v59  ;;  %1600 = vrsqrt.f32 %v3079_v0  ;;  %v1095_v8 = vmul.f32 %v1094_v58, %v3059_v1  ;;  %v3291_v17 = vld [vmem:[#allocation16_spill] sm:$0xff] }
 0x104   : > { %1602 = vrcp.f32 %v1151_v36  ;;  %v437_v34 = vmin.f32 %v373_v13, %v3291_v17  ;;  %v3292_v36 = vld [vmem:[#allocation17_spill] sm:$0xff]  ;;  %vm1108_vm4 = vcmp.eq.f32.partialorder %v3079_v0, inf  ;;  %vm1110_vm5 = vcmp.eq.f32.partialorder %v3079_v0, 0.0 }
 0x105   : > { %v3086_v7 = vadd.f32 %v989_v35, %v926_v40  ;;  %v1039_v6 = vmul.f32 %v1599_v19, %v1038_v37  ;;  %v3290_v40 = vld [vmem:[#allocation14_spill] sm:$0xff]  ;;  %1604 = vrcp.f32 %v1193_v53  ;;  %v1096_v10 = vadd.f32 -0.2121144, %v1095_v8 }
 0x106   : > { %v1190_v24 = vmul.f32 %v2944_v30, %v3290_v40  ;;  %v501_v25 = vmin.f32 %v437_v34, %v3292_v36  ;;  %vm1081_vm6 = vcmp.ge.f32.partialorder %v1080_v45, 0.0  ;;  %vm1114_vm7 = vcmp.ge.f32.partialorder %v1430_v27, 0.0 }
 0x107   : > { %v1040_v56 = vmul.f32 0.5, %v1039_v6  ;;  %v1097_v14 = vmul.f32 %v1096_v10, %v3059_v1  ;;  %v1111_v1 = vand.u32 2147483648, %v3079_v0  ;;  %vm1145_vm10 = vcmp.ge.f32.partialorder %v1144_v26, 0.0 }
 0x108   : > { %v1191_v4 = vadd.f32 %v1190_v24, %v1189_v63  ;;  %v565_v38 = vmin.f32 %v501_v25, %v2147_v47 }
 0x109   : > { %v1041_v18 = vsub.f32 1.5, %v1040_v56  ;;  %v1601_v20 = vpop.eup %1600  ;;  %v1098_v8 = vadd.f32 1.5707288, %v1097_v14 }
 0x10a   : > { %v1102_v12 = vmul.f32 %v1601_v20, %v3079_v0  ;;  %v1603_v29 = vpop.eup %1602 }
 0x10b   : > { %v1042_v28 = vmul.f32 %v1599_v19, %v1041_v18  ;;  %v3105_v35 = vmul.f32 %v1603_v29, %v1149_v44  ;;  %v3109_v19 = vmul.f32 %v2934_v52, %v3290_v40  ;;  %v1605_v37 = vpop.eup %1604 }
 0x10c   : > { %v1103_v55 = vmul.f32 %v1601_v20, %v1102_v12  ;;  %v3123_v52 = vmul.f32 %v1605_v37, %v1191_v4  ;;  %v629_v4 = vmin.f32 %v565_v38, %v2304_v57 }
 0x10d   : > { %v1043_v23 = vmul.f32 %v1042_v28, %v3042_v59  ;;  %v1431_v9 = vclamps-f32 %v3105_v35, 0.9999  ;;  %v1186_v13 = vsub.f32 %v3109_v19, %v3117_v15 }
 0x10e   : > { %v1104_v6 = vmul.f32 0.5, %v1103_v55  ;;  %v1432_v56 = vclamps-f32 %v3123_v52, 0.9999 }
 0x10f   : > { %v1045_v58 = vsel %vm1044_vm0, %v3042_v59, %v1043_v23  ;;  %v1156_v30 = vand.u32 2147483647, %v1431_v9  ;;  %v1018_v59 = vsel %vm1017_vm2, 1.0, %v3265_v51  ;;  %vm1178_vm13 = vcmp.ge.f32.partialorder %v1431_v9, 0.0 }
 0x110   : > { %v1048_v39 = vsel %vm1046_vm1, %v1047_v49, %v1045_v58  ;;  %v1105_v22 = vsub.f32 1.5, %v1104_v6  ;;  %v1198_v47 = vand.u32 2147483647, %v1432_v56  ;;  %v1082_v49 = vsel %vm1081_vm6, 1.0, %v3265_v51 }
 0x111   : > { %v1049_v53 = vmul.f32 %v1048_v39, %v1034_v5  ;;  %v1163_v40 = vsub.f32 1.0, %v1156_v30  ;;  %v1157_v24 = vmul.f32 -0.0187293, %v1156_v30  ;;  %vm1187_vm14 = vcmp.ge.f32.partialorder %v1186_v13, 0.0 }
 0x112   : > { %v1106_v63 = vmul.f32 %v1601_v20, %v1105_v22  ;;  %v1205_v44 = vsub.f32 1.0, %v1198_v47  ;;  %v1199_v12 = vmul.f32 -0.0187293, %v1198_v47  ;;  %vm1220_vm15 = vcmp.ge.f32.partialorder %v1432_v56, 0.0 }
 0x113   : > { %v1051_v2 = vsub.f32 3.1415927, %v1049_v53  ;;  %v1164_v43 = vmax.f32 %v1163_v40, 0.0  ;;  %v1158_v28 = vadd.f32 0.074261, %v1157_v24  ;;  %vm1230_vm0 = vcmask 1041408  }
 0x114   : > { %v1107_v60 = vmul.f32 %v1106_v63, %v3079_v0  ;;  %v1206_v5 = vmax.f32 %v1205_v44, 0.0  ;;  %v1200_v46 = vadd.f32 0.074261, %v1199_v12 }
 0x115   : > { %v1052_v54 = vsel %vm1050_vm3, %v1049_v53, %v1051_v2  ;;  %1606 = vrsqrt.f32 %v1164_v43  ;;  %v1159_v3 = vmul.f32 %v1158_v28, %v1156_v30  ;;  %vm1172_vm8 = vcmp.eq.f32.partialorder %v1164_v43, inf }
 0x116   : > { %v1053_v18 = vmul.f32 %v1052_v54, %v1018_v59  ;;  %v1109_v20 = vsel %vm1108_vm4, %v3079_v0, %v1107_v60  ;;  %1608 = vrsqrt.f32 %v1206_v5  ;;  %v693_v0 = vmin.f32 %v629_v4, %v2422_v32 }
 0x117   : > { %v1112_v34 = vsel %vm1110_vm5, %v1111_v1, %v1109_v20  ;;  %v1160_v36 = vadd.f32 -0.2121144, %v1159_v3  ;;  %v1201_v25 = vmul.f32 %v1200_v46, %v1198_v47  ;;  %vm1174_vm9 = vcmp.eq.f32.partialorder %v1164_v43, 0.0 }
 0x118   : > { %v1054_v17 = vadd.f32 %v1053_v18, %v3086_v7  ;;  %v1113_v29 = vmul.f32 %v1112_v34, %v1098_v8  ;;  %v757_v62 = vmin.f32 %v693_v0, %v2515_v31  ;;  %v1175_v2 = vand.u32 2147483648, %v1164_v43 }
 0x119   : > { %v1161_v39 = vmul.f32 %v1160_v36, %v1156_v30  ;;  %v1202_v14 = vadd.f32 -0.2121144, %v1201_v25  ;;  %vm1214_vm11 = vcmp.eq.f32.partialorder %v1206_v5, inf  ;;  %vm1216_vm12 = vcmp.eq.f32.partialorder %v1206_v5, 0.0 }
 0x11a   : > { %v1115_v10 = vsub.f32 3.1415927, %v1113_v29  ;;  %v821_v38 = vmin.f32 %v757_v62, %v2609_v48  ;;  %v1217_v48 = vand.u32 2147483648, %v1206_v5 }
 0x11b   : > { %v1607_v45 = vpop.eup %1606  ;;  %v1162_v63 = vadd.f32 1.5707288, %v1161_v39  ;;  %v1203_v1 = vmul.f32 %v1202_v14, %v1198_v47 }
 0x11c   : > { %v1116_v7 = vsel %vm1114_vm7, %v1113_v29, %v1115_v10  ;;  %v1166_v55 = vmul.f32 %v1607_v45, %v1164_v43  ;;  %v1609_v58 = vpop.eup %1608  ;;  %v885_v54 = vmin.f32 %v821_v38, %v2644_v42  ;;  %v1146_v42 = vsel %vm1145_vm10, 1.0, %v3265_v51 }
 0x11d   : > { %v1117_v23 = vmul.f32 %v1116_v7, %v1082_v49  ;;  %v1208_v6 = vmul.f32 %v1609_v58, %v1206_v5  ;;  %v1204_v18 = vadd.f32 1.5707288, %v1203_v1 }
 0x11e   : > { %v1167_v57 = vmul.f32 %v1607_v45, %v1166_v55  ;;  %v949_v20 = vmin.f32 %v885_v54, %v2747_v21  ;;  %v1188_v21 = vsel %vm1187_vm14, 1.0, %v3265_v51 }
 0x11f   : > { %v1118_v37 = vadd.f32 %v1117_v23, %v1054_v17  ;;  %v1209_v22 = vmul.f32 %v1609_v58, %v1208_v6 }
 0x120   : > { %v1168_v27 = vmul.f32 0.5, %v1167_v57  ;;  %v1013_v17 = vmin.f32 %v949_v20, %v2870_v61 }
 0x121   : > { %v1210_v32 = vmul.f32 0.5, %v1209_v22 }
 0x122   : > { %v1169_v53 = vsub.f32 1.5, %v1168_v27  ;;  %v1077_v12 = vmin.f32 %v1013_v17, %v2964_v50 }
 0x123   : > { %v1211_v24 = vsub.f32 1.5, %v1210_v32 }
 0x124   : > { %v1170_v59 = vmul.f32 %v1607_v45, %v1169_v53  ;;  %v1141_v15 = vmin.f32 %v1077_v12, %v3003_v11 }
 0x125   : > { %v1212_v8 = vmul.f32 %v1609_v58, %v1211_v24 }
 0x126   : > { %v1171_v40 = vmul.f32 %v1170_v59, %v1164_v43  ;;  %v1183_v52 = vmin.f32 %v1141_v15, %v3063_v16 }
 0x127   : > { %v1213_v44 = vmul.f32 %v1212_v8, %v1206_v5 }
 0x128   : > { %v1173_v31 = vsel %vm1172_vm8, %v1164_v43, %v1171_v40 }
 0x129   : > { %v1176_v30 = vsel %vm1174_vm9, %v1175_v2, %v1173_v31  ;;  %v1215_v43 = vsel %vm1214_vm11, %v1206_v5, %v1213_v44 }
 0x12a   : > { %v1177_v60 = vmul.f32 %v1176_v30, %v1162_v63  ;;  %v1218_v41 = vsel %vm1216_vm12, %v1217_v48, %v1215_v43 }
 0x12b   : > { %v1219_v26 = vmul.f32 %v1218_v41, %v1204_v18 }
 0x12c   : > { %v1179_v47 = vsub.f32 3.1415927, %v1177_v60 }
 0x12d   : > { %v1221_v35 = vsub.f32 3.1415927, %v1219_v26 }
 0x12e   : > { %v1180_v33 = vsel %vm1178_vm13, %v1177_v60, %v1179_v47 }
 0x12f   : > { %v1181_v34 = vmul.f32 %v1180_v33, %v1146_v42  ;;  %v1222_v28 = vsel %vm1220_vm15, %v1219_v26, %v1221_v35 }
 0x130   : > { %v1223_v4 = vmul.f32 %v1222_v28, %v1188_v21 }
 0x131   : > { %v1182_v9 = vadd.f32 %v1181_v34, %v1118_v37 }
 0x133   : > { %v1224_v19 = vadd.f32 %v1223_v4, %v1182_v9 }
 0x135   : > { %v1225_v13 = vand.u32 2147483647, %v1224_v19 }
 0x137   : > { %v1226_v61 = vmul.f32 0.15915494, %v1225_v13 }
 0x139   : > { %v1227_v51 = vmax.f32 %v1226_v61, 0.0 }
 0x13b   : > { %v3175_v56 = vmin.f32 %v1227_v51, 1.0 }
 0x13d   : > { %v1229_v50 = vmul.f32 %v3175_v56, %v1183_v52  ;;  %1267 = vst [vmem:[%s186_s29] sm:$0x3] %v3175_v56 }
 0x13f   : > { %v1231_v11 = vsel %vm1230_vm0, %v1229_v50, -inf }
 0x140   : > { %1232 = vmax.xlane.f32.xlu0 %v1231_v11 }
 0x141   : > { %1675 = shalt.err (!%p1672_p7)
}
 0x142   : > { %1455 = dma.vmem_to_hbm [thread:$0]  (%p1815_p5), %s1304_s8, 32, %s1306_s9, %s1274_s10  }
 0x143   : > { %s1442_s28 = smul.u32 6, %s3171_s27  ;;  %s1696_s20 = scalar_lea.hbm %s3232_s2, 12 }
 0x144   : > { %s1445_s29 = smul.u32 6, %s1798_s16  ;;  %s1269_s16 = scalar_lea.sflag [#allocation3], %s3171_s27 }
 0x145   : > { %s179_s7 = scalar_lea.vmem [#allocation7], %s1442_s28 }
 0x146   : > { %s1285_s6 = scalar_lea.hbm %s3232_s2, %s1445_s29  ;;  %s1286_s8 = sshll.u32 %s179_s7, 4  ;;  %s1287_s8 = int_to_ptr.vmem [resolvable:$true] %s1286_s8 }
 0x147   : > { %s1288_s9 = sshll.u32 %s1285_s6, 4  ;;  %s1289_s9 = int_to_ptr.hbm [resolvable:$true] %s1288_s9 }
 0x148   : > { %s1690_s10 = sshra.s32 %s1289_s9, 4  ;;  %s1691_s10 = int_to_ptr.hbm [resolvable:$true] %s1690_s10 }
 0x149   : > { %s1692_s11 = scalar_lea.hbm %s1691_s10, 6  ;;  %p1697_p11 = scmp.lt.s32.totalorder %s1691_s10, %s3232_s2 }
 0x14a   : > { %p1693_p8 = scmp.ne.s32.totalorder %s1691_s10, %s1692_s11  ;;  %p1698_p12 = scmp.lt.s32.totalorder %s1696_s20, %s1692_s11 }
 0x14c   : > { %p1694_p9 = pnand %p1693_p8, %p1815_p5  ;;  %p1699_p13 = por %p1698_p12, %p1697_p11 }
 0x14e   : > { %p1695_p10 = pneg %p1694_p9 }
 0x150   : > { %p1700_p0 = pnand %p1699_p13, %p1695_p10 }
 0x1b3   : > { %v1233_v16 = vpop.xlane.xlu0 %1232 }
 0x1b4   : > { %v1234_v29 = vrot.slane %v1233_v16, 4 }
 0x1b6   : > { %v1235_v5 = vmax.f32 %v1233_v16, %v1234_v29 }
 0x1b8   : > { %v1236_v49 = vrot.slane %v1235_v5, 2 }
 0x1ba   : > { %v1237_v10 = vmax.f32 %v1235_v5, %v1236_v49 }
 0x1bc   : > { %v1238_v3 = vrot.slane %v1237_v10, 1 }
 0x1be   : > { %v1239_v46 = vmax.f32 %v1237_v10, %v1238_v3 }
 0x1c0   : > { %1443 = vpush %v1239_v46 }
 0x1f1   : > { %s1444_s26 = spop %1443 }
 0x1f2   : > { %v1241_v45 = vstv %s1444_s26 }
 0x1f3   : > { %v1242_v0 = vadd.f32 0.0001, %v1241_v45 }
 0x1f5   : > { %1610 = vrcp.f32 %v1242_v0 }
 0x1fb   : > { %v1611_v7 = vpop.eup %1610 }
 0x1fc   : > { %v1244_v23 = vmul.f32 %v1611_v7, %v1229_v50 }
 0x1fe   : > { %v1245_v55 = vmul.f32 %v1244_v23, %v1244_v23  ;;  %v1433_v37 = vadd.f32 -0.5, %v1244_v23  ;;  %v1435_v36 = vadd.f32 -1.0, %v1244_v23 }
 0x200   : > { %v1246_v57 = vmul.f32 -22.18071, %v1245_v55  ;;  %v1252_v25 = vmul.f32 %v1433_v37, %v1433_v37  ;;  %v1260_v58 = vmul.f32 %v1435_v36, %v1435_v36 }
 0x202   : > { %v1247_v62 = vmul.f32 1.442695, %v1246_v57  ;;  %v1253_v27 = vmul.f32 -22.18071, %v1252_v25  ;;  %v1261_v6 = vmul.f32 -22.18071, %v1260_v58 }
 0x204   : > { %1612 = vpow2.f32 %v1247_v62  ;;  %v1254_v39 = vmul.f32 1.442695, %v1253_v27  ;;  %v1262_v53 = vmul.f32 1.442695, %v1261_v6 }
 0x206   : > { %1614 = vpow2.f32 %v1254_v39 }
 0x207   : > { %1616 = vpow2.f32 %v1262_v53 }
 0x20a   : > { %v1613_v14 = vpop.eup %1612 }
 0x20b   : > { %v1249_v22 = vmul.f32 %v1613_v14, %v3175_v56 }
 0x20c   : > { %v1615_v38 = vpop.eup %1614 }
 0x20d   : > { %v1617_v59 = vpop.eup %1616  ;;  %1250 = vst [vmem:[%s179_s7] sm:$0x3] %v1249_v22  ;;  %v1256_v32 = vmul.f32 %v1615_v38, %v3175_v56 }
 0x20e   : > { %v1264_v2 = vmul.f32 %v1617_v59, %v3175_v56 }
 0x20f   : > { %1434 = vst [vmem:[%s179_s7 + $0x2] sm:$0x3] %v1256_v32 }
 0x210   : > { %1436 = vst [vmem:[%s179_s7 + $0x4] sm:$0x3] %v1264_v2 }
 0x211   : > { %1703 = shalt.err (!%p1700_p0)
}
 0x212   : > { %s1755_s27 = smov 32   ;;  %s1756_s5 = smov 2  }
 0x213   : > { %1454 = dma.vmem_to_hbm [thread:$0]  (%p1815_p5), %s1287_s8, 96, %s1289_s9, %s1269_s16, %s1755_s27, %s1755_s27, %s1756_s5  }
 0x214 PF: > { %p1476_p1 = scmp.ge.s32.totalorder %s1750_s15, 2  ;;  %s1317_s26 = sand.u32 1, %s1738_s12  }
 0x215   : > { %s1318_s28 = scalar_lea.sflag [#allocation3], %s1317_s26 }
 0x216   : > { %p1466_p2 = pnand %p1476_p1, %p1819_p6 }
 0x218   : > { %p1467_p3 = pneg %p1466_p2 }
 0x21a   : > { %1729 = dma.done.wait (%p1467_p3), %s1318_s28, 96  }
 0x21b   : > { %1731 = vsyncadd (%p1467_p3), %s1318_s28, 4294967200  ;;  %s1328_s29 = scalar_lea.sflag [#allocation9], %s1317_s26 }
 0x21c   : > { %1733 = dma.done.wait (%p1467_p3), %s1328_s29, 32  }
 0x21d   : > { %1735 = vsyncadd (%p1467_p3), %s1328_s29, 4294967264  ;;  %p19_p5 = scmp.ge.s32.totalorder %s1802_s18, 4   ;;  %s3293_s12 = smov %s1742_s13 }
 0x21e   : > { %s3294_s13 = smov %s1746_s14  ;;  %s3295_s14 = smov %s1813_s21 }
 0x21f   : > { %s3296_s15 = smov %s1802_s18  ;;  %21 = sbr.rel (!%p19_p5) target bundleno = 7 (0x7), region = 88 }
 0x224   :  { %1334 = vsyncpa [#allocation3], 1 }
 0x225   :  { %1336 = vsyncpa [#allocation3 + $0x1], 1 }
 0x226   :  { %1337 = vsyncpa [#allocation9], 1 }
 0x227   :  { %1339 = vsyncpa [#allocation9 + $0x1], 1 }
 0x228   :  { %1340 = vsyncpa [#allocation4], 1 }
 0x229   :  { %1342 = vsyncpa [#allocation4 + $0x1], 1 }
 0x22a   :  { %1343 = vsyncpa [#allocation6], 1 }

</bundles_post_ra>
